<compile_context>
chip_gen: v6e
topology: v6e:2x2x1
jax: 0.10.0
libtpu: 0.0.40
codegen_flags: <defaults>
</compile_context>

<pallas_src>
import functools

import jax
import jax.numpy as jnp
from jax.experimental import pallas as pl
from jax.experimental.pallas import tpu as pltpu

LRELU_SLOPE = 0.2
IN_EPS = 1e-5          # nn.InstanceNorm2d default eps (affine=False, no running stats)

_TM = 256              # M (= Ho*Wo) tile rows          (multiple of 8)
_TN = 128              # Cout tile (lane-dense; 128 also suits v5e's 128-wide MXU)
_THW = 256             # HW tile for the instance-norm kernels

STRIDES = (2, 2, 2, 1, 1)
PAD = 1


def _round_up(x, m):
    return (x + m - 1) // m * m


def _vmem_limit_bytes():
    cap = 64 * 1024 * 1024                      # conservative fallback (v7x-sized)
    try:
        cap = int(pltpu.get_tpu_info().vmem_capacity_bytes)
    except Exception:
        pass
    # Leave headroom for double-buffering / compiler scratch.
    return int(min((cap * 3) // 4, 96 * 1024 * 1024))


_VMEM_LIMIT = _vmem_limit_bytes()


# ----------------------------- Pallas kernels -------------------------------

def _conv_mm_kernel(a_ref, w_ref, b_ref, o_ref, acc_ref, *, apply_lrelu):
    """One (tm, tn) output tile: acc += A_tile @ W_tile; epilogue adds bias (+LeakyReLU)."""
    k = pl.program_id(3)

    @pl.when(k == 0)
    def _():
        acc_ref[...] = jnp.zeros_like(acc_ref)

    acc_ref[...] += jnp.dot(a_ref[0], w_ref[...],
                            preferred_element_type=jnp.float32)

    @pl.when(k == pl.num_programs(3) - 1)
    def _():
        y = acc_ref[...] + b_ref[...]
        if apply_lrelu:
            y = jnp.where(y >= 0, y, LRELU_SLOPE * y)
        o_ref[0] = y


def _in_stats_kernel(x_ref, stats_ref, sum_sc, sq_sc, *, hw_true, thw):
    """Accumulate per-(n, c) sum / sum-of-squares over HW tiles; emit mean & rstd."""
    h = pl.program_id(1)

    @pl.when(h == 0)
    def _():
        sum_sc[...] = jnp.zeros_like(sum_sc)
        sq_sc[...] = jnp.zeros_like(sq_sc)

    x = x_ref[0]                                            # (thw, Cp) f32
    if hw_true % thw != 0:                                  # static check: mask padded rows
        row = h * thw + jax.lax.broadcasted_iota(jnp.int32, x.shape, 0)
        x = jnp.where(row < hw_true, x, 0.0)
    sum_sc[...] += jnp.sum(x, axis=0, keepdims=True)
    sq_sc[...] += jnp.sum(x * x, axis=0, keepdims=True)

    @pl.when(h == pl.num_programs(1) - 1)
    def _():
        inv_n = 1.0 / float(hw_true)
        mean = sum_sc[...] * inv_n
        var = sq_sc[...] * inv_n - mean * mean              # biased variance (IN semantics)
        rstd = jax.lax.rsqrt(var + IN_EPS)
        stats_ref[0] = jnp.concatenate([mean, rstd], axis=0)


def _in_norm_kernel(x_ref, stats_ref, o_ref):
    """y = (x - mean) * rstd ; LeakyReLU(0.2)."""
    x = x_ref[0]                                            # (thw, Cp)
    st = stats_ref[0]                                       # (2, Cp): [mean; rstd]
    y = (x - st[0:1, :]) * st[1:2, :]
    o_ref[0] = jnp.where(y >= 0, y, LRELU_SLOPE * y)


# ------------------------------- wrappers ------------------------------------

def _im2col(x, k, stride, pad):
    """x: (N, H, W, C) -> (N, Ho*Wo, k*k*C) with (kh, kw, cin) ordering along K."""
    n, h, w, c = x.shape
    xp = jnp.pad(x, ((0, 0), (pad, pad), (pad, pad), (0, 0)))
    ho = (h + 2 * pad - k) // stride + 1
    wo = (w + 2 * pad - k) // stride + 1
    cols = []
    for i in range(k):
        for j in range(k):
            cols.append(xp[:, i:i + stride * ho:stride, j:j + stride * wo:stride, :])
    patches = jnp.stack(cols, axis=3)                       # (N, Ho, Wo, k*k, C)
    return patches.reshape(n, ho * wo, k * k * c), ho, wo


def conv2d_pallas(x_nhwc, w_hwio, b, stride, pad, apply_lrelu):
    """Conv2d (+bias, optional LeakyReLU) as a tiled Pallas matmul.

    Returns (out, (ho, wo, cout, hw)) where out is (N, HWp, Cp) f32 (HW / channels padded).
    """
    k, _, cin, cout = w_hwio.shape
    n = x_nhwc.shape[0]

    a, ho, wo = _im2col(x_nhwc.astype(jnp.bfloat16), k, stride, pad)
    hw = ho * wo
    kk = k * k * cin

    hwp = _round_up(hw, _TM)
    kp = _round_up(kk, 128)
    cp = _round_up(cout, _TN)
    tk = 512 if kp % 512 == 0 else (256 if kp % 256 == 0 else 128)

    a = jnp.pad(a, ((0, 0), (0, hwp - hw), (0, kp - kk)))
    wm = jnp.pad(w_hwio.reshape(kk, cout).astype(jnp.bfloat16),
                 ((0, kp - kk), (0, cp - cout)))
    bm = jnp.pad(b.reshape(1, cout).astype(jnp.float32), ((0, 0), (0, cp - cout)))

    grid = (n, hwp // _TM, cp // _TN, kp // tk)
    out = pl.pallas_call(
        functools.partial(_conv_mm_kernel, apply_lrelu=apply_lrelu),
        out_shape=jax.ShapeDtypeStruct((n, hwp, cp), jnp.float32),
        grid_spec=pltpu.PrefetchScalarGridSpec(
            num_scalar_prefetch=0,
            grid=grid,
            in_specs=[
                pl.BlockSpec((1, _TM, tk), lambda nb, i, j, kb: (nb, i, kb)),
                pl.BlockSpec((tk, _TN), lambda nb, i, j, kb: (kb, j)),
                pl.BlockSpec((1, _TN), lambda nb, i, j, kb: (0, j)),
            ],
            out_specs=pl.BlockSpec((1, _TM, _TN), lambda nb, i, j, kb: (nb, i, j)),
            scratch_shapes=[pltpu.VMEM((_TM, _TN), jnp.float32)],
        ),
        compiler_params=pltpu.CompilerParams(
            dimension_semantics=("parallel", "parallel", "parallel", "arbitrary"),
            vmem_limit_bytes=_VMEM_LIMIT,
        ),
    )(a, wm, bm)
    return out, (ho, wo, cout, hw)


def instnorm_lrelu_pallas(y, hw_true):
    """InstanceNorm2d (biased var, eps=1e-5) + LeakyReLU(0.2) on (N, HWp, Cp) f32."""
    n, hwp, cp = y.shape
    thw = min(_THW, hwp)
    assert hwp % thw == 0
    grid = (n, hwp // thw)

    stats = pl.pallas_call(
        functools.partial(_in_stats_kernel, hw_true=hw_true, thw=thw),
        out_shape=jax.ShapeDtypeStruct((n, 2, cp), jnp.float32),
        grid_spec=pltpu.PrefetchScalarGridSpec(
            num_scalar_prefetch=0,
            grid=grid,
            in_specs=[pl.BlockSpec((1, thw, cp), lambda nb, h: (nb, h, 0))],
            out_specs=pl.BlockSpec((1, 2, cp), lambda nb, h: (nb, 0, 0)),
            scratch_shapes=[pltpu.VMEM((1, cp), jnp.float32),
                            pltpu.VMEM((1, cp), jnp.float32)],
        ),
        compiler_params=pltpu.CompilerParams(
            dimension_semantics=("parallel", "arbitrary"),
            vmem_limit_bytes=_VMEM_LIMIT,
        ),
    )(y)

    return pl.pallas_call(
        _in_norm_kernel,
        out_shape=jax.ShapeDtypeStruct((n, hwp, cp), jnp.float32),
        grid_spec=pltpu.PrefetchScalarGridSpec(
            num_scalar_prefetch=0,
            grid=grid,
            in_specs=[
                pl.BlockSpec((1, thw, cp), lambda nb, h: (nb, h, 0)),
                pl.BlockSpec((1, 2, cp), lambda nb, h: (nb, 0, 0)),
            ],
            out_specs=pl.BlockSpec((1, thw, cp), lambda nb, h: (nb, h, 0)),
        ),
        compiler_params=pltpu.CompilerParams(
            dimension_semantics=("parallel", "parallel"),
            vmem_limit_bytes=_VMEM_LIMIT,
        ),
    )(y, stats)


# -------------------------- Discriminator module ------------------------------

def init_params(key, input_nc=3, ndf=64):
    """Deterministic synthetic weights.  Each layer: (W[kh,kw,cin,cout], b[cout])."""
    chans = [(input_nc, ndf), (ndf, ndf * 2), (ndf * 2, ndf * 4),
             (ndf * 4, ndf * 8), (ndf * 8, 1)]
    params = []
    for i, (cin, cout) in enumerate(chans):
        kw_, kb_ = jax.random.split(jax.random.fold_in(key, i))
        w = jax.random.normal(kw_, (4, 4, cin, cout), jnp.float32) * 0.05
        b = jax.random.normal(kb_, (cout,), jnp.float32) * 0.05
        params.append((w, b))
    return params


def _to_spatial(y, n, ho, wo, cout, hw):
    return y[:, :hw, :cout].reshape(n, ho, wo, cout)


def discriminator_forward(params, x_nchw):
    x = jnp.transpose(x_nchw, (0, 2, 3, 1))                 # NCHW -> NHWC
    n = x.shape[0]

    # conv1 + LeakyReLU (fused into the conv epilogue)
    w, b = params[0]
    y, (ho, wo, cout, hw) = conv2d_pallas(x, w, b, STRIDES[0], PAD, apply_lrelu=True)
    x = _to_spatial(y, n, ho, wo, cout, hw)

    # conv2..conv4: conv -> InstanceNorm -> LeakyReLU (IN+LReLU in native (N,HW,C) layout)
    for li in range(1, 4):
        w, b = params[li]
        y, (ho, wo, cout, hw) = conv2d_pallas(x, w, b, STRIDES[li], PAD, apply_lrelu=False)
        y = instnorm_lrelu_pallas(y, hw)
        x = _to_spatial(y, n, ho, wo, cout, hw)

    # conv5 (no activation)
    w, b = params[4]
    y, (ho, wo, cout, hw) = conv2d_pallas(x, w, b, STRIDES[4], PAD, apply_lrelu=False)
    x = _to_spatial(y, n, ho, wo, cout, hw)
    return jnp.transpose(x, (0, 3, 1, 2))                   # NHWC -> NCHW


# ------------------------------ pure-JAX reference ----------------------------

def discriminator_ref(params, x_nchw):
    """Pure-JAX reference (bf16-in / f32-accumulate convs to mirror MXU precision)."""
    x = jnp.transpose(x_nchw, (0, 2, 3, 1))

    def conv(v, w, b, s):
        y = jax.lax.conv_general_dilated(
            v.astype(jnp.bfloat16), w.astype(jnp.bfloat16), (s, s),
            ((PAD, PAD), (PAD, PAD)),
            dimension_numbers=("NHWC", "HWIO", "NHWC"),
            preferred_element_type=jnp.float32)
        return y + b

    def lrelu(v):
        return jnp.where(v >= 0, v, LRELU_SLOPE * v)

    def instnorm(v):
        mean = jnp.mean(v, axis=(1, 2), keepdims=True)
        var = jnp.mean(jnp.square(v - mean), axis=(1, 2), keepdims=True)
        return (v - mean) * jax.lax.rsqrt(var + IN_EPS)

    w, b = params[0]
    x = lrelu(conv(x, w, b, STRIDES[0]))
    for li in range(1, 4):
        w, b = params[li]
        x = lrelu(instnorm(conv(x, w, b, STRIDES[li])))
    w, b = params[4]
    x = conv(x, w, b, STRIDES[4])
    return jnp.transpose(x, (0, 3, 1, 2))


if __name__ == "__main__":
    key = jax.random.PRNGKey(0)
    # Small but valid shapes: 32x32 input keeps every conv output non-empty
    # (32 -> 16 -> 8 -> 4 -> 3 -> 2).  ndf reduced to 16 for a fast demo.
    params = init_params(key, input_nc=3, ndf=16)
    x = jax.random.normal(jax.random.fold_in(key, 100), (2, 3, 32, 32), jnp.float32)

    fwd = jax.jit(discriminator_forward)
    out = jax.block_until_ready(fwd(params, x))
    ref = jax.block_until_ready(discriminator_ref(params, x))

    assert out.shape == (2, 1, 2, 2), out.shape
    max_err = float(jnp.max(jnp.abs(out - ref)))
    # Both pipelines use bf16-in / f32-accumulate matmuls; tolerance covers the
    # independent bf16 rounding of intermediate activations across 5 layers.
    assert jnp.allclose(out, ref, rtol=3e-2, atol=3e-2), max_err
    print("KERNEL_OK")
</pallas_src>

<mosaic_0001>
module attributes {stable_mosaic.version = 11 : i64} {
  func.func @_conv_mm_kernel(%arg0: i32, %arg1: i32, %arg2: i32, %arg3: i32, %arg4: memref<1x256x128xbf16, #tpu.memory_space<vmem>>, %arg5: memref<128x128xbf16, #tpu.memory_space<vmem>>, %arg6: memref<1x128xf32, #tpu.memory_space<vmem>>, %arg7: memref<1x256x128xf32, #tpu.memory_space<vmem>>, %arg8: memref<256x128xf32, #tpu.memory_space<vmem>>) attributes {dimension_semantics = [#tpu.dimension_semantics<parallel>, #tpu.dimension_semantics<parallel>, #tpu.dimension_semantics<parallel>, #tpu.dimension_semantics<arbitrary>], iteration_bounds = array<i64: 2, 1, 1, 1>, scalar_prefetch = 0 : i64, scratch_operands = 1 : i64, tpu.core_type = #tpu.core_type<tc>, window_params = [{transform_indices = @transform_0, window_bounds = array<i64: 1, 256, 128>}, {transform_indices = @transform_1, window_bounds = array<i64: 128, 128>}, {transform_indices = @transform_2, window_bounds = array<i64: 1, 128>}, {transform_indices = @transform_3, window_bounds = array<i64: 1, 256, 128>}]} {
    %c0_i32 = arith.constant 0 : i32
    %0 = arith.cmpi eq, %arg3, %c0_i32 : i32
    %1 = arith.extui %0 : i1 to i32
    %c0_i32_0 = arith.constant 0 : i32
    %2 = arith.cmpi ne, %1, %c0_i32_0 : i32
    scf.if %2 {
      %cst_11 = arith.constant 0.000000e+00 : f32
      %13 = vector.broadcast %cst_11 : f32 to vector<256x128xf32>
      %c0_12 = arith.constant 0 : index
      %c0_13 = arith.constant 0 : index
      %14 = vector.load %arg8[%c0_12, %c0_13] : memref<256x128xf32, #tpu.memory_space<vmem>>, vector<256x128xf32>
      tpu.vector_store %arg8[%c0_12, %c0_13], %13 {strides = array<i32>} : memref<256x128xf32, #tpu.memory_space<vmem>>, vector<256x128xf32>,
    } else {
    }
    %c0 = arith.constant 0 : index
    %c0_1 = arith.constant 0 : index
    %3 = vector.load %arg8[%c0, %c0_1] : memref<256x128xf32, #tpu.memory_space<vmem>>, vector<256x128xf32>
    %c0_2 = arith.constant 0 : index
    %c0_3 = arith.constant 0 : index
    %c0_4 = arith.constant 0 : index
    %4 = vector.load %arg4[%c0_2, %c0_3, %c0_4] : memref<1x256x128xbf16, #tpu.memory_space<vmem>>, vector<1x256x128xbf16>
    %5 = vector.shape_cast %4 : vector<1x256x128xbf16> to vector<256x128xbf16>
    %c0_5 = arith.constant 0 : index
    %c0_6 = arith.constant 0 : index
    %6 = vector.load %arg5[%c0_5, %c0_6] : memref<128x128xbf16, #tpu.memory_space<vmem>>, vector<128x128xbf16>
    %cst = arith.constant dense<0.000000e+00> : vector<256x128xf32>
    %7 = tpu.matmul %5, %6, %cst {dimension_numbers = #tpu.dot_dimension_numbers<[1], [0], [0], [1], [0, 0, 1, 1], [], []>} : vector<256x128xbf16>, vector<128x128xbf16>, vector<256x128xf32> -> vector<256x128xf32>
    %8 = arith.addf %3, %7 : vector<256x128xf32>
    %c0_7 = arith.constant 0 : index
    %c0_8 = arith.constant 0 : index
    %9 = vector.load %arg8[%c0_7, %c0_8] : memref<256x128xf32, #tpu.memory_space<vmem>>, vector<256x128xf32>
    tpu.vector_store %arg8[%c0_7, %c0_8], %8 {strides = array<i32>} : memref<256x128xf32, #tpu.memory_space<vmem>>, vector<256x128xf32>,
    %c0_i32_9 = arith.constant 0 : i32
    %10 = arith.cmpi eq, %arg3, %c0_i32_9 : i32
    %11 = arith.extui %10 : i1 to i32
    %c0_i32_10 = arith.constant 0 : i32
    %12 = arith.cmpi ne, %11, %c0_i32_10 : i32
    scf.if %12 {
      %c0_11 = arith.constant 0 : index
      %c0_12 = arith.constant 0 : index
      %13 = vector.load %arg8[%c0_11, %c0_12] : memref<256x128xf32, #tpu.memory_space<vmem>>, vector<256x128xf32>
      %c0_13 = arith.constant 0 : index
      %c0_14 = arith.constant 0 : index
      %14 = vector.load %arg6[%c0_13, %c0_14] : memref<1x128xf32, #tpu.memory_space<vmem>>, vector<1x128xf32>
      %15 = vector.broadcast %14 : vector<1x128xf32> to vector<256x128xf32>
      %16 = arith.addf %13, %15 : vector<256x128xf32>
      %cst_15 = arith.constant 0.000000e+00 : f32
      %17 = vector.broadcast %cst_15 : f32 to vector<256x128xf32>
      %18 = arith.cmpf oge, %16, %17 : vector<256x128xf32>
      %cst_16 = arith.constant 2.000000e-01 : f32
      %19 = vector.broadcast %cst_16 : f32 to vector<256x128xf32>
      %20 = arith.mulf %19, %16 : vector<256x128xf32>
      %21 = arith.select %18, %16, %20 : vector<256x128xi1>, vector<256x128xf32>
      %c0_17 = arith.constant 0 : index
      %c0_18 = arith.constant 0 : index
      %c0_19 = arith.constant 0 : index
      %22 = vector.load %arg7[%c0_17, %c0_18, %c0_19] : memref<1x256x128xf32, #tpu.memory_space<vmem>>, vector<1x256x128xf32>
      %23 = vector.shape_cast %22 : vector<1x256x128xf32> to vector<256x128xf32>
      %24 = vector.shape_cast %21 : vector<256x128xf32> to vector<1x256x128xf32>
      tpu.vector_store %arg7[%c0_17, %c0_18, %c0_19], %24 {strides = array<i32>} : memref<1x256x128xf32, #tpu.memory_space<vmem>>, vector<1x256x128xf32>,
    } else {
    }
    return
  }
  func.func @transform_0(%arg0: i32, %arg1: i32, %arg2: i32, %arg3: i32) -> (i32, i32, i32) {
    %c0_i32 = arith.constant 0 : i32
    return %arg0, %arg1, %arg3 : i32, i32, i32
  }
  func.func @transform_1(%arg0: i32, %arg1: i32, %arg2: i32, %arg3: i32) -> (i32, i32) {
    %c0_i32 = arith.constant 0 : i32
    return %arg3, %arg2 : i32, i32
  }
  func.func @transform_2(%arg0: i32, %arg1: i32, %arg2: i32, %arg3: i32) -> (i32, i32) {
    %c0_i32 = arith.constant 0 : i32
    %c0_i32_0 = arith.constant 0 : i32
    return %c0_i32, %arg2 : i32, i32
  }
  func.func @transform_3(%arg0: i32, %arg1: i32, %arg2: i32, %arg3: i32) -> (i32, i32, i32) {
    %c0_i32 = arith.constant 0 : i32
    return %arg0, %arg1, %arg2 : i32, i32, i32
  }
}

module attributes {stable_mosaic.version = 11 : i64} {
  func.func @_conv_mm_kernel(%arg0: i32, %arg1: i32, %arg2: i32, %arg3: i32, %arg4: memref<1x256x256xbf16, #tpu.memory_space<vmem>>, %arg5: memref<256x128xbf16, #tpu.memory_space<vmem>>, %arg6: memref<1x128xf32, #tpu.memory_space<vmem>>, %arg7: memref<1x256x128xf32, #tpu.memory_space<vmem>>, %arg8: memref<256x128xf32, #tpu.memory_space<vmem>>) attributes {dimension_semantics = [#tpu.dimension_semantics<parallel>, #tpu.dimension_semantics<parallel>, #tpu.dimension_semantics<parallel>, #tpu.dimension_semantics<arbitrary>], iteration_bounds = array<i64: 2, 1, 1, 1>, scalar_prefetch = 0 : i64, scratch_operands = 1 : i64, tpu.core_type = #tpu.core_type<tc>, window_params = [{transform_indices = @transform_0, window_bounds = array<i64: 1, 256, 256>}, {transform_indices = @transform_1, window_bounds = array<i64: 256, 128>}, {transform_indices = @transform_2, window_bounds = array<i64: 1, 128>}, {transform_indices = @transform_3, window_bounds = array<i64: 1, 256, 128>}]} {
    %c0_i32 = arith.constant 0 : i32
    %0 = arith.cmpi eq, %arg3, %c0_i32 : i32
    %1 = arith.extui %0 : i1 to i32
    %c0_i32_0 = arith.constant 0 : i32
    %2 = arith.cmpi ne, %1, %c0_i32_0 : i32
    scf.if %2 {
      %cst_11 = arith.constant 0.000000e+00 : f32
      %13 = vector.broadcast %cst_11 : f32 to vector<256x128xf32>
      %c0_12 = arith.constant 0 : index
      %c0_13 = arith.constant 0 : index
      %14 = vector.load %arg8[%c0_12, %c0_13] : memref<256x128xf32, #tpu.memory_space<vmem>>, vector<256x128xf32>
      tpu.vector_store %arg8[%c0_12, %c0_13], %13 {strides = array<i32>} : memref<256x128xf32, #tpu.memory_space<vmem>>, vector<256x128xf32>,
    } else {
    }
    %c0 = arith.constant 0 : index
    %c0_1 = arith.constant 0 : index
    %3 = vector.load %arg8[%c0, %c0_1] : memref<256x128xf32, #tpu.memory_space<vmem>>, vector<256x128xf32>
    %c0_2 = arith.constant 0 : index
    %c0_3 = arith.constant 0 : index
    %c0_4 = arith.constant 0 : index
    %4 = vector.load %arg4[%c0_2, %c0_3, %c0_4] : memref<1x256x256xbf16, #tpu.memory_space<vmem>>, vector<1x256x256xbf16>
    %5 = vector.shape_cast %4 : vector<1x256x256xbf16> to vector<256x256xbf16>
    %c0_5 = arith.constant 0 : index
    %c0_6 = arith.constant 0 : index
    %6 = vector.load %arg5[%c0_5, %c0_6] : memref<256x128xbf16, #tpu.memory_space<vmem>>, vector<256x128xbf16>
    %cst = arith.constant dense<0.000000e+00> : vector<256x128xf32>
    %7 = tpu.matmul %5, %6, %cst {dimension_numbers = #tpu.dot_dimension_numbers<[1], [0], [0], [1], [0, 0, 1, 1], [], []>} : vector<256x256xbf16>, vector<256x128xbf16>, vector<256x128xf32> -> vector<256x128xf32>
    %8 = arith.addf %3, %7 : vector<256x128xf32>
    %c0_7 = arith.constant 0 : index
    %c0_8 = arith.constant 0 : index
    %9 = vector.load %arg8[%c0_7, %c0_8] : memref<256x128xf32, #tpu.memory_space<vmem>>, vector<256x128xf32>
    tpu.vector_store %arg8[%c0_7, %c0_8], %8 {strides = array<i32>} : memref<256x128xf32, #tpu.memory_space<vmem>>, vector<256x128xf32>,
    %c0_i32_9 = arith.constant 0 : i32
    %10 = arith.cmpi eq, %arg3, %c0_i32_9 : i32
    %11 = arith.extui %10 : i1 to i32
    %c0_i32_10 = arith.constant 0 : i32
    %12 = arith.cmpi ne, %11, %c0_i32_10 : i32
    scf.if %12 {
      %c0_11 = arith.constant 0 : index
      %c0_12 = arith.constant 0 : index
      %13 = vector.load %arg8[%c0_11, %c0_12] : memref<256x128xf32, #tpu.memory_space<vmem>>, vector<256x128xf32>
      %c0_13 = arith.constant 0 : index
      %c0_14 = arith.constant 0 : index
      %14 = vector.load %arg6[%c0_13, %c0_14] : memref<1x128xf32, #tpu.memory_space<vmem>>, vector<1x128xf32>
      %15 = vector.broadcast %14 : vector<1x128xf32> to vector<256x128xf32>
      %16 = arith.addf %13, %15 : vector<256x128xf32>
      %c0_15 = arith.constant 0 : index
      %c0_16 = arith.constant 0 : index
      %c0_17 = arith.constant 0 : index
      %17 = vector.load %arg7[%c0_15, %c0_16, %c0_17] : memref<1x256x128xf32, #tpu.memory_space<vmem>>, vector<1x256x128xf32>
      %18 = vector.shape_cast %17 : vector<1x256x128xf32> to vector<256x128xf32>
      %19 = vector.shape_cast %16 : vector<256x128xf32> to vector<1x256x128xf32>
      tpu.vector_store %arg7[%c0_15, %c0_16, %c0_17], %19 {strides = array<i32>} : memref<1x256x128xf32, #tpu.memory_space<vmem>>, vector<1x256x128xf32>,
    } else {
    }
    return
  }
  func.func @transform_0(%arg0: i32, %arg1: i32, %arg2: i32, %arg3: i32) -> (i32, i32, i32) {
    %c0_i32 = arith.constant 0 : i32
    return %arg0, %arg1, %arg3 : i32, i32, i32
  }
  func.func @transform_1(%arg0: i32, %arg1: i32, %arg2: i32, %arg3: i32) -> (i32, i32) {
    %c0_i32 = arith.constant 0 : i32
    return %arg3, %arg2 : i32, i32
  }
  func.func @transform_2(%arg0: i32, %arg1: i32, %arg2: i32, %arg3: i32) -> (i32, i32) {
    %c0_i32 = arith.constant 0 : i32
    %c0_i32_0 = arith.constant 0 : i32
    return %c0_i32, %arg2 : i32, i32
  }
  func.func @transform_3(%arg0: i32, %arg1: i32, %arg2: i32, %arg3: i32) -> (i32, i32, i32) {
    %c0_i32 = arith.constant 0 : i32
    return %arg0, %arg1, %arg2 : i32, i32, i32
  }
}

module attributes {stable_mosaic.version = 11 : i64} {
  func.func @_in_stats_kernel(%arg0: i32, %arg1: i32, %arg2: memref<1x256x128xf32, #tpu.memory_space<vmem>>, %arg3: memref<1x2x128xf32, #tpu.memory_space<vmem>>, %arg4: memref<1x128xf32, #tpu.memory_space<vmem>>, %arg5: memref<1x128xf32, #tpu.memory_space<vmem>>) attributes {dimension_semantics = [#tpu.dimension_semantics<parallel>, #tpu.dimension_semantics<arbitrary>], iteration_bounds = array<i64: 2, 1>, scalar_prefetch = 0 : i64, scratch_operands = 2 : i64, tpu.core_type = #tpu.core_type<tc>, window_params = [{transform_indices = @transform_0, window_bounds = array<i64: 1, 256, 128>}, {transform_indices = @transform_1, window_bounds = array<i64: 1, 2, 128>}]} {
    %c0_i32 = arith.constant 0 : i32
    %0 = arith.cmpi eq, %arg1, %c0_i32 : i32
    %1 = arith.extui %0 : i1 to i32
    %c0_i32_0 = arith.constant 0 : i32
    %2 = arith.cmpi ne, %1, %c0_i32_0 : i32
    scf.if %2 {
      %cst_15 = arith.constant 0.000000e+00 : f32
      %27 = vector.broadcast %cst_15 : f32 to vector<1x128xf32>
      %c0_16 = arith.constant 0 : index
      %c0_17 = arith.constant 0 : index
      %28 = vector.load %arg4[%c0_16, %c0_17] : memref<1x128xf32, #tpu.memory_space<vmem>>, vector<1x128xf32>
      tpu.vector_store %arg4[%c0_16, %c0_17], %27 {strides = array<i32>} : memref<1x128xf32, #tpu.memory_space<vmem>>, vector<1x128xf32>,
      %cst_18 = arith.constant 0.000000e+00 : f32
      %29 = vector.broadcast %cst_18 : f32 to vector<1x128xf32>
      %c0_19 = arith.constant 0 : index
      %c0_20 = arith.constant 0 : index
      %30 = vector.load %arg5[%c0_19, %c0_20] : memref<1x128xf32, #tpu.memory_space<vmem>>, vector<1x128xf32>
      tpu.vector_store %arg5[%c0_19, %c0_20], %29 {strides = array<i32>} : memref<1x128xf32, #tpu.memory_space<vmem>>, vector<1x128xf32>,
    } else {
    }
    %c0 = arith.constant 0 : index
    %c0_1 = arith.constant 0 : index
    %c0_2 = arith.constant 0 : index
    %3 = vector.load %arg2[%c0, %c0_1, %c0_2] : memref<1x256x128xf32, #tpu.memory_space<vmem>>, vector<1x256x128xf32>
    %4 = vector.shape_cast %3 : vector<1x256x128xf32> to vector<256x128xf32>
    %c256_i32 = arith.constant 256 : i32
    %5 = arith.muli %arg1, %c256_i32 : i32
    %6 = tpu.iota {dimensions = array<i32: 0>} : vector<256x128xi32>
    %7 = vector.broadcast %5 : i32 to vector<256x128xi32>
    %8 = arith.addi %7, %6 : vector<256x128xi32>
    %c64_i32 = arith.constant 64 : i32
    %9 = vector.broadcast %c64_i32 : i32 to vector<256x128xi32>
    %10 = arith.cmpi slt, %8, %9 : vector<256x128xi32>
    %cst = arith.constant 0.000000e+00 : f32
    %11 = vector.broadcast %cst : f32 to vector<256x128xf32>
    %12 = arith.select %10, %4, %11 : vector<256x128xi1>, vector<256x128xf32>
    %c0_3 = arith.constant 0 : index
    %c0_4 = arith.constant 0 : index
    %13 = vector.load %arg4[%c0_3, %c0_4] : memref<1x128xf32, #tpu.memory_space<vmem>>, vector<1x128xf32>
    %cst_5 = arith.constant dense<0.000000e+00> : vector<128xf32>
    %14 = vector.multi_reduction <add>, %12, %cst_5 [0] : vector<256x128xf32> to vector<128xf32>
    %15 = vector.shape_cast %14 : vector<128xf32> to vector<1x128xf32>
    %16 = arith.addf %13, %15 : vector<1x128xf32>
    %c0_6 = arith.constant 0 : index
    %c0_7 = arith.constant 0 : index
    %17 = vector.load %arg4[%c0_6, %c0_7] : memref<1x128xf32, #tpu.memory_space<vmem>>, vector<1x128xf32>
    tpu.vector_store %arg4[%c0_6, %c0_7], %16 {strides = array<i32>} : memref<1x128xf32, #tpu.memory_space<vmem>>, vector<1x128xf32>,
    %c0_8 = arith.constant 0 : index
    %c0_9 = arith.constant 0 : index
    %18 = vector.load %arg5[%c0_8, %c0_9] : memref<1x128xf32, #tpu.memory_space<vmem>>, vector<1x128xf32>
    %19 = arith.mulf %12, %12 : vector<256x128xf32>
    %cst_10 = arith.constant dense<0.000000e+00> : vector<128xf32>
    %20 = vector.multi_reduction <add>, %19, %cst_10 [0] : vector<256x128xf32> to vector<128xf32>
    %21 = vector.shape_cast %20 : vector<128xf32> to vector<1x128xf32>
    %22 = arith.addf %18, %21 : vector<1x128xf32>
    %c0_11 = arith.constant 0 : index
    %c0_12 = arith.constant 0 : index
    %23 = vector.load %arg5[%c0_11, %c0_12] : memref<1x128xf32, #tpu.memory_space<vmem>>, vector<1x128xf32>
    tpu.vector_store %arg5[%c0_11, %c0_12], %22 {strides = array<i32>} : memref<1x128xf32, #tpu.memory_space<vmem>>, vector<1x128xf32>,
    %c0_i32_13 = arith.constant 0 : i32
    %24 = arith.cmpi eq, %arg1, %c0_i32_13 : i32
    %25 = arith.extui %24 : i1 to i32
    %c0_i32_14 = arith.constant 0 : i32
    %26 = arith.cmpi ne, %25, %c0_i32_14 : i32
    scf.if %26 {
      %c0_15 = arith.constant 0 : index
      %c0_16 = arith.constant 0 : index
      %27 = vector.load %arg4[%c0_15, %c0_16] : memref<1x128xf32, #tpu.memory_space<vmem>>, vector<1x128xf32>
      %cst_17 = arith.constant 1.562500e-02 : f32
      %28 = vector.broadcast %cst_17 : f32 to vector<1x128xf32>
      %29 = arith.mulf %27, %28 : vector<1x128xf32>
      %c0_18 = arith.constant 0 : index
      %c0_19 = arith.constant 0 : index
      %30 = vector.load %arg5[%c0_18, %c0_19] : memref<1x128xf32, #tpu.memory_space<vmem>>, vector<1x128xf32>
      %cst_20 = arith.constant 1.562500e-02 : f32
      %31 = vector.broadcast %cst_20 : f32 to vector<1x128xf32>
      %32 = arith.mulf %30, %31 : vector<1x128xf32>
      %33 = arith.mulf %29, %29 : vector<1x128xf32>
      %34 = arith.subf %32, %33 : vector<1x128xf32>
      %cst_21 = arith.constant 9.99999974E-6 : f32
      %35 = vector.broadcast %cst_21 : f32 to vector<1x128xf32>
      %36 = arith.addf %34, %35 : vector<1x128xf32>
      %37 = math.rsqrt %36 : vector<1x128xf32>
      %38 = tpu.concatenate %29, %37 in 0 : vector<1x128xf32>, vector<1x128xf32> -> vector<2x128xf32>
      %c0_22 = arith.constant 0 : index
      %c0_23 = arith.constant 0 : index
      %c0_24 = arith.constant 0 : index
      %39 = vector.load %arg3[%c0_22, %c0_23, %c0_24] : memref<1x2x128xf32, #tpu.memory_space<vmem>>, vector<1x2x128xf32>
      %40 = vector.shape_cast %39 : vector<1x2x128xf32> to vector<2x128xf32>
      %41 = vector.shape_cast %38 : vector<2x128xf32> to vector<1x2x128xf32>
      tpu.vector_store %arg3[%c0_22, %c0_23, %c0_24], %41 {strides = array<i32>} : memref<1x2x128xf32, #tpu.memory_space<vmem>>, vector<1x2x128xf32>,
    } else {
    }
    return
  }
  func.func @transform_0(%arg0: i32, %arg1: i32) -> (i32, i32, i32) {
    %c0_i32 = arith.constant 0 : i32
    %c0_i32_0 = arith.constant 0 : i32
    return %arg0, %arg1, %c0_i32 : i32, i32, i32
  }
  func.func @transform_1(%arg0: i32, %arg1: i32) -> (i32, i32, i32) {
    %c0_i32 = arith.constant 0 : i32
    %c0_i32_0 = arith.constant 0 : i32
    %c0_i32_1 = arith.constant 0 : i32
    return %arg0, %c0_i32, %c0_i32_0 : i32, i32, i32
  }
}

module attributes {stable_mosaic.version = 11 : i64} {
  func.func @_in_norm_kernel(%arg0: i32, %arg1: i32, %arg2: memref<1x256x128xf32, #tpu.memory_space<vmem>>, %arg3: memref<1x2x128xf32, #tpu.memory_space<vmem>>, %arg4: memref<1x256x128xf32, #tpu.memory_space<vmem>>) attributes {dimension_semantics = [#tpu.dimension_semantics<parallel>, #tpu.dimension_semantics<parallel>], iteration_bounds = array<i64: 2, 1>, scalar_prefetch = 0 : i64, scratch_operands = 0 : i64, tpu.core_type = #tpu.core_type<tc>, window_params = [{transform_indices = @transform_0, window_bounds = array<i64: 1, 256, 128>}, {transform_indices = @transform_1, window_bounds = array<i64: 1, 2, 128>}, {transform_indices = @transform_2, window_bounds = array<i64: 1, 256, 128>}]} {
    %c0 = arith.constant 0 : index
    %c0_0 = arith.constant 0 : index
    %c0_1 = arith.constant 0 : index
    %0 = vector.load %arg2[%c0, %c0_0, %c0_1] : memref<1x256x128xf32, #tpu.memory_space<vmem>>, vector<1x256x128xf32>
    %1 = vector.shape_cast %0 : vector<1x256x128xf32> to vector<256x128xf32>
    %c0_2 = arith.constant 0 : index
    %c0_3 = arith.constant 0 : index
    %c0_4 = arith.constant 0 : index
    %2 = vector.load %arg3[%c0_2, %c0_3, %c0_4] : memref<1x2x128xf32, #tpu.memory_space<vmem>>, vector<1x2x128xf32>
    %3 = vector.shape_cast %2 : vector<1x2x128xf32> to vector<2x128xf32>
    %4 = vector.extract_strided_slice %3 {offsets = [0, 0], sizes = [1, 128], strides = [1, 1]} : vector<2x128xf32> to vector<1x128xf32>
    %5 = vector.broadcast %4 : vector<1x128xf32> to vector<256x128xf32>
    %6 = arith.subf %1, %5 : vector<256x128xf32>
    %7 = vector.extract_strided_slice %3 {offsets = [1, 0], sizes = [1, 128], strides = [1, 1]} : vector<2x128xf32> to vector<1x128xf32>
    %8 = vector.broadcast %7 : vector<1x128xf32> to vector<256x128xf32>
    %9 = arith.mulf %6, %8 : vector<256x128xf32>
    %cst = arith.constant 0.000000e+00 : f32
    %10 = vector.broadcast %cst : f32 to vector<256x128xf32>
    %11 = arith.cmpf oge, %9, %10 : vector<256x128xf32>
    %cst_5 = arith.constant 2.000000e-01 : f32
    %12 = vector.broadcast %cst_5 : f32 to vector<256x128xf32>
    %13 = arith.mulf %12, %9 : vector<256x128xf32>
    %14 = arith.select %11, %9, %13 : vector<256x128xi1>, vector<256x128xf32>
    %c0_6 = arith.constant 0 : index
    %c0_7 = arith.constant 0 : index
    %c0_8 = arith.constant 0 : index
    %15 = vector.load %arg4[%c0_6, %c0_7, %c0_8] : memref<1x256x128xf32, #tpu.memory_space<vmem>>, vector<1x256x128xf32>
    %16 = vector.shape_cast %15 : vector<1x256x128xf32> to vector<256x128xf32>
    %17 = vector.shape_cast %14 : vector<256x128xf32> to vector<1x256x128xf32>
    tpu.vector_store %arg4[%c0_6, %c0_7, %c0_8], %17 {strides = array<i32>} : memref<1x256x128xf32, #tpu.memory_space<vmem>>, vector<1x256x128xf32>,
    return
  }
  func.func @transform_0(%arg0: i32, %arg1: i32) -> (i32, i32, i32) {
    %c0_i32 = arith.constant 0 : i32
    %c0_i32_0 = arith.constant 0 : i32
    return %arg0, %arg1, %c0_i32 : i32, i32, i32
  }
  func.func @transform_1(%arg0: i32, %arg1: i32) -> (i32, i32, i32) {
    %c0_i32 = arith.constant 0 : i32
    %c0_i32_0 = arith.constant 0 : i32
    %c0_i32_1 = arith.constant 0 : i32
    return %arg0, %c0_i32, %c0_i32_0 : i32, i32, i32
  }
  func.func @transform_2(%arg0: i32, %arg1: i32) -> (i32, i32, i32) {
    %c0_i32 = arith.constant 0 : i32
    %c0_i32_0 = arith.constant 0 : i32
    return %arg0, %arg1, %c0_i32 : i32, i32, i32
  }
}

module attributes {stable_mosaic.version = 11 : i64} {
  func.func @_in_stats_kernel(%arg0: i32, %arg1: i32, %arg2: memref<1x256x128xf32, #tpu.memory_space<vmem>>, %arg3: memref<1x2x128xf32, #tpu.memory_space<vmem>>, %arg4: memref<1x128xf32, #tpu.memory_space<vmem>>, %arg5: memref<1x128xf32, #tpu.memory_space<vmem>>) attributes {dimension_semantics = [#tpu.dimension_semantics<parallel>, #tpu.dimension_semantics<arbitrary>], iteration_bounds = array<i64: 2, 1>, scalar_prefetch = 0 : i64, scratch_operands = 2 : i64, tpu.core_type = #tpu.core_type<tc>, window_params = [{transform_indices = @transform_0, window_bounds = array<i64: 1, 256, 128>}, {transform_indices = @transform_1, window_bounds = array<i64: 1, 2, 128>}]} {
    %c0_i32 = arith.constant 0 : i32
    %0 = arith.cmpi eq, %arg1, %c0_i32 : i32
    %1 = arith.extui %0 : i1 to i32
    %c0_i32_0 = arith.constant 0 : i32
    %2 = arith.cmpi ne, %1, %c0_i32_0 : i32
    scf.if %2 {
      %cst_15 = arith.constant 0.000000e+00 : f32
      %27 = vector.broadcast %cst_15 : f32 to vector<1x128xf32>
      %c0_16 = arith.constant 0 : index
      %c0_17 = arith.constant 0 : index
      %28 = vector.load %arg4[%c0_16, %c0_17] : memref<1x128xf32, #tpu.memory_space<vmem>>, vector<1x128xf32>
      tpu.vector_store %arg4[%c0_16, %c0_17], %27 {strides = array<i32>} : memref<1x128xf32, #tpu.memory_space<vmem>>, vector<1x128xf32>,
      %cst_18 = arith.constant 0.000000e+00 : f32
      %29 = vector.broadcast %cst_18 : f32 to vector<1x128xf32>
      %c0_19 = arith.constant 0 : index
      %c0_20 = arith.constant 0 : index
      %30 = vector.load %arg5[%c0_19, %c0_20] : memref<1x128xf32, #tpu.memory_space<vmem>>, vector<1x128xf32>
      tpu.vector_store %arg5[%c0_19, %c0_20], %29 {strides = array<i32>} : memref<1x128xf32, #tpu.memory_space<vmem>>, vector<1x128xf32>,
    } else {
    }
    %c0 = arith.constant 0 : index
    %c0_1 = arith.constant 0 : index
    %c0_2 = arith.constant 0 : index
    %3 = vector.load %arg2[%c0, %c0_1, %c0_2] : memref<1x256x128xf32, #tpu.memory_space<vmem>>, vector<1x256x128xf32>
    %4 = vector.shape_cast %3 : vector<1x256x128xf32> to vector<256x128xf32>
    %c256_i32 = arith.constant 256 : i32
    %5 = arith.muli %arg1, %c256_i32 : i32
    %6 = tpu.iota {dimensions = array<i32: 0>} : vector<256x128xi32>
    %7 = vector.broadcast %5 : i32 to vector<256x128xi32>
    %8 = arith.addi %7, %6 : vector<256x128xi32>
    %c16_i32 = arith.constant 16 : i32
    %9 = vector.broadcast %c16_i32 : i32 to vector<256x128xi32>
    %10 = arith.cmpi slt, %8, %9 : vector<256x128xi32>
    %cst = arith.constant 0.000000e+00 : f32
    %11 = vector.broadcast %cst : f32 to vector<256x128xf32>
    %12 = arith.select %10, %4, %11 : vector<256x128xi1>, vector<256x128xf32>
    %c0_3 = arith.constant 0 : index
    %c0_4 = arith.constant 0 : index
    %13 = vector.load %arg4[%c0_3, %c0_4] : memref<1x128xf32, #tpu.memory_space<vmem>>, vector<1x128xf32>
    %cst_5 = arith.constant dense<0.000000e+00> : vector<128xf32>
    %14 = vector.multi_reduction <add>, %12, %cst_5 [0] : vector<256x128xf32> to vector<128xf32>
    %15 = vector.shape_cast %14 : vector<128xf32> to vector<1x128xf32>
    %16 = arith.addf %13, %15 : vector<1x128xf32>
    %c0_6 = arith.constant 0 : index
    %c0_7 = arith.constant 0 : index
    %17 = vector.load %arg4[%c0_6, %c0_7] : memref<1x128xf32, #tpu.memory_space<vmem>>, vector<1x128xf32>
    tpu.vector_store %arg4[%c0_6, %c0_7], %16 {strides = array<i32>} : memref<1x128xf32, #tpu.memory_space<vmem>>, vector<1x128xf32>,
    %c0_8 = arith.constant 0 : index
    %c0_9 = arith.constant 0 : index
    %18 = vector.load %arg5[%c0_8, %c0_9] : memref<1x128xf32, #tpu.memory_space<vmem>>, vector<1x128xf32>
    %19 = arith.mulf %12, %12 : vector<256x128xf32>
    %cst_10 = arith.constant dense<0.000000e+00> : vector<128xf32>
    %20 = vector.multi_reduction <add>, %19, %cst_10 [0] : vector<256x128xf32> to vector<128xf32>
    %21 = vector.shape_cast %20 : vector<128xf32> to vector<1x128xf32>
    %22 = arith.addf %18, %21 : vector<1x128xf32>
    %c0_11 = arith.constant 0 : index
    %c0_12 = arith.constant 0 : index
    %23 = vector.load %arg5[%c0_11, %c0_12] : memref<1x128xf32, #tpu.memory_space<vmem>>, vector<1x128xf32>
    tpu.vector_store %arg5[%c0_11, %c0_12], %22 {strides = array<i32>} : memref<1x128xf32, #tpu.memory_space<vmem>>, vector<1x128xf32>,
    %c0_i32_13 = arith.constant 0 : i32
    %24 = arith.cmpi eq, %arg1, %c0_i32_13 : i32
    %25 = arith.extui %24 : i1 to i32
    %c0_i32_14 = arith.constant 0 : i32
    %26 = arith.cmpi ne, %25, %c0_i32_14 : i32
    scf.if %26 {
      %c0_15 = arith.constant 0 : index
      %c0_16 = arith.constant 0 : index
      %27 = vector.load %arg4[%c0_15, %c0_16] : memref<1x128xf32, #tpu.memory_space<vmem>>, vector<1x128xf32>
      %cst_17 = arith.constant 6.250000e-02 : f32
      %28 = vector.broadcast %cst_17 : f32 to vector<1x128xf32>
      %29 = arith.mulf %27, %28 : vector<1x128xf32>
      %c0_18 = arith.constant 0 : index
      %c0_19 = arith.constant 0 : index
      %30 = vector.load %arg5[%c0_18, %c0_19] : memref<1x128xf32, #tpu.memory_space<vmem>>, vector<1x128xf32>
      %cst_20 = arith.constant 6.250000e-02 : f32
      %31 = vector.broadcast %cst_20 : f32 to vector<1x128xf32>
      %32 = arith.mulf %30, %31 : vector<1x128xf32>
      %33 = arith.mulf %29, %29 : vector<1x128xf32>
      %34 = arith.subf %32, %33 : vector<1x128xf32>
      %cst_21 = arith.constant 9.99999974E-6 : f32
      %35 = vector.broadcast %cst_21 : f32 to vector<1x128xf32>
      %36 = arith.addf %34, %35 : vector<1x128xf32>
      %37 = math.rsqrt %36 : vector<1x128xf32>
      %38 = tpu.concatenate %29, %37 in 0 : vector<1x128xf32>, vector<1x128xf32> -> vector<2x128xf32>
      %c0_22 = arith.constant 0 : index
      %c0_23 = arith.constant 0 : index
      %c0_24 = arith.constant 0 : index
      %39 = vector.load %arg3[%c0_22, %c0_23, %c0_24] : memref<1x2x128xf32, #tpu.memory_space<vmem>>, vector<1x2x128xf32>
      %40 = vector.shape_cast %39 : vector<1x2x128xf32> to vector<2x128xf32>
      %41 = vector.shape_cast %38 : vector<2x128xf32> to vector<1x2x128xf32>
      tpu.vector_store %arg3[%c0_22, %c0_23, %c0_24], %41 {strides = array<i32>} : memref<1x2x128xf32, #tpu.memory_space<vmem>>, vector<1x2x128xf32>,
    } else {
    }
    return
  }
  func.func @transform_0(%arg0: i32, %arg1: i32) -> (i32, i32, i32) {
    %c0_i32 = arith.constant 0 : i32
    %c0_i32_0 = arith.constant 0 : i32
    return %arg0, %arg1, %c0_i32 : i32, i32, i32
  }
  func.func @transform_1(%arg0: i32, %arg1: i32) -> (i32, i32, i32) {
    %c0_i32 = arith.constant 0 : i32
    %c0_i32_0 = arith.constant 0 : i32
    %c0_i32_1 = arith.constant 0 : i32
    return %arg0, %c0_i32, %c0_i32_0 : i32, i32, i32
  }
}

module attributes {stable_mosaic.version = 11 : i64} {
  func.func @_conv_mm_kernel(%arg0: i32, %arg1: i32, %arg2: i32, %arg3: i32, %arg4: memref<1x256x512xbf16, #tpu.memory_space<vmem>>, %arg5: memref<512x128xbf16, #tpu.memory_space<vmem>>, %arg6: memref<1x128xf32, #tpu.memory_space<vmem>>, %arg7: memref<1x256x128xf32, #tpu.memory_space<vmem>>, %arg8: memref<256x128xf32, #tpu.memory_space<vmem>>) attributes {dimension_semantics = [#tpu.dimension_semantics<parallel>, #tpu.dimension_semantics<parallel>, #tpu.dimension_semantics<parallel>, #tpu.dimension_semantics<arbitrary>], iteration_bounds = array<i64: 2, 1, 1, 1>, scalar_prefetch = 0 : i64, scratch_operands = 1 : i64, tpu.core_type = #tpu.core_type<tc>, window_params = [{transform_indices = @transform_0, window_bounds = array<i64: 1, 256, 512>}, {transform_indices = @transform_1, window_bounds = array<i64: 512, 128>}, {transform_indices = @transform_2, window_bounds = array<i64: 1, 128>}, {transform_indices = @transform_3, window_bounds = array<i64: 1, 256, 128>}]} {
    %c0_i32 = arith.constant 0 : i32
    %0 = arith.cmpi eq, %arg3, %c0_i32 : i32
    %1 = arith.extui %0 : i1 to i32
    %c0_i32_0 = arith.constant 0 : i32
    %2 = arith.cmpi ne, %1, %c0_i32_0 : i32
    scf.if %2 {
      %cst_11 = arith.constant 0.000000e+00 : f32
      %13 = vector.broadcast %cst_11 : f32 to vector<256x128xf32>
      %c0_12 = arith.constant 0 : index
      %c0_13 = arith.constant 0 : index
      %14 = vector.load %arg8[%c0_12, %c0_13] : memref<256x128xf32, #tpu.memory_space<vmem>>, vector<256x128xf32>
      tpu.vector_store %arg8[%c0_12, %c0_13], %13 {strides = array<i32>} : memref<256x128xf32, #tpu.memory_space<vmem>>, vector<256x128xf32>,
    } else {
    }
    %c0 = arith.constant 0 : index
    %c0_1 = arith.constant 0 : index
    %3 = vector.load %arg8[%c0, %c0_1] : memref<256x128xf32, #tpu.memory_space<vmem>>, vector<256x128xf32>
    %c0_2 = arith.constant 0 : index
    %c0_3 = arith.constant 0 : index
    %c0_4 = arith.constant 0 : index
    %4 = vector.load %arg4[%c0_2, %c0_3, %c0_4] : memref<1x256x512xbf16, #tpu.memory_space<vmem>>, vector<1x256x512xbf16>
    %5 = vector.shape_cast %4 : vector<1x256x512xbf16> to vector<256x512xbf16>
    %c0_5 = arith.constant 0 : index
    %c0_6 = arith.constant 0 : index
    %6 = vector.load %arg5[%c0_5, %c0_6] : memref<512x128xbf16, #tpu.memory_space<vmem>>, vector<512x128xbf16>
    %cst = arith.constant dense<0.000000e+00> : vector<256x128xf32>
    %7 = tpu.matmul %5, %6, %cst {dimension_numbers = #tpu.dot_dimension_numbers<[1], [0], [0], [1], [0, 0, 1, 1], [], []>} : vector<256x512xbf16>, vector<512x128xbf16>, vector<256x128xf32> -> vector<256x128xf32>
    %8 = arith.addf %3, %7 : vector<256x128xf32>
    %c0_7 = arith.constant 0 : index
    %c0_8 = arith.constant 0 : index
    %9 = vector.load %arg8[%c0_7, %c0_8] : memref<256x128xf32, #tpu.memory_space<vmem>>, vector<256x128xf32>
    tpu.vector_store %arg8[%c0_7, %c0_8], %8 {strides = array<i32>} : memref<256x128xf32, #tpu.memory_space<vmem>>, vector<256x128xf32>,
    %c0_i32_9 = arith.constant 0 : i32
    %10 = arith.cmpi eq, %arg3, %c0_i32_9 : i32
    %11 = arith.extui %10 : i1 to i32
    %c0_i32_10 = arith.constant 0 : i32
    %12 = arith.cmpi ne, %11, %c0_i32_10 : i32
    scf.if %12 {
      %c0_11 = arith.constant 0 : index
      %c0_12 = arith.constant 0 : index
      %13 = vector.load %arg8[%c0_11, %c0_12] : memref<256x128xf32, #tpu.memory_space<vmem>>, vector<256x128xf32>
      %c0_13 = arith.constant 0 : index
      %c0_14 = arith.constant 0 : index
      %14 = vector.load %arg6[%c0_13, %c0_14] : memref<1x128xf32, #tpu.memory_space<vmem>>, vector<1x128xf32>
      %15 = vector.broadcast %14 : vector<1x128xf32> to vector<256x128xf32>
      %16 = arith.addf %13, %15 : vector<256x128xf32>
      %c0_15 = arith.constant 0 : index
      %c0_16 = arith.constant 0 : index
      %c0_17 = arith.constant 0 : index
      %17 = vector.load %arg7[%c0_15, %c0_16, %c0_17] : memref<1x256x128xf32, #tpu.memory_space<vmem>>, vector<1x256x128xf32>
      %18 = vector.shape_cast %17 : vector<1x256x128xf32> to vector<256x128xf32>
      %19 = vector.shape_cast %16 : vector<256x128xf32> to vector<1x256x128xf32>
      tpu.vector_store %arg7[%c0_15, %c0_16, %c0_17], %19 {strides = array<i32>} : memref<1x256x128xf32, #tpu.memory_space<vmem>>, vector<1x256x128xf32>,
    } else {
    }
    return
  }
  func.func @transform_0(%arg0: i32, %arg1: i32, %arg2: i32, %arg3: i32) -> (i32, i32, i32) {
    %c0_i32 = arith.constant 0 : i32
    return %arg0, %arg1, %arg3 : i32, i32, i32
  }
  func.func @transform_1(%arg0: i32, %arg1: i32, %arg2: i32, %arg3: i32) -> (i32, i32) {
    %c0_i32 = arith.constant 0 : i32
    return %arg3, %arg2 : i32, i32
  }
  func.func @transform_2(%arg0: i32, %arg1: i32, %arg2: i32, %arg3: i32) -> (i32, i32) {
    %c0_i32 = arith.constant 0 : i32
    %c0_i32_0 = arith.constant 0 : i32
    return %c0_i32, %arg2 : i32, i32
  }
  func.func @transform_3(%arg0: i32, %arg1: i32, %arg2: i32, %arg3: i32) -> (i32, i32, i32) {
    %c0_i32 = arith.constant 0 : i32
    return %arg0, %arg1, %arg2 : i32, i32, i32
  }
}

module attributes {stable_mosaic.version = 11 : i64} {
  func.func @_conv_mm_kernel(%arg0: i32, %arg1: i32, %arg2: i32, %arg3: i32, %arg4: memref<1x256x512xbf16, #tpu.memory_space<vmem>>, %arg5: memref<512x128xbf16, #tpu.memory_space<vmem>>, %arg6: memref<1x128xf32, #tpu.memory_space<vmem>>, %arg7: memref<1x256x128xf32, #tpu.memory_space<vmem>>, %arg8: memref<256x128xf32, #tpu.memory_space<vmem>>) attributes {dimension_semantics = [#tpu.dimension_semantics<parallel>, #tpu.dimension_semantics<parallel>, #tpu.dimension_semantics<parallel>, #tpu.dimension_semantics<arbitrary>], iteration_bounds = array<i64: 2, 1, 1, 2>, scalar_prefetch = 0 : i64, scratch_operands = 1 : i64, tpu.core_type = #tpu.core_type<tc>, window_params = [{transform_indices = @transform_0, window_bounds = array<i64: 1, 256, 512>}, {transform_indices = @transform_1, window_bounds = array<i64: 512, 128>}, {transform_indices = @transform_2, window_bounds = array<i64: 1, 128>}, {transform_indices = @transform_3, window_bounds = array<i64: 1, 256, 128>}]} {
    %c0_i32 = arith.constant 0 : i32
    %0 = arith.cmpi eq, %arg3, %c0_i32 : i32
    %1 = arith.extui %0 : i1 to i32
    %c0_i32_0 = arith.constant 0 : i32
    %2 = arith.cmpi ne, %1, %c0_i32_0 : i32
    scf.if %2 {
      %cst_10 = arith.constant 0.000000e+00 : f32
      %13 = vector.broadcast %cst_10 : f32 to vector<256x128xf32>
      %c0_11 = arith.constant 0 : index
      %c0_12 = arith.constant 0 : index
      %14 = vector.load %arg8[%c0_11, %c0_12] : memref<256x128xf32, #tpu.memory_space<vmem>>, vector<256x128xf32>
      tpu.vector_store %arg8[%c0_11, %c0_12], %13 {strides = array<i32>} : memref<256x128xf32, #tpu.memory_space<vmem>>, vector<256x128xf32>,
    } else {
    }
    %c0 = arith.constant 0 : index
    %c0_1 = arith.constant 0 : index
    %3 = vector.load %arg8[%c0, %c0_1] : memref<256x128xf32, #tpu.memory_space<vmem>>, vector<256x128xf32>
    %c0_2 = arith.constant 0 : index
    %c0_3 = arith.constant 0 : index
    %c0_4 = arith.constant 0 : index
    %4 = vector.load %arg4[%c0_2, %c0_3, %c0_4] : memref<1x256x512xbf16, #tpu.memory_space<vmem>>, vector<1x256x512xbf16>
    %5 = vector.shape_cast %4 : vector<1x256x512xbf16> to vector<256x512xbf16>
    %c0_5 = arith.constant 0 : index
    %c0_6 = arith.constant 0 : index
    %6 = vector.load %arg5[%c0_5, %c0_6] : memref<512x128xbf16, #tpu.memory_space<vmem>>, vector<512x128xbf16>
    %cst = arith.constant dense<0.000000e+00> : vector<256x128xf32>
    %7 = tpu.matmul %5, %6, %cst {dimension_numbers = #tpu.dot_dimension_numbers<[1], [0], [0], [1], [0, 0, 1, 1], [], []>} : vector<256x512xbf16>, vector<512x128xbf16>, vector<256x128xf32> -> vector<256x128xf32>
    %8 = arith.addf %3, %7 : vector<256x128xf32>
    %c0_7 = arith.constant 0 : index
    %c0_8 = arith.constant 0 : index
    %9 = vector.load %arg8[%c0_7, %c0_8] : memref<256x128xf32, #tpu.memory_space<vmem>>, vector<256x128xf32>
    tpu.vector_store %arg8[%c0_7, %c0_8], %8 {strides = array<i32>} : memref<256x128xf32, #tpu.memory_space<vmem>>, vector<256x128xf32>,
    %c1_i32 = arith.constant 1 : i32
    %10 = arith.cmpi eq, %arg3, %c1_i32 : i32
    %11 = arith.extui %10 : i1 to i32
    %c0_i32_9 = arith.constant 0 : i32
    %12 = arith.cmpi ne, %11, %c0_i32_9 : i32
    scf.if %12 {
      %c0_10 = arith.constant 0 : index
      %c0_11 = arith.constant 0 : index
      %13 = vector.load %arg8[%c0_10, %c0_11] : memref<256x128xf32, #tpu.memory_space<vmem>>, vector<256x128xf32>
      %c0_12 = arith.constant 0 : index
      %c0_13 = arith.constant 0 : index
      %14 = vector.load %arg6[%c0_12, %c0_13] : memref<1x128xf32, #tpu.memory_space<vmem>>, vector<1x128xf32>
      %15 = vector.broadcast %14 : vector<1x128xf32> to vector<256x128xf32>
      %16 = arith.addf %13, %15 : vector<256x128xf32>
      %c0_14 = arith.constant 0 : index
      %c0_15 = arith.constant 0 : index
      %c0_16 = arith.constant 0 : index
      %17 = vector.load %arg7[%c0_14, %c0_15, %c0_16] : memref<1x256x128xf32, #tpu.memory_space<vmem>>, vector<1x256x128xf32>
      %18 = vector.shape_cast %17 : vector<1x256x128xf32> to vector<256x128xf32>
      %19 = vector.shape_cast %16 : vector<256x128xf32> to vector<1x256x128xf32>
      tpu.vector_store %arg7[%c0_14, %c0_15, %c0_16], %19 {strides = array<i32>} : memref<1x256x128xf32, #tpu.memory_space<vmem>>, vector<1x256x128xf32>,
    } else {
    }
    return
  }
  func.func @transform_0(%arg0: i32, %arg1: i32, %arg2: i32, %arg3: i32) -> (i32, i32, i32) {
    %c0_i32 = arith.constant 0 : i32
    return %arg0, %arg1, %arg3 : i32, i32, i32
  }
  func.func @transform_1(%arg0: i32, %arg1: i32, %arg2: i32, %arg3: i32) -> (i32, i32) {
    %c0_i32 = arith.constant 0 : i32
    return %arg3, %arg2 : i32, i32
  }
  func.func @transform_2(%arg0: i32, %arg1: i32, %arg2: i32, %arg3: i32) -> (i32, i32) {
    %c0_i32 = arith.constant 0 : i32
    %c0_i32_0 = arith.constant 0 : i32
    return %c0_i32, %arg2 : i32, i32
  }
  func.func @transform_3(%arg0: i32, %arg1: i32, %arg2: i32, %arg3: i32) -> (i32, i32, i32) {
    %c0_i32 = arith.constant 0 : i32
    return %arg0, %arg1, %arg2 : i32, i32, i32
  }
}

module attributes {stable_mosaic.version = 11 : i64} {
  func.func @_in_stats_kernel(%arg0: i32, %arg1: i32, %arg2: memref<1x256x128xf32, #tpu.memory_space<vmem>>, %arg3: memref<1x2x128xf32, #tpu.memory_space<vmem>>, %arg4: memref<1x128xf32, #tpu.memory_space<vmem>>, %arg5: memref<1x128xf32, #tpu.memory_space<vmem>>) attributes {dimension_semantics = [#tpu.dimension_semantics<parallel>, #tpu.dimension_semantics<arbitrary>], iteration_bounds = array<i64: 2, 1>, scalar_prefetch = 0 : i64, scratch_operands = 2 : i64, tpu.core_type = #tpu.core_type<tc>, window_params = [{transform_indices = @transform_0, window_bounds = array<i64: 1, 256, 128>}, {transform_indices = @transform_1, window_bounds = array<i64: 1, 2, 128>}]} {
    %c0_i32 = arith.constant 0 : i32
    %0 = arith.cmpi eq, %arg1, %c0_i32 : i32
    %1 = arith.extui %0 : i1 to i32
    %c0_i32_0 = arith.constant 0 : i32
    %2 = arith.cmpi ne, %1, %c0_i32_0 : i32
    scf.if %2 {
      %cst_15 = arith.constant 0.000000e+00 : f32
      %27 = vector.broadcast %cst_15 : f32 to vector<1x128xf32>
      %c0_16 = arith.constant 0 : index
      %c0_17 = arith.constant 0 : index
      %28 = vector.load %arg4[%c0_16, %c0_17] : memref<1x128xf32, #tpu.memory_space<vmem>>, vector<1x128xf32>
      tpu.vector_store %arg4[%c0_16, %c0_17], %27 {strides = array<i32>} : memref<1x128xf32, #tpu.memory_space<vmem>>, vector<1x128xf32>,
      %cst_18 = arith.constant 0.000000e+00 : f32
      %29 = vector.broadcast %cst_18 : f32 to vector<1x128xf32>
      %c0_19 = arith.constant 0 : index
      %c0_20 = arith.constant 0 : index
      %30 = vector.load %arg5[%c0_19, %c0_20] : memref<1x128xf32, #tpu.memory_space<vmem>>, vector<1x128xf32>
      tpu.vector_store %arg5[%c0_19, %c0_20], %29 {strides = array<i32>} : memref<1x128xf32, #tpu.memory_space<vmem>>, vector<1x128xf32>,
    } else {
    }
    %c0 = arith.constant 0 : index
    %c0_1 = arith.constant 0 : index
    %c0_2 = arith.constant 0 : index
    %3 = vector.load %arg2[%c0, %c0_1, %c0_2] : memref<1x256x128xf32, #tpu.memory_space<vmem>>, vector<1x256x128xf32>
    %4 = vector.shape_cast %3 : vector<1x256x128xf32> to vector<256x128xf32>
    %c256_i32 = arith.constant 256 : i32
    %5 = arith.muli %arg1, %c256_i32 : i32
    %6 = tpu.iota {dimensions = array<i32: 0>} : vector<256x128xi32>
    %7 = vector.broadcast %5 : i32 to vector<256x128xi32>
    %8 = arith.addi %7, %6 : vector<256x128xi32>
    %c9_i32 = arith.constant 9 : i32
    %9 = vector.broadcast %c9_i32 : i32 to vector<256x128xi32>
    %10 = arith.cmpi slt, %8, %9 : vector<256x128xi32>
    %cst = arith.constant 0.000000e+00 : f32
    %11 = vector.broadcast %cst : f32 to vector<256x128xf32>
    %12 = arith.select %10, %4, %11 : vector<256x128xi1>, vector<256x128xf32>
    %c0_3 = arith.constant 0 : index
    %c0_4 = arith.constant 0 : index
    %13 = vector.load %arg4[%c0_3, %c0_4] : memref<1x128xf32, #tpu.memory_space<vmem>>, vector<1x128xf32>
    %cst_5 = arith.constant dense<0.000000e+00> : vector<128xf32>
    %14 = vector.multi_reduction <add>, %12, %cst_5 [0] : vector<256x128xf32> to vector<128xf32>
    %15 = vector.shape_cast %14 : vector<128xf32> to vector<1x128xf32>
    %16 = arith.addf %13, %15 : vector<1x128xf32>
    %c0_6 = arith.constant 0 : index
    %c0_7 = arith.constant 0 : index
    %17 = vector.load %arg4[%c0_6, %c0_7] : memref<1x128xf32, #tpu.memory_space<vmem>>, vector<1x128xf32>
    tpu.vector_store %arg4[%c0_6, %c0_7], %16 {strides = array<i32>} : memref<1x128xf32, #tpu.memory_space<vmem>>, vector<1x128xf32>,
    %c0_8 = arith.constant 0 : index
    %c0_9 = arith.constant 0 : index
    %18 = vector.load %arg5[%c0_8, %c0_9] : memref<1x128xf32, #tpu.memory_space<vmem>>, vector<1x128xf32>
    %19 = arith.mulf %12, %12 : vector<256x128xf32>
    %cst_10 = arith.constant dense<0.000000e+00> : vector<128xf32>
    %20 = vector.multi_reduction <add>, %19, %cst_10 [0] : vector<256x128xf32> to vector<128xf32>
    %21 = vector.shape_cast %20 : vector<128xf32> to vector<1x128xf32>
    %22 = arith.addf %18, %21 : vector<1x128xf32>
    %c0_11 = arith.constant 0 : index
    %c0_12 = arith.constant 0 : index
    %23 = vector.load %arg5[%c0_11, %c0_12] : memref<1x128xf32, #tpu.memory_space<vmem>>, vector<1x128xf32>
    tpu.vector_store %arg5[%c0_11, %c0_12], %22 {strides = array<i32>} : memref<1x128xf32, #tpu.memory_space<vmem>>, vector<1x128xf32>,
    %c0_i32_13 = arith.constant 0 : i32
    %24 = arith.cmpi eq, %arg1, %c0_i32_13 : i32
    %25 = arith.extui %24 : i1 to i32
    %c0_i32_14 = arith.constant 0 : i32
    %26 = arith.cmpi ne, %25, %c0_i32_14 : i32
    scf.if %26 {
      %c0_15 = arith.constant 0 : index
      %c0_16 = arith.constant 0 : index
      %27 = vector.load %arg4[%c0_15, %c0_16] : memref<1x128xf32, #tpu.memory_space<vmem>>, vector<1x128xf32>
      %cst_17 = arith.constant 0.111111112 : f32
      %28 = vector.broadcast %cst_17 : f32 to vector<1x128xf32>
      %29 = arith.mulf %27, %28 : vector<1x128xf32>
      %c0_18 = arith.constant 0 : index
      %c0_19 = arith.constant 0 : index
      %30 = vector.load %arg5[%c0_18, %c0_19] : memref<1x128xf32, #tpu.memory_space<vmem>>, vector<1x128xf32>
      %cst_20 = arith.constant 0.111111112 : f32
      %31 = vector.broadcast %cst_20 : f32 to vector<1x128xf32>
      %32 = arith.mulf %30, %31 : vector<1x128xf32>
      %33 = arith.mulf %29, %29 : vector<1x128xf32>
      %34 = arith.subf %32, %33 : vector<1x128xf32>
      %cst_21 = arith.constant 9.99999974E-6 : f32
      %35 = vector.broadcast %cst_21 : f32 to vector<1x128xf32>
      %36 = arith.addf %34, %35 : vector<1x128xf32>
      %37 = math.rsqrt %36 : vector<1x128xf32>
      %38 = tpu.concatenate %29, %37 in 0 : vector<1x128xf32>, vector<1x128xf32> -> vector<2x128xf32>
      %c0_22 = arith.constant 0 : index
      %c0_23 = arith.constant 0 : index
      %c0_24 = arith.constant 0 : index
      %39 = vector.load %arg3[%c0_22, %c0_23, %c0_24] : memref<1x2x128xf32, #tpu.memory_space<vmem>>, vector<1x2x128xf32>
      %40 = vector.shape_cast %39 : vector<1x2x128xf32> to vector<2x128xf32>
      %41 = vector.shape_cast %38 : vector<2x128xf32> to vector<1x2x128xf32>
      tpu.vector_store %arg3[%c0_22, %c0_23, %c0_24], %41 {strides = array<i32>} : memref<1x2x128xf32, #tpu.memory_space<vmem>>, vector<1x2x128xf32>,
    } else {
    }
    return
  }
  func.func @transform_0(%arg0: i32, %arg1: i32) -> (i32, i32, i32) {
    %c0_i32 = arith.constant 0 : i32
    %c0_i32_0 = arith.constant 0 : i32
    return %arg0, %arg1, %c0_i32 : i32, i32, i32
  }
  func.func @transform_1(%arg0: i32, %arg1: i32) -> (i32, i32, i32) {
    %c0_i32 = arith.constant 0 : i32
    %c0_i32_0 = arith.constant 0 : i32
    %c0_i32_1 = arith.constant 0 : i32
    return %arg0, %c0_i32, %c0_i32_0 : i32, i32, i32
  }
}

module attributes {stable_mosaic.version = 11 : i64} {
  func.func @_conv_mm_kernel(%arg0: i32, %arg1: i32, %arg2: i32, %arg3: i32, %arg4: memref<1x256x512xbf16, #tpu.memory_space<vmem>>, %arg5: memref<512x128xbf16, #tpu.memory_space<vmem>>, %arg6: memref<1x128xf32, #tpu.memory_space<vmem>>, %arg7: memref<1x256x128xf32, #tpu.memory_space<vmem>>, %arg8: memref<256x128xf32, #tpu.memory_space<vmem>>) attributes {dimension_semantics = [#tpu.dimension_semantics<parallel>, #tpu.dimension_semantics<parallel>, #tpu.dimension_semantics<parallel>, #tpu.dimension_semantics<arbitrary>], iteration_bounds = array<i64: 2, 1, 1, 4>, scalar_prefetch = 0 : i64, scratch_operands = 1 : i64, tpu.core_type = #tpu.core_type<tc>, window_params = [{transform_indices = @transform_0, window_bounds = array<i64: 1, 256, 512>}, {transform_indices = @transform_1, window_bounds = array<i64: 512, 128>}, {transform_indices = @transform_2, window_bounds = array<i64: 1, 128>}, {transform_indices = @transform_3, window_bounds = array<i64: 1, 256, 128>}]} {
    %c0_i32 = arith.constant 0 : i32
    %0 = arith.cmpi eq, %arg3, %c0_i32 : i32
    %1 = arith.extui %0 : i1 to i32
    %c0_i32_0 = arith.constant 0 : i32
    %2 = arith.cmpi ne, %1, %c0_i32_0 : i32
    scf.if %2 {
      %cst_10 = arith.constant 0.000000e+00 : f32
      %13 = vector.broadcast %cst_10 : f32 to vector<256x128xf32>
      %c0_11 = arith.constant 0 : index
      %c0_12 = arith.constant 0 : index
      %14 = vector.load %arg8[%c0_11, %c0_12] : memref<256x128xf32, #tpu.memory_space<vmem>>, vector<256x128xf32>
      tpu.vector_store %arg8[%c0_11, %c0_12], %13 {strides = array<i32>} : memref<256x128xf32, #tpu.memory_space<vmem>>, vector<256x128xf32>,
    } else {
    }
    %c0 = arith.constant 0 : index
    %c0_1 = arith.constant 0 : index
    %3 = vector.load %arg8[%c0, %c0_1] : memref<256x128xf32, #tpu.memory_space<vmem>>, vector<256x128xf32>
    %c0_2 = arith.constant 0 : index
    %c0_3 = arith.constant 0 : index
    %c0_4 = arith.constant 0 : index
    %4 = vector.load %arg4[%c0_2, %c0_3, %c0_4] : memref<1x256x512xbf16, #tpu.memory_space<vmem>>, vector<1x256x512xbf16>
    %5 = vector.shape_cast %4 : vector<1x256x512xbf16> to vector<256x512xbf16>
    %c0_5 = arith.constant 0 : index
    %c0_6 = arith.constant 0 : index
    %6 = vector.load %arg5[%c0_5, %c0_6] : memref<512x128xbf16, #tpu.memory_space<vmem>>, vector<512x128xbf16>
    %cst = arith.constant dense<0.000000e+00> : vector<256x128xf32>
    %7 = tpu.matmul %5, %6, %cst {dimension_numbers = #tpu.dot_dimension_numbers<[1], [0], [0], [1], [0, 0, 1, 1], [], []>} : vector<256x512xbf16>, vector<512x128xbf16>, vector<256x128xf32> -> vector<256x128xf32>
    %8 = arith.addf %3, %7 : vector<256x128xf32>
    %c0_7 = arith.constant 0 : index
    %c0_8 = arith.constant 0 : index
    %9 = vector.load %arg8[%c0_7, %c0_8] : memref<256x128xf32, #tpu.memory_space<vmem>>, vector<256x128xf32>
    tpu.vector_store %arg8[%c0_7, %c0_8], %8 {strides = array<i32>} : memref<256x128xf32, #tpu.memory_space<vmem>>, vector<256x128xf32>,
    %c3_i32 = arith.constant 3 : i32
    %10 = arith.cmpi eq, %arg3, %c3_i32 : i32
    %11 = arith.extui %10 : i1 to i32
    %c0_i32_9 = arith.constant 0 : i32
    %12 = arith.cmpi ne, %11, %c0_i32_9 : i32
    scf.if %12 {
      %c0_10 = arith.constant 0 : index
      %c0_11 = arith.constant 0 : index
      %13 = vector.load %arg8[%c0_10, %c0_11] : memref<256x128xf32, #tpu.memory_space<vmem>>, vector<256x128xf32>
      %c0_12 = arith.constant 0 : index
      %c0_13 = arith.constant 0 : index
      %14 = vector.load %arg6[%c0_12, %c0_13] : memref<1x128xf32, #tpu.memory_space<vmem>>, vector<1x128xf32>
      %15 = vector.broadcast %14 : vector<1x128xf32> to vector<256x128xf32>
      %16 = arith.addf %13, %15 : vector<256x128xf32>
      %c0_14 = arith.constant 0 : index
      %c0_15 = arith.constant 0 : index
      %c0_16 = arith.constant 0 : index
      %17 = vector.load %arg7[%c0_14, %c0_15, %c0_16] : memref<1x256x128xf32, #tpu.memory_space<vmem>>, vector<1x256x128xf32>
      %18 = vector.shape_cast %17 : vector<1x256x128xf32> to vector<256x128xf32>
      %19 = vector.shape_cast %16 : vector<256x128xf32> to vector<1x256x128xf32>
      tpu.vector_store %arg7[%c0_14, %c0_15, %c0_16], %19 {strides = array<i32>} : memref<1x256x128xf32, #tpu.memory_space<vmem>>, vector<1x256x128xf32>,
    } else {
    }
    return
  }
  func.func @transform_0(%arg0: i32, %arg1: i32, %arg2: i32, %arg3: i32) -> (i32, i32, i32) {
    %c0_i32 = arith.constant 0 : i32
    return %arg0, %arg1, %arg3 : i32, i32, i32
  }
  func.func @transform_1(%arg0: i32, %arg1: i32, %arg2: i32, %arg3: i32) -> (i32, i32) {
    %c0_i32 = arith.constant 0 : i32
    return %arg3, %arg2 : i32, i32
  }
  func.func @transform_2(%arg0: i32, %arg1: i32, %arg2: i32, %arg3: i32) -> (i32, i32) {
    %c0_i32 = arith.constant 0 : i32
    %c0_i32_0 = arith.constant 0 : i32
    return %c0_i32, %arg2 : i32, i32
  }
  func.func @transform_3(%arg0: i32, %arg1: i32, %arg2: i32, %arg3: i32) -> (i32, i32, i32) {
    %c0_i32 = arith.constant 0 : i32
    return %arg0, %arg1, %arg2 : i32, i32, i32
  }
}

</mosaic_0001>

<bundles_post_ra>
// kernel: discriminator_forward.11
= control target key start
LH: loop header
LB: loop body
LE: loop exit
PB: predicated region body
PF: predicated region fallthrough
CT: control target
= control target key end

     0   :  { %s1334_s12 = smov 0   ;;  %s1336_s13 = smov 0   ;;  %s1484_s0 = inlined_call_operand.vmem [shape: bf16[2,256,128], index: 0, kind: input, shape index: {}]   ;;  %s1485_s1 = inlined_call_operand.vmem [shape: bf16[128,128], index: 1, kind: input, shape index: {}]   ;;  %s1486_s2 = inlined_call_operand.vmem [shape: f32[1,128], index: 2, kind: input, shape index: {}]   ;;  %s1487_s3 = inlined_call_operand.vmem [shape: f32[2,256,128], index: 3, kind: output, shape index: {}]  }
   0x1   :  { %s1338_s14 = smov 0  }
   0x2 LB: > { %s39_s15 = sadd.s32 1, %s1308_s13  ;;  %p1120_p0 = scmp.ge.s32.totalorder %s1312_s14, 1  ;;  %s1312_s14 = sphi %s1338_s14, %s13_s14   ;;  %s1308_s13 = sphi %s1336_s13, %s1489_s13   ;;  %s1304_s12 = sphi %s1334_s12, %s1488_s12  }
   0x3   : > { %p41_p1 = scmp.ge.s32.totalorder %s39_s15, 2  ;;  %p203_p2 = scmp.lt.s32.totalorder %s1312_s14, 3 }
   0x5   : > { %s1491_s15 = smov (%p41_p1, %s39_s15), 0  ;;  %p204_p3 = pnand %p1120_p0, %p203_p2 }
   0x6   : > { %p253_p4 = scmp.lt.s32.totalorder (!%p204_p3), %s1304_s12, 1 }
   0x7   : > { %207 = sbr.rel (%p204_p3) target bundleno = 275 (0x113), region = 32 }
   0xc   : > { %v1266_v0 = vld [vmem:[%s1485_s1 + $0x38] sm:$0xff]   ;;  %v1267_v1 = vld [vmem:[%s1485_s1 + $0x30] sm:$0xff]   ;;  %s1493_s12 = smov (!%p253_p4, %s1304_s12), 1  ;;  %v1268_v2 = vld [vmem:[%s1485_s1 + $0x28] sm:$0xff]  }
   0xd   : > { %1178 = vmatprep.subr.bf16.mxu0 %v1266_v0  ;;  %1226 = vmatprep.subr.bf16.mxu1 %v1266_v0  ;;  %s1152_s22 = sshll.u32 %s1493_s12, 7  ;;  %v1269_v3 = vld [vmem:[%s1485_s1 + $0x20] sm:$0xff]   ;;  %v1270_v6 = vld [vmem:[%s1485_s1 + $0x18] sm:$0xff]   ;;  %v1271_v7 = vld [vmem:[%s1485_s1 + $0x10] sm:$0xff]   ;;  %s1153_s11 = sshll.u32 %s1493_s12, 8 }
   0xe   : > { %1179 = vmatpush3.bf16.msra.mxu0 %v1266_v0  ;;  %1234 = vmatpush3.bf16.msra.mxu1 %v1266_v0  ;;  %s1367_s25 = scalar_lea.vmem %s1484_s0, %s1152_s22  ;;  %v1272_v8 = vld [vmem:[%s1485_s1 + $0x8] sm:$0xff]   ;;  %v1273_v9 = vld [vmem:[%s1485_s1] sm:$0xff]   ;;  %s1411_s18 = scalar_lea.vmem %s1487_s3, %s1153_s11 }
   0xf   : > { %1180 = vmatprep.subr.bf16.mxu0 %v1267_v1  ;;  %1227 = vmatprep.subr.bf16.mxu1 %v1267_v1  ;;  %v1274_v4 = vld [vmem:[%s1367_s25] sm:$0xff]   ;;  %v1276_v10 = vld [vmem:[%s1367_s25 + $0x8] sm:$0xff]   ;;  %v1278_v12 = vld [vmem:[%s1367_s25 + $0x10] sm:$0xff]  }
  0x10   : > { %v1275_v5 = vld [vmem:[%s1367_s25 + $0x40] sm:$0xff]   ;;  %1194 = vmatprep.mubr.bf16.mxu0 %v1274_v4  ;;  %v1277_v11 = vld [vmem:[%s1367_s25 + $0x48] sm:$0xff]   ;;  %v1279_v13 = vld [vmem:[%s1367_s25 + $0x50] sm:$0xff]  }
  0x11   : > { %1210 = vmatprep.mubr.bf16.mxu1 %v1275_v5  ;;  %v1280_v14 = vld [vmem:[%s1367_s25 + $0x18] sm:$0xff]   ;;  %v1282_v16 = vld [vmem:[%s1367_s25 + $0x20] sm:$0xff]   ;;  %v1284_v18 = vld [vmem:[%s1367_s25 + $0x28] sm:$0xff]  }
  0x12   : > { %1181 = vmatpush3.bf16.msra.mxu0 %v1267_v1  ;;  %1235 = vmatpush3.bf16.msra.mxu1 %v1267_v1  ;;  %v1281_v15 = vld [vmem:[%s1367_s25 + $0x58] sm:$0xff]   ;;  %v1283_v17 = vld [vmem:[%s1367_s25 + $0x60] sm:$0xff]   ;;  %v1285_v19 = vld [vmem:[%s1367_s25 + $0x68] sm:$0xff]  }
  0x13   : > { %1182 = vmatprep.subr.bf16.mxu0 %v1268_v2  ;;  %1228 = vmatprep.subr.bf16.mxu1 %v1268_v2  ;;  %v1286_v20 = vld [vmem:[%s1367_s25 + $0x30] sm:$0xff]   ;;  %v1288_v22 = vld [vmem:[%s1367_s25 + $0x38] sm:$0xff]   ;;  %v1403_v24 = vld [vmem:[%s1486_s2] ss:$0 sm:$0xff] }
  0x14   : > { %v1287_v21 = vld [vmem:[%s1367_s25 + $0x70] sm:$0xff]   ;;  %v1289_v23 = vld [vmem:[%s1367_s25 + $0x78] sm:$0xff]  }
  0x16   : > { %1183 = vmatpush3.bf16.msra.mxu0 %v1268_v2  ;;  %1236 = vmatpush3.bf16.msra.mxu1 %v1268_v2 }
  0x17   : > { %1184 = vmatprep.subr.bf16.mxu0 %v1269_v3  ;;  %1229 = vmatprep.subr.bf16.mxu1 %v1269_v3 }
  0x1a   : > { %1185 = vmatpush3.bf16.msra.mxu0 %v1269_v3  ;;  %1237 = vmatpush3.bf16.msra.mxu1 %v1269_v3 }
  0x1b   : > { %1186 = vmatprep.subr.bf16.mxu0 %v1270_v6  ;;  %1230 = vmatprep.subr.bf16.mxu1 %v1270_v6 }
  0x1e   : > { %1187 = vmatpush3.bf16.msra.mxu0 %v1270_v6  ;;  %1238 = vmatpush3.bf16.msra.mxu1 %v1270_v6 }
  0x1f   : > { %1188 = vmatprep.subr.bf16.mxu0 %v1271_v7  ;;  %1231 = vmatprep.subr.bf16.mxu1 %v1271_v7 }
  0x22   : > { %1189 = vmatpush3.bf16.msra.mxu0 %v1271_v7  ;;  %1239 = vmatpush3.bf16.msra.mxu1 %v1271_v7 }
  0x23   : > { %1190 = vmatprep.subr.bf16.mxu0 %v1272_v8  ;;  %1232 = vmatprep.subr.bf16.mxu1 %v1272_v8 }
  0x26   : > { %1191 = vmatpush3.bf16.msra.mxu0 %v1272_v8  ;;  %1240 = vmatpush3.bf16.msra.mxu1 %v1272_v8 }
  0x27   : > { %1192 = vmatprep.subr.bf16.mxu0 %v1273_v9  ;;  %1233 = vmatprep.subr.bf16.mxu1 %v1273_v9 }
  0x2a   : > { %1193 = vmatpush3.bf16.msra.mxu0 %v1273_v9  ;;  %1241 = vmatpush3.bf16.msra.mxu1 %v1273_v9 }
  0x2d   : > { %1195 = vmatmul.mubr.bf16.vlgmr.msra.gmra.mxu0 %v1276_v10  ;;  %1211 = vmatmul.mubr.bf16.vlgmr.msra.gmra.mxu1 %v1277_v11 }
  0x2e   : > { %1198 = vmatprep.mubr.bf16.mxu0 %v1278_v12  ;;  %1214 = vmatprep.mubr.bf16.mxu1 %v1279_v13 }
  0x35   : > { %1199 = vmatmul.mubr.bf16.gmra.mxu0 %v1280_v14  ;;  %1215 = vmatmul.mubr.bf16.gmra.mxu1 %v1281_v15 }
  0x36   : > { %1202 = vmatprep.mubr.bf16.mxu0 %v1282_v16  ;;  %1218 = vmatprep.mubr.bf16.mxu1 %v1283_v17 }
  0x3d   : > { %1203 = vmatmul.mubr.bf16.gmra.mxu0 %v1284_v18  ;;  %1219 = vmatmul.mubr.bf16.gmra.mxu1 %v1285_v19 }
  0x3e   : > { %1206 = vmatprep.mubr.bf16.mxu0 %v1286_v20  ;;  %1222 = vmatprep.mubr.bf16.mxu1 %v1287_v21 }
  0x45   : > { %1207 = vmatmul.mubr.bf16.gmra.mxu0 %v1288_v22  ;;  %1223 = vmatmul.mubr.bf16.gmra.mxu1 %v1289_v23 }
  0xed   : > { %v1196_v25 = vpop.f32.mrf.mxu0  ;;  %v1212_v26 = vpop.f32.mrf.mxu1 }
  0xee   : > { %v820_v27 = vadd.f32 %v1196_v25, %v1403_v24  ;;  %v836_v28 = vadd.f32 %v1212_v26, %v1403_v24 }
  0xef   : > { %v585_v29 = vpop.f32.mrf.mxu0  ;;  %v649_v30 = vpop.f32.mrf.mxu1 }
  0xf0   : > { %vm852_vm0 = vcmp.ge.f32.partialorder %v820_v27, 0.0  ;;  %v884_v31 = vmul.f32 0.2, %v820_v27  ;;  %vm868_vm1 = vcmp.ge.f32.partialorder %v836_v28, 0.0  ;;  %v900_v32 = vmul.f32 0.2, %v836_v28 }
  0xf1   : > { %v818_v33 = vadd.f32 %v1403_v24, %v585_v29  ;;  %v834_v34 = vadd.f32 %v1403_v24, %v649_v30  ;;  %v1197_v35 = vpop.f32.mrf.mxu0  ;;  %v1213_v36 = vpop.f32.mrf.mxu1 }
  0xf2   : > { %v916_v37 = vsel %vm852_vm0, %v820_v27, %v884_v31  ;;  %v932_v38 = vsel %vm868_vm1, %v836_v28, %v900_v32  ;;  %v821_v39 = vadd.f32 %v1197_v35, %v1403_v24  ;;  %v837_v40 = vadd.f32 %v1213_v36, %v1403_v24 }
  0xf3   : > { %948 = vst [vmem:[%s1411_s18 + $0x10] sm:$0xff] %v916_v37  ;;  %964 = vst [vmem:[%s1411_s18 + $0x90] sm:$0xff] %v932_v38  ;;  %vm850_vm2 = vcmp.ge.f32.partialorder %v818_v33, 0.0  ;;  %v882_v41 = vmul.f32 0.2, %v818_v33  ;;  %vm866_vm3 = vcmp.ge.f32.partialorder %v834_v34, 0.0  ;;  %v588_v43 = vpop.f32.mrf.mxu0  ;;  %v652_v44 = vpop.f32.mrf.mxu1 }
  0xf4   : > { %v898_v42 = vmul.f32 0.2, %v834_v34  ;;  %vm853_vm4 = vcmp.ge.f32.partialorder %v821_v39, 0.0  ;;  %v885_v45 = vmul.f32 0.2, %v821_v39  ;;  %vm869_vm5 = vcmp.ge.f32.partialorder %v837_v40, 0.0 }
  0xf5   : > { %v901_v46 = vmul.f32 0.2, %v837_v40  ;;  %v914_v47 = vsel %vm850_vm2, %v818_v33, %v882_v41  ;;  %v819_v49 = vadd.f32 %v1403_v24, %v588_v43  ;;  %v835_v50 = vadd.f32 %v1403_v24, %v652_v44  ;;  %v1200_v51 = vpop.f32.mrf.mxu0  ;;  %v1216_v52 = vpop.f32.mrf.mxu1 }
  0xf6   : > { %v930_v48 = vsel %vm866_vm3, %v834_v34, %v898_v42  ;;  %946 = vst [vmem:[%s1411_s18] sm:$0xff] %v914_v47  ;;  %v917_v53 = vsel %vm853_vm4, %v821_v39, %v885_v45  ;;  %v824_v55 = vadd.f32 %v1200_v51, %v1403_v24  ;;  %v840_v56 = vadd.f32 %v1216_v52, %v1403_v24 }
  0xf7   : > { %962 = vst [vmem:[%s1411_s18 + $0x80] sm:$0xff] %v930_v48  ;;  %v933_v54 = vsel %vm869_vm5, %v837_v40, %v901_v46  ;;  %949 = vst [vmem:[%s1411_s18 + $0x18] sm:$0xff] %v917_v53  ;;  %vm851_vm6 = vcmp.ge.f32.partialorder %v819_v49, 0.0  ;;  %v883_v57 = vmul.f32 0.2, %v819_v49  ;;  %vm867_vm7 = vcmp.ge.f32.partialorder %v835_v50, 0.0  ;;  %v601_v59 = vpop.f32.mrf.mxu0  ;;  %v665_v60 = vpop.f32.mrf.mxu1 }
  0xf8   : > { %965 = vst [vmem:[%s1411_s18 + $0x98] sm:$0xff] %v933_v54  ;;  %v899_v58 = vmul.f32 0.2, %v835_v50  ;;  %vm856_vm8 = vcmp.ge.f32.partialorder %v824_v55, 0.0  ;;  %v888_v61 = vmul.f32 0.2, %v824_v55  ;;  %v822_v1 = vadd.f32 %v1403_v24, %v601_v59 }
  0xf9   : > { %vm872_vm9 = vcmp.ge.f32.partialorder %v840_v56, 0.0  ;;  %v904_v62 = vmul.f32 0.2, %v840_v56  ;;  %v915_v63 = vsel %vm851_vm6, %v819_v49, %v883_v57  ;;  %v838_v2 = vadd.f32 %v1403_v24, %v665_v60  ;;  %v1201_v3 = vpop.f32.mrf.mxu0  ;;  %v1217_v4 = vpop.f32.mrf.mxu1 }
  0xfa   : > { %v931_v0 = vsel %vm867_vm7, %v835_v50, %v899_v58  ;;  %947 = vst [vmem:[%s1411_s18 + $0x8] sm:$0xff] %v915_v63  ;;  %v920_v5 = vsel %vm856_vm8, %v824_v55, %v888_v61  ;;  %v825_v7 = vadd.f32 %v1201_v3, %v1403_v24  ;;  %v841_v8 = vadd.f32 %v1217_v4, %v1403_v24 }
  0xfb   : > { %963 = vst [vmem:[%s1411_s18 + $0x88] sm:$0xff] %v931_v0  ;;  %v936_v6 = vsel %vm872_vm9, %v840_v56, %v904_v62  ;;  %952 = vst [vmem:[%s1411_s18 + $0x30] sm:$0xff] %v920_v5  ;;  %vm854_vm10 = vcmp.ge.f32.partialorder %v822_v1, 0.0  ;;  %v886_v9 = vmul.f32 0.2, %v822_v1  ;;  %vm870_vm11 = vcmp.ge.f32.partialorder %v838_v2, 0.0  ;;  %v604_v11 = vpop.f32.mrf.mxu0  ;;  %v668_v12 = vpop.f32.mrf.mxu1 }
  0xfc   : > { %968 = vst [vmem:[%s1411_s18 + $0xb0] sm:$0xff] %v936_v6  ;;  %v902_v10 = vmul.f32 0.2, %v838_v2  ;;  %vm857_vm12 = vcmp.ge.f32.partialorder %v825_v7, 0.0  ;;  %v889_v13 = vmul.f32 0.2, %v825_v7  ;;  %v823_v17 = vadd.f32 %v1403_v24, %v604_v11 }
  0xfd   : > { %vm873_vm13 = vcmp.ge.f32.partialorder %v841_v8, 0.0  ;;  %v905_v14 = vmul.f32 0.2, %v841_v8  ;;  %v918_v15 = vsel %vm854_vm10, %v822_v1, %v886_v9  ;;  %v839_v18 = vadd.f32 %v1403_v24, %v668_v12  ;;  %v1204_v19 = vpop.f32.mrf.mxu0  ;;  %v1220_v20 = vpop.f32.mrf.mxu1 }
  0xfe   : > { %v934_v16 = vsel %vm870_vm11, %v838_v2, %v902_v10  ;;  %950 = vst [vmem:[%s1411_s18 + $0x20] sm:$0xff] %v918_v15  ;;  %v921_v21 = vsel %vm857_vm12, %v825_v7, %v889_v13  ;;  %v828_v23 = vadd.f32 %v1204_v19, %v1403_v24  ;;  %v844_v25 = vadd.f32 %v1220_v20, %v1403_v24 }
  0xff   : > { %966 = vst [vmem:[%s1411_s18 + $0xa0] sm:$0xff] %v934_v16  ;;  %v937_v22 = vsel %vm873_vm13, %v841_v8, %v905_v14  ;;  %953 = vst [vmem:[%s1411_s18 + $0x38] sm:$0xff] %v921_v21  ;;  %vm855_vm14 = vcmp.ge.f32.partialorder %v823_v17, 0.0  ;;  %v887_v26 = vmul.f32 0.2, %v823_v17  ;;  %vm871_vm15 = vcmp.ge.f32.partialorder %v839_v18, 0.0  ;;  %v617_v28 = vpop.f32.mrf.mxu0  ;;  %v681_v29 = vpop.f32.mrf.mxu1 }
 0x100   : > { %969 = vst [vmem:[%s1411_s18 + $0xb8] sm:$0xff] %v937_v22  ;;  %v903_v27 = vmul.f32 0.2, %v839_v18  ;;  %vm860_vm0 = vcmp.ge.f32.partialorder %v828_v23, 0.0  ;;  %v892_v30 = vmul.f32 0.2, %v828_v23  ;;  %v826_v34 = vadd.f32 %v1403_v24, %v617_v28 }
 0x101   : > { %vm876_vm1 = vcmp.ge.f32.partialorder %v844_v25, 0.0  ;;  %v908_v31 = vmul.f32 0.2, %v844_v25  ;;  %v919_v32 = vsel %vm855_vm14, %v823_v17, %v887_v26  ;;  %v842_v35 = vadd.f32 %v1403_v24, %v681_v29  ;;  %v1205_v36 = vpop.f32.mrf.mxu0  ;;  %v1221_v37 = vpop.f32.mrf.mxu1 }
 0x102   : > { %v935_v33 = vsel %vm871_vm15, %v839_v18, %v903_v27  ;;  %951 = vst [vmem:[%s1411_s18 + $0x28] sm:$0xff] %v919_v32  ;;  %v924_v38 = vsel %vm860_vm0, %v828_v23, %v892_v30  ;;  %v829_v40 = vadd.f32 %v1205_v36, %v1403_v24  ;;  %v845_v41 = vadd.f32 %v1221_v37, %v1403_v24 }
 0x103   : > { %967 = vst [vmem:[%s1411_s18 + $0xa8] sm:$0xff] %v935_v33  ;;  %v940_v39 = vsel %vm876_vm1, %v844_v25, %v908_v31  ;;  %956 = vst [vmem:[%s1411_s18 + $0x50] sm:$0xff] %v924_v38  ;;  %vm858_vm2 = vcmp.ge.f32.partialorder %v826_v34, 0.0  ;;  %v890_v42 = vmul.f32 0.2, %v826_v34  ;;  %vm874_vm3 = vcmp.ge.f32.partialorder %v842_v35, 0.0  ;;  %v620_v44 = vpop.f32.mrf.mxu0  ;;  %v684_v45 = vpop.f32.mrf.mxu1 }
 0x104   : > { %972 = vst [vmem:[%s1411_s18 + $0xd0] sm:$0xff] %v940_v39  ;;  %v906_v43 = vmul.f32 0.2, %v842_v35  ;;  %vm861_vm4 = vcmp.ge.f32.partialorder %v829_v40, 0.0  ;;  %v893_v46 = vmul.f32 0.2, %v829_v40  ;;  %v827_v50 = vadd.f32 %v1403_v24, %v620_v44 }
 0x105   : > { %vm877_vm5 = vcmp.ge.f32.partialorder %v845_v41, 0.0  ;;  %v909_v47 = vmul.f32 0.2, %v845_v41  ;;  %v922_v48 = vsel %vm858_vm2, %v826_v34, %v890_v42  ;;  %v843_v51 = vadd.f32 %v1403_v24, %v684_v45  ;;  %v1208_v52 = vpop.f32.mrf.mxu0  ;;  %v1224_v53 = vpop.f32.mrf.mxu1 }
 0x106   : > { %v938_v49 = vsel %vm874_vm3, %v842_v35, %v906_v43  ;;  %954 = vst [vmem:[%s1411_s18 + $0x40] sm:$0xff] %v922_v48  ;;  %v925_v54 = vsel %vm861_vm4, %v829_v40, %v893_v46  ;;  %v832_v56 = vadd.f32 %v1208_v52, %v1403_v24  ;;  %v848_v57 = vadd.f32 %v1224_v53, %v1403_v24 }
 0x107   : > { %970 = vst [vmem:[%s1411_s18 + $0xc0] sm:$0xff] %v938_v49  ;;  %v941_v55 = vsel %vm877_vm5, %v845_v41, %v909_v47  ;;  %957 = vst [vmem:[%s1411_s18 + $0x58] sm:$0xff] %v925_v54  ;;  %vm859_vm6 = vcmp.ge.f32.partialorder %v827_v50, 0.0  ;;  %v891_v58 = vmul.f32 0.2, %v827_v50  ;;  %vm875_vm7 = vcmp.ge.f32.partialorder %v843_v51, 0.0  ;;  %v633_v60 = vpop.f32.mrf.mxu0  ;;  %v697_v61 = vpop.f32.mrf.mxu1 }
 0x108   : > { %973 = vst [vmem:[%s1411_s18 + $0xd8] sm:$0xff] %v941_v55  ;;  %v907_v59 = vmul.f32 0.2, %v843_v51  ;;  %vm864_vm8 = vcmp.ge.f32.partialorder %v832_v56, 0.0  ;;  %v896_v62 = vmul.f32 0.2, %v832_v56  ;;  %v830_v2 = vadd.f32 %v1403_v24, %v633_v60 }
 0x109   : > { %vm880_vm9 = vcmp.ge.f32.partialorder %v848_v57, 0.0  ;;  %v912_v63 = vmul.f32 0.2, %v848_v57  ;;  %v923_v0 = vsel %vm859_vm6, %v827_v50, %v891_v58  ;;  %v846_v3 = vadd.f32 %v1403_v24, %v697_v61  ;;  %v1209_v4 = vpop.f32.mrf.mxu0  ;;  %v1225_v5 = vpop.f32.mrf.mxu1 }
 0x10a   : > { %v939_v1 = vsel %vm875_vm7, %v843_v51, %v907_v59  ;;  %955 = vst [vmem:[%s1411_s18 + $0x48] sm:$0xff] %v923_v0  ;;  %v928_v6 = vsel %vm864_vm8, %v832_v56, %v896_v62  ;;  %v833_v8 = vadd.f32 %v1209_v4, %v1403_v24  ;;  %v849_v9 = vadd.f32 %v1225_v5, %v1403_v24 }
 0x10b   : > { %971 = vst [vmem:[%s1411_s18 + $0xc8] sm:$0xff] %v939_v1  ;;  %v944_v7 = vsel %vm880_vm9, %v848_v57, %v912_v63  ;;  %960 = vst [vmem:[%s1411_s18 + $0x70] sm:$0xff] %v928_v6  ;;  %vm862_vm10 = vcmp.ge.f32.partialorder %v830_v2, 0.0  ;;  %v894_v10 = vmul.f32 0.2, %v830_v2  ;;  %vm878_vm11 = vcmp.ge.f32.partialorder %v846_v3, 0.0  ;;  %v636_v12 = vpop.f32.mrf.mxu0  ;;  %v700_v13 = vpop.f32.mrf.mxu1 }
 0x10c   : > { %976 = vst [vmem:[%s1411_s18 + $0xf0] sm:$0xff] %v944_v7  ;;  %v910_v11 = vmul.f32 0.2, %v846_v3  ;;  %vm865_vm12 = vcmp.ge.f32.partialorder %v833_v8, 0.0  ;;  %v897_v14 = vmul.f32 0.2, %v833_v8  ;;  %v831_v18 = vadd.f32 %v1403_v24, %v636_v12 }
 0x10d   : > { %vm881_vm13 = vcmp.ge.f32.partialorder %v849_v9, 0.0  ;;  %v913_v15 = vmul.f32 0.2, %v849_v9  ;;  %v926_v16 = vsel %vm862_vm10, %v830_v2, %v894_v10  ;;  %v847_v19 = vadd.f32 %v1403_v24, %v700_v13 }
 0x10e   : > { %v942_v17 = vsel %vm878_vm11, %v846_v3, %v910_v11  ;;  %958 = vst [vmem:[%s1411_s18 + $0x60] sm:$0xff] %v926_v16  ;;  %v929_v20 = vsel %vm865_vm12, %v833_v8, %v897_v14  ;;  %vm863_vm14 = vcmp.ge.f32.partialorder %v831_v18, 0.0  ;;  %v895_v22 = vmul.f32 0.2, %v831_v18 }
 0x10f   : > { %974 = vst [vmem:[%s1411_s18 + $0xe0] sm:$0xff] %v942_v17  ;;  %v945_v21 = vsel %vm881_vm13, %v849_v9, %v913_v15  ;;  %961 = vst [vmem:[%s1411_s18 + $0x78] sm:$0xff] %v929_v20  ;;  %vm879_vm15 = vcmp.ge.f32.partialorder %v847_v19, 0.0  ;;  %v911_v23 = vmul.f32 0.2, %v847_v19 }
 0x110   : > { %977 = vst [vmem:[%s1411_s18 + $0xf8] sm:$0xff] %v945_v21  ;;  %v927_v25 = vsel %vm863_vm14, %v831_v18, %v895_v22 }
 0x111   : > { %v943_v26 = vsel %vm879_vm15, %v847_v19, %v911_v23  ;;  %959 = vst [vmem:[%s1411_s18 + $0x68] sm:$0xff] %v927_v25 }
 0x112   : > { %975 = vst [vmem:[%s1411_s18 + $0xe8] sm:$0xff] %v943_v26 }
 0x113 PF: > { %s13_s14 = sadd.s32 1, %s1312_s14   ;;  %s1488_s12 = smov %s1308_s13 }
 0x114   : > { %p10_p5 = scmp.ge.s32.totalorder %s13_s14, 4   ;;  %s1489_s13 = smov %s1491_s15 }
 0x116   :  { %12 = sbr.rel (!%p10_p5) target bundleno = 2 (0x2), region = 76 }

// kernel: discriminator_forward.12
= control target key start
LH: loop header
LB: loop body
LE: loop exit
PB: predicated region body
PF: predicated region fallthrough
CT: control target
= control target key end

     0   :  { %s1481_s12 = smov 0   ;;  %s1483_s13 = smov 0   ;;  %s1674_s0 = inlined_call_operand.vmem [shape: bf16[2,256,256], index: 0, kind: input, shape index: {}]   ;;  %s1675_s1 = inlined_call_operand.vmem [shape: bf16[256,128], index: 1, kind: input, shape index: {}]   ;;  %s1676_s2 = inlined_call_operand.vmem [shape: f32[1,128], index: 2, kind: input, shape index: {}]   ;;  %s1677_s3 = inlined_call_operand.vmem [shape: f32[2,256,128], index: 3, kind: output, shape index: {}]  }
   0x1   :  { %s1485_s14 = smov 0  }
   0x2 LB: > { %s39_s15 = sadd.s32 1, %s1455_s13  ;;  %p1163_p0 = scmp.ge.s32.totalorder %s1459_s14, 1  ;;  %s1459_s14 = sphi %s1485_s14, %s13_s14   ;;  %s1455_s13 = sphi %s1483_s13, %s1679_s13   ;;  %s1451_s12 = sphi %s1481_s12, %s1678_s12  }
   0x3   : > { %p41_p1 = scmp.ge.s32.totalorder %s39_s15, 2  ;;  %p206_p2 = scmp.lt.s32.totalorder %s1459_s14, 3 }
   0x5   : > { %s1681_s15 = smov (%p41_p1, %s39_s15), 0  ;;  %p207_p3 = pnand %p1163_p0, %p206_p2 }
   0x6   : > { %p259_p4 = scmp.lt.s32.totalorder (!%p207_p3), %s1451_s12, 1 }
   0x7   : > { %210 = sbr.rel (%p207_p3) target bundleno = 305 (0x131), region = 32 }
   0xc   : > { %v1373_v0 = vld [vmem:[%s1675_s1 + $0x78] sm:$0xff]   ;;  %v1375_v2 = vld [vmem:[%s1675_s1 + $0x70] sm:$0xff]   ;;  %v1377_v4 = vld [vmem:[%s1675_s1 + $0x68] sm:$0xff]   ;;  %s1683_s12 = smov (!%p259_p4, %s1451_s12), 1 }
   0xd   : > { %v1374_v1 = vld [vmem:[%s1675_s1 + $0x38] sm:$0xff]   ;;  %1221 = vmatprep.subr.bf16.mxu0 %v1373_v0  ;;  %1333 = vmatprep.subr.bf16.mxu1 %v1373_v0  ;;  %v1376_v3 = vld [vmem:[%s1675_s1 + $0x30] sm:$0xff]   ;;  %v1378_v5 = vld [vmem:[%s1675_s1 + $0x28] sm:$0xff]   ;;  %s1219_s5 = sshll.u32 %s1683_s12, 8 }
   0xe   : > { %1222 = vmatpush3.bf16.msra.mxu0 %v1374_v1  ;;  %1341 = vmatpush3.bf16.msra.mxu1 %v1374_v1  ;;  %v1379_v6 = vld [vmem:[%s1675_s1 + $0x60] sm:$0xff]   ;;  %v1381_v8 = vld [vmem:[%s1675_s1 + $0x58] sm:$0xff]   ;;  %s1534_s10 = scalar_lea.vmem %s1674_s0, %s1219_s5  ;;  %v1383_v10 = vld [vmem:[%s1675_s1 + $0x50] sm:$0xff]   ;;  %s1599_s7 = scalar_lea.vmem %s1677_s3, %s1219_s5 }
   0xf   : > { %1223 = vmatprep.subr.bf16.mxu0 %v1375_v2  ;;  %1334 = vmatprep.subr.bf16.mxu1 %v1375_v2  ;;  %v1380_v7 = vld [vmem:[%s1675_s1 + $0x20] sm:$0xff]   ;;  %v1382_v9 = vld [vmem:[%s1675_s1 + $0x18] sm:$0xff]   ;;  %v1384_v13 = vld [vmem:[%s1675_s1 + $0x10] sm:$0xff]  }
  0x10   : > { %v1391_v11 = vld [vmem:[%s1534_s10 + $0x4] ss:$8 sps:$4 sm:$0xff]   ;;  %v1389_v18 = vld [vmem:[%s1534_s10] ss:$8 sps:$4 sm:$0xff]   ;;  %v1395_v20 = vld [vmem:[%s1534_s10 + $0x14] ss:$8 sps:$4 sm:$0xff]  }
  0x11   : > { %v1394_v12 = vld [vmem:[%s1534_s10 + $0x84] ss:$8 sps:$4 sm:$0xff]   ;;  %719 = vmatprep.mubr.bf16.mxu0 %v1391_v11  ;;  %v1392_v19 = vld [vmem:[%s1534_s10 + $0x80] ss:$8 sps:$4 sm:$0xff]   ;;  %v1397_v21 = vld [vmem:[%s1534_s10 + $0x94] ss:$8 sps:$4 sm:$0xff]  }
  0x12   : > { %1224 = vmatpush3.bf16.msra.mxu0 %v1376_v3  ;;  %1342 = vmatpush3.bf16.msra.mxu1 %v1376_v3  ;;  %v1385_v14 = vld [vmem:[%s1675_s1 + $0x48] sm:$0xff]   ;;  %v1387_v16 = vld [vmem:[%s1675_s1 + $0x40] sm:$0xff]   ;;  %v1399_v22 = vld [vmem:[%s1534_s10 + $0x10] ss:$8 sps:$4 sm:$0xff]  }
  0x13   : > { %1225 = vmatprep.subr.bf16.mxu0 %v1377_v4  ;;  %1335 = vmatprep.subr.bf16.mxu1 %v1377_v4  ;;  %v1386_v15 = vld [vmem:[%s1675_s1 + $0x8] sm:$0xff]   ;;  %v1388_v17 = vld [vmem:[%s1675_s1] sm:$0xff]   ;;  %v1400_v23 = vld [vmem:[%s1534_s10 + $0x90] ss:$8 sps:$4 sm:$0xff]  }
  0x14   : > { %783 = vmatprep.mubr.bf16.mxu1 %v1394_v12  ;;  %v1401_v24 = vld [vmem:[%s1534_s10 + $0x24] ss:$8 sps:$4 sm:$0xff]   ;;  %v1405_v26 = vld [vmem:[%s1534_s10 + $0x20] ss:$8 sps:$4 sm:$0xff]   ;;  %v1407_v28 = vld [vmem:[%s1534_s10 + $0x34] ss:$8 sps:$4 sm:$0xff]  }
  0x15   : > { %v1403_v25 = vld [vmem:[%s1534_s10 + $0xa4] ss:$8 sps:$4 sm:$0xff]   ;;  %v1406_v27 = vld [vmem:[%s1534_s10 + $0xa0] ss:$8 sps:$4 sm:$0xff]   ;;  %v1409_v29 = vld [vmem:[%s1534_s10 + $0xb4] ss:$8 sps:$4 sm:$0xff]  }
  0x16   : > { %1226 = vmatpush3.bf16.msra.mxu0 %v1378_v5  ;;  %1343 = vmatpush3.bf16.msra.mxu1 %v1378_v5  ;;  %v1411_v30 = vld [vmem:[%s1534_s10 + $0x30] ss:$8 sps:$4 sm:$0xff]   ;;  %v1413_v32 = vld [vmem:[%s1534_s10 + $0x44] ss:$8 sps:$4 sm:$0xff]   ;;  %v1417_v34 = vld [vmem:[%s1534_s10 + $0x40] ss:$8 sps:$4 sm:$0xff]  }
  0x17   : > { %1227 = vmatprep.subr.bf16.mxu0 %v1379_v6  ;;  %1336 = vmatprep.subr.bf16.mxu1 %v1379_v6  ;;  %v1412_v31 = vld [vmem:[%s1534_s10 + $0xb0] ss:$8 sps:$4 sm:$0xff]   ;;  %v1415_v33 = vld [vmem:[%s1534_s10 + $0xc4] ss:$8 sps:$4 sm:$0xff]   ;;  %v1418_v35 = vld [vmem:[%s1534_s10 + $0xc0] ss:$8 sps:$4 sm:$0xff]  }
  0x18   : > { %v1419_v36 = vld [vmem:[%s1534_s10 + $0x54] ss:$8 sps:$4 sm:$0xff]   ;;  %v1423_v38 = vld [vmem:[%s1534_s10 + $0x50] ss:$8 sps:$4 sm:$0xff]   ;;  %v1425_v40 = vld [vmem:[%s1534_s10 + $0x64] ss:$8 sps:$4 sm:$0xff]  }
  0x19   : > { %v1421_v37 = vld [vmem:[%s1534_s10 + $0xd4] ss:$8 sps:$4 sm:$0xff]   ;;  %v1424_v39 = vld [vmem:[%s1534_s10 + $0xd0] ss:$8 sps:$4 sm:$0xff]   ;;  %v1427_v41 = vld [vmem:[%s1534_s10 + $0xe4] ss:$8 sps:$4 sm:$0xff]  }
  0x1a   : > { %1228 = vmatpush3.bf16.msra.mxu0 %v1380_v7  ;;  %1344 = vmatpush3.bf16.msra.mxu1 %v1380_v7  ;;  %v1429_v42 = vld [vmem:[%s1534_s10 + $0x60] ss:$8 sps:$4 sm:$0xff]   ;;  %v1431_v44 = vld [vmem:[%s1534_s10 + $0x74] ss:$8 sps:$4 sm:$0xff]   ;;  %v1435_v46 = vld [vmem:[%s1534_s10 + $0x70] ss:$8 sps:$4 sm:$0xff]  }
  0x1b   : > { %1229 = vmatprep.subr.bf16.mxu0 %v1381_v8  ;;  %1337 = vmatprep.subr.bf16.mxu1 %v1381_v8  ;;  %v1430_v43 = vld [vmem:[%s1534_s10 + $0xe0] ss:$8 sps:$4 sm:$0xff]   ;;  %v1433_v45 = vld [vmem:[%s1534_s10 + $0xf4] ss:$8 sps:$4 sm:$0xff]   ;;  %v1436_v47 = vld [vmem:[%s1534_s10 + $0xf0] ss:$8 sps:$4 sm:$0xff]  }
  0x1c   : > { %v1592_v51 = vld [vmem:[%s1676_s2] ss:$0 sm:$0xff] }
  0x1e   : > { %1230 = vmatpush3.bf16.msra.mxu0 %v1382_v9  ;;  %1345 = vmatpush3.bf16.msra.mxu1 %v1382_v9 }
  0x1f   : > { %1231 = vmatprep.subr.bf16.mxu0 %v1383_v10  ;;  %1338 = vmatprep.subr.bf16.mxu1 %v1383_v10 }
  0x22   : > { %1232 = vmatpush3.bf16.msra.mxu0 %v1384_v13  ;;  %1346 = vmatpush3.bf16.msra.mxu1 %v1384_v13 }
  0x23   : > { %1233 = vmatprep.subr.bf16.mxu0 %v1385_v14  ;;  %1339 = vmatprep.subr.bf16.mxu1 %v1385_v14 }
  0x26   : > { %1234 = vmatpush3.bf16.msra.mxu0 %v1386_v15  ;;  %1347 = vmatpush3.bf16.msra.mxu1 %v1386_v15 }
  0x27   : > { %1235 = vmatprep.subr.bf16.mxu0 %v1387_v16  ;;  %1340 = vmatprep.subr.bf16.mxu1 %v1387_v16 }
  0x2a   : > { %1236 = vmatpush3.bf16.msra.mxu0 %v1388_v17  ;;  %1348 = vmatpush3.bf16.msra.mxu1 %v1388_v17 }
  0x2d   : > { %720 = vmatmul.mubr.bf16.vlgmr.msra.gmra.mxu0 %v1389_v18  ;;  %784 = vmatmul.mubr.bf16.vlgmr.msra.gmra.mxu1 %v1392_v19 }
  0x2e   : > { %727 = vmatprep.mubr.bf16.mxu0 %v1395_v20  ;;  %791 = vmatprep.mubr.bf16.mxu1 %v1397_v21 }
  0x35   : > { %728 = vmatmul.mubr.bf16.gmra.mxu0 %v1399_v22  ;;  %792 = vmatmul.mubr.bf16.gmra.mxu1 %v1400_v23 }
  0x36   : > { %735 = vmatprep.mubr.bf16.mxu0 %v1401_v24  ;;  %799 = vmatprep.mubr.bf16.mxu1 %v1403_v25 }
  0x3d   : > { %736 = vmatmul.mubr.bf16.gmra.mxu0 %v1405_v26  ;;  %800 = vmatmul.mubr.bf16.gmra.mxu1 %v1406_v27 }
  0x3e   : > { %743 = vmatprep.mubr.bf16.mxu0 %v1407_v28  ;;  %807 = vmatprep.mubr.bf16.mxu1 %v1409_v29 }
  0x45   : > { %744 = vmatmul.mubr.bf16.gmra.mxu0 %v1411_v30  ;;  %808 = vmatmul.mubr.bf16.gmra.mxu1 %v1412_v31 }
  0x46   : > { %751 = vmatprep.mubr.bf16.mxu0 %v1413_v32  ;;  %815 = vmatprep.mubr.bf16.mxu1 %v1415_v33 }
  0x4d   : > { %752 = vmatmul.mubr.bf16.gmra.mxu0 %v1417_v34  ;;  %816 = vmatmul.mubr.bf16.gmra.mxu1 %v1418_v35 }
  0x4e   : > { %759 = vmatprep.mubr.bf16.mxu0 %v1419_v36  ;;  %823 = vmatprep.mubr.bf16.mxu1 %v1421_v37 }
  0x55   : > { %760 = vmatmul.mubr.bf16.gmra.mxu0 %v1423_v38  ;;  %824 = vmatmul.mubr.bf16.gmra.mxu1 %v1424_v39 }
  0x56   : > { %767 = vmatprep.mubr.bf16.mxu0 %v1425_v40  ;;  %831 = vmatprep.mubr.bf16.mxu1 %v1427_v41 }
  0x5d   : > { %768 = vmatmul.mubr.bf16.gmra.mxu0 %v1429_v42  ;;  %832 = vmatmul.mubr.bf16.gmra.mxu1 %v1430_v43 }
  0x5e   : > { %775 = vmatprep.mubr.bf16.mxu0 %v1431_v44  ;;  %839 = vmatprep.mubr.bf16.mxu1 %v1433_v45 }
  0x65   : > { %776 = vmatmul.mubr.bf16.gmra.mxu0 %v1435_v46  ;;  %840 = vmatmul.mubr.bf16.gmra.mxu1 %v1436_v47 }
  0xed   : > { %v1237_v48 = vpop.f32.mrf.mxu0  ;;  %v1285_v49 = vpop.f32.mrf.mxu1 }
  0xef   : > { %v1238_v50 = vpop.f32.mrf.mxu0  ;;  %v1286_v52 = vpop.f32.mrf.mxu1 }
  0xf0   : > { %v1239_v53 = vadd.f32 %v1238_v50, %v1237_v48  ;;  %v1287_v54 = vadd.f32 %v1286_v52, %v1285_v49 }
  0xf1   : > { %v1240_v55 = vpop.f32.mrf.mxu0  ;;  %v1288_v56 = vpop.f32.mrf.mxu1 }
  0xf2   : > { %v954_v57 = vadd.f32 %v1239_v53, %v1592_v51  ;;  %v970_v58 = vadd.f32 %v1287_v54, %v1592_v51 }
  0xf3   : > { %v1241_v59 = vpop.f32.mrf.mxu0  ;;  %v1289_v60 = vpop.f32.mrf.mxu1 }
  0xf4   : > { %986 = vst [vmem:[%s1599_s7] sm:$0xff] %v954_v57  ;;  %1002 = vst [vmem:[%s1599_s7 + $0x80] sm:$0xff] %v970_v58  ;;  %v1242_v61 = vadd.f32 %v1241_v59, %v1240_v55  ;;  %v1290_v62 = vadd.f32 %v1289_v60, %v1288_v56 }
  0xf5   : > { %v1243_v63 = vpop.f32.mrf.mxu0  ;;  %v1291_v0 = vpop.f32.mrf.mxu1 }
  0xf6   : > { %v955_v1 = vadd.f32 %v1242_v61, %v1592_v51  ;;  %v971_v2 = vadd.f32 %v1290_v62, %v1592_v51 }
  0xf7   : > { %v1244_v3 = vpop.f32.mrf.mxu0  ;;  %v1292_v4 = vpop.f32.mrf.mxu1 }
  0xf8   : > { %987 = vst [vmem:[%s1599_s7 + $0x8] sm:$0xff] %v955_v1  ;;  %1003 = vst [vmem:[%s1599_s7 + $0x88] sm:$0xff] %v971_v2  ;;  %v1245_v5 = vadd.f32 %v1244_v3, %v1243_v63  ;;  %v1293_v6 = vadd.f32 %v1292_v4, %v1291_v0 }
  0xf9   : > { %v1246_v7 = vpop.f32.mrf.mxu0  ;;  %v1294_v8 = vpop.f32.mrf.mxu1 }
  0xfa   : > { %v956_v9 = vadd.f32 %v1245_v5, %v1592_v51  ;;  %v972_v10 = vadd.f32 %v1293_v6, %v1592_v51 }
  0xfb   : > { %v1247_v11 = vpop.f32.mrf.mxu0  ;;  %v1295_v12 = vpop.f32.mrf.mxu1 }
  0xfc   : > { %988 = vst [vmem:[%s1599_s7 + $0x10] sm:$0xff] %v956_v9  ;;  %1004 = vst [vmem:[%s1599_s7 + $0x90] sm:$0xff] %v972_v10  ;;  %v1248_v13 = vadd.f32 %v1247_v11, %v1246_v7  ;;  %v1296_v14 = vadd.f32 %v1295_v12, %v1294_v8 }
  0xfd   : > { %v1249_v15 = vpop.f32.mrf.mxu0  ;;  %v1297_v16 = vpop.f32.mrf.mxu1 }
  0xfe   : > { %v957_v17 = vadd.f32 %v1248_v13, %v1592_v51  ;;  %v973_v18 = vadd.f32 %v1296_v14, %v1592_v51 }
  0xff   : > { %v1250_v19 = vpop.f32.mrf.mxu0  ;;  %v1298_v20 = vpop.f32.mrf.mxu1 }
 0x100   : > { %989 = vst [vmem:[%s1599_s7 + $0x18] sm:$0xff] %v957_v17  ;;  %1005 = vst [vmem:[%s1599_s7 + $0x98] sm:$0xff] %v973_v18  ;;  %v1251_v21 = vadd.f32 %v1250_v19, %v1249_v15  ;;  %v1299_v22 = vadd.f32 %v1298_v20, %v1297_v16 }
 0x101   : > { %v1252_v23 = vpop.f32.mrf.mxu0  ;;  %v1300_v24 = vpop.f32.mrf.mxu1 }
 0x102   : > { %v958_v25 = vadd.f32 %v1251_v21, %v1592_v51  ;;  %v974_v26 = vadd.f32 %v1299_v22, %v1592_v51 }
 0x103   : > { %v1253_v27 = vpop.f32.mrf.mxu0  ;;  %v1301_v28 = vpop.f32.mrf.mxu1 }
 0x104   : > { %990 = vst [vmem:[%s1599_s7 + $0x20] sm:$0xff] %v958_v25  ;;  %1006 = vst [vmem:[%s1599_s7 + $0xa0] sm:$0xff] %v974_v26  ;;  %v1254_v29 = vadd.f32 %v1253_v27, %v1252_v23  ;;  %v1302_v30 = vadd.f32 %v1301_v28, %v1300_v24 }
 0x105   : > { %v1255_v31 = vpop.f32.mrf.mxu0  ;;  %v1303_v32 = vpop.f32.mrf.mxu1 }
 0x106   : > { %v959_v33 = vadd.f32 %v1254_v29, %v1592_v51  ;;  %v975_v34 = vadd.f32 %v1302_v30, %v1592_v51 }
 0x107   : > { %v1256_v35 = vpop.f32.mrf.mxu0  ;;  %v1304_v36 = vpop.f32.mrf.mxu1 }
 0x108   : > { %991 = vst [vmem:[%s1599_s7 + $0x28] sm:$0xff] %v959_v33  ;;  %1007 = vst [vmem:[%s1599_s7 + $0xa8] sm:$0xff] %v975_v34  ;;  %v1257_v37 = vadd.f32 %v1256_v35, %v1255_v31  ;;  %v1305_v38 = vadd.f32 %v1304_v36, %v1303_v32 }
 0x109   : > { %v1258_v39 = vpop.f32.mrf.mxu0  ;;  %v1306_v40 = vpop.f32.mrf.mxu1 }
 0x10a   : > { %v960_v41 = vadd.f32 %v1257_v37, %v1592_v51  ;;  %v976_v42 = vadd.f32 %v1305_v38, %v1592_v51 }
 0x10b   : > { %v1259_v43 = vpop.f32.mrf.mxu0  ;;  %v1307_v44 = vpop.f32.mrf.mxu1 }
 0x10c   : > { %992 = vst [vmem:[%s1599_s7 + $0x30] sm:$0xff] %v960_v41  ;;  %1008 = vst [vmem:[%s1599_s7 + $0xb0] sm:$0xff] %v976_v42  ;;  %v1260_v45 = vadd.f32 %v1259_v43, %v1258_v39  ;;  %v1308_v46 = vadd.f32 %v1307_v44, %v1306_v40 }
 0x10d   : > { %v1261_v47 = vpop.f32.mrf.mxu0  ;;  %v1309_v48 = vpop.f32.mrf.mxu1 }
 0x10e   : > { %v961_v49 = vadd.f32 %v1260_v45, %v1592_v51  ;;  %v977_v50 = vadd.f32 %v1308_v46, %v1592_v51 }
 0x10f   : > { %v1262_v52 = vpop.f32.mrf.mxu0  ;;  %v1310_v53 = vpop.f32.mrf.mxu1 }
 0x110   : > { %993 = vst [vmem:[%s1599_s7 + $0x38] sm:$0xff] %v961_v49  ;;  %1009 = vst [vmem:[%s1599_s7 + $0xb8] sm:$0xff] %v977_v50  ;;  %v1263_v54 = vadd.f32 %v1262_v52, %v1261_v47  ;;  %v1311_v55 = vadd.f32 %v1310_v53, %v1309_v48 }
 0x111   : > { %v1264_v56 = vpop.f32.mrf.mxu0  ;;  %v1312_v57 = vpop.f32.mrf.mxu1 }
 0x112   : > { %v962_v58 = vadd.f32 %v1263_v54, %v1592_v51  ;;  %v978_v59 = vadd.f32 %v1311_v55, %v1592_v51 }
 0x113   : > { %v1265_v60 = vpop.f32.mrf.mxu0  ;;  %v1313_v61 = vpop.f32.mrf.mxu1 }
 0x114   : > { %994 = vst [vmem:[%s1599_s7 + $0x40] sm:$0xff] %v962_v58  ;;  %1010 = vst [vmem:[%s1599_s7 + $0xc0] sm:$0xff] %v978_v59  ;;  %v1266_v62 = vadd.f32 %v1265_v60, %v1264_v56  ;;  %v1314_v63 = vadd.f32 %v1313_v61, %v1312_v57 }
 0x115   : > { %v1267_v0 = vpop.f32.mrf.mxu0  ;;  %v1315_v1 = vpop.f32.mrf.mxu1 }
 0x116   : > { %v963_v2 = vadd.f32 %v1266_v62, %v1592_v51  ;;  %v979_v3 = vadd.f32 %v1314_v63, %v1592_v51 }
 0x117   : > { %v1268_v4 = vpop.f32.mrf.mxu0  ;;  %v1316_v5 = vpop.f32.mrf.mxu1 }
 0x118   : > { %995 = vst [vmem:[%s1599_s7 + $0x48] sm:$0xff] %v963_v2  ;;  %1011 = vst [vmem:[%s1599_s7 + $0xc8] sm:$0xff] %v979_v3  ;;  %v1269_v6 = vadd.f32 %v1268_v4, %v1267_v0  ;;  %v1317_v7 = vadd.f32 %v1316_v5, %v1315_v1 }
 0x119   : > { %v1270_v8 = vpop.f32.mrf.mxu0  ;;  %v1318_v9 = vpop.f32.mrf.mxu1 }
 0x11a   : > { %v964_v10 = vadd.f32 %v1269_v6, %v1592_v51  ;;  %v980_v11 = vadd.f32 %v1317_v7, %v1592_v51 }
 0x11b   : > { %v1271_v12 = vpop.f32.mrf.mxu0  ;;  %v1319_v13 = vpop.f32.mrf.mxu1 }
 0x11c   : > { %996 = vst [vmem:[%s1599_s7 + $0x50] sm:$0xff] %v964_v10  ;;  %1012 = vst [vmem:[%s1599_s7 + $0xd0] sm:$0xff] %v980_v11  ;;  %v1272_v14 = vadd.f32 %v1271_v12, %v1270_v8  ;;  %v1320_v15 = vadd.f32 %v1319_v13, %v1318_v9 }
 0x11d   : > { %v1273_v16 = vpop.f32.mrf.mxu0  ;;  %v1321_v17 = vpop.f32.mrf.mxu1 }
 0x11e   : > { %v965_v18 = vadd.f32 %v1272_v14, %v1592_v51  ;;  %v981_v19 = vadd.f32 %v1320_v15, %v1592_v51 }
 0x11f   : > { %v1274_v20 = vpop.f32.mrf.mxu0  ;;  %v1322_v21 = vpop.f32.mrf.mxu1 }
 0x120   : > { %997 = vst [vmem:[%s1599_s7 + $0x58] sm:$0xff] %v965_v18  ;;  %1013 = vst [vmem:[%s1599_s7 + $0xd8] sm:$0xff] %v981_v19  ;;  %v1275_v22 = vadd.f32 %v1274_v20, %v1273_v16  ;;  %v1323_v23 = vadd.f32 %v1322_v21, %v1321_v17 }
 0x121   : > { %v1276_v24 = vpop.f32.mrf.mxu0  ;;  %v1324_v25 = vpop.f32.mrf.mxu1 }
 0x122   : > { %v966_v26 = vadd.f32 %v1275_v22, %v1592_v51  ;;  %v982_v27 = vadd.f32 %v1323_v23, %v1592_v51 }
 0x123   : > { %v1277_v28 = vpop.f32.mrf.mxu0  ;;  %v1325_v29 = vpop.f32.mrf.mxu1 }
 0x124   : > { %998 = vst [vmem:[%s1599_s7 + $0x60] sm:$0xff] %v966_v26  ;;  %1014 = vst [vmem:[%s1599_s7 + $0xe0] sm:$0xff] %v982_v27  ;;  %v1278_v30 = vadd.f32 %v1277_v28, %v1276_v24  ;;  %v1326_v31 = vadd.f32 %v1325_v29, %v1324_v25 }
 0x125   : > { %v1279_v32 = vpop.f32.mrf.mxu0  ;;  %v1327_v33 = vpop.f32.mrf.mxu1 }
 0x126   : > { %v967_v34 = vadd.f32 %v1278_v30, %v1592_v51  ;;  %v983_v35 = vadd.f32 %v1326_v31, %v1592_v51 }
 0x127   : > { %v1280_v36 = vpop.f32.mrf.mxu0  ;;  %v1328_v37 = vpop.f32.mrf.mxu1 }
 0x128   : > { %999 = vst [vmem:[%s1599_s7 + $0x68] sm:$0xff] %v967_v34  ;;  %1015 = vst [vmem:[%s1599_s7 + $0xe8] sm:$0xff] %v983_v35  ;;  %v1281_v38 = vadd.f32 %v1280_v36, %v1279_v32  ;;  %v1329_v39 = vadd.f32 %v1328_v37, %v1327_v33 }
 0x129   : > { %v1282_v40 = vpop.f32.mrf.mxu0  ;;  %v1330_v41 = vpop.f32.mrf.mxu1 }
 0x12a   : > { %v968_v42 = vadd.f32 %v1281_v38, %v1592_v51  ;;  %v984_v43 = vadd.f32 %v1329_v39, %v1592_v51 }
 0x12b   : > { %v1283_v44 = vpop.f32.mrf.mxu0  ;;  %v1331_v45 = vpop.f32.mrf.mxu1 }
 0x12c   : > { %1000 = vst [vmem:[%s1599_s7 + $0x70] sm:$0xff] %v968_v42  ;;  %1016 = vst [vmem:[%s1599_s7 + $0xf0] sm:$0xff] %v984_v43  ;;  %v1284_v46 = vadd.f32 %v1283_v44, %v1282_v40  ;;  %v1332_v47 = vadd.f32 %v1331_v45, %v1330_v41 }
 0x12e   : > { %v969_v48 = vadd.f32 %v1284_v46, %v1592_v51  ;;  %v985_v49 = vadd.f32 %v1332_v47, %v1592_v51 }
 0x130   : > { %1001 = vst [vmem:[%s1599_s7 + $0x78] sm:$0xff] %v969_v48  ;;  %1017 = vst [vmem:[%s1599_s7 + $0xf8] sm:$0xff] %v985_v49 }
 0x131 PF: > { %s13_s14 = sadd.s32 1, %s1459_s14   ;;  %s1678_s12 = smov %s1455_s13 }
 0x132   : > { %p10_p5 = scmp.ge.s32.totalorder %s13_s14, 4   ;;  %s1679_s13 = smov %s1681_s15 }
 0x134   :  { %12 = sbr.rel (!%p10_p5) target bundleno = 2 (0x2), region = 76 }

// kernel: discriminator_forward.13
= control target key start
LH: loop header
LB: loop body
LE: loop exit
PB: predicated region body
PF: predicated region fallthrough
CT: control target
= control target key end

     0   :  { %s584_s6 = smov 0   ;;  %s586_s7 = smov 0   ;;  %s621_s0 = inlined_call_operand.vmem [shape: f32[2,256,128], index: 0, kind: input, shape index: {}]   ;;  %s622_s1 = inlined_call_operand.vmem [shape: f32[2,2,128], index: 1, kind: output, shape index: {}]  }
   0x1   :  { %s588_s8 = smov 0  }
   0x2 LB: > { %s23_s9 = sadd.s32 1, %s567_s7  ;;  %p515_p0 = scmp.ge.s32.totalorder %s571_s8, 1  ;;  %s571_s8 = sphi %s588_s8, %s11_s8   ;;  %s567_s7 = sphi %s586_s7, %s624_s7   ;;  %s563_s6 = sphi %s584_s6, %s623_s6  }
   0x3   : > { %p25_p1 = scmp.ge.s32.totalorder %s23_s9, 2  ;;  %p106_p2 = scmp.lt.s32.totalorder %s571_s8, 3 }
   0x5   : > { %s626_s9 = smov (%p25_p1, %s23_s9), 0  ;;  %p107_p3 = pnand %p515_p0, %p106_p2 }
   0x6   : > { %p130_p4 = scmp.lt.s32.totalorder (!%p107_p3), %s563_s6, 1 }
   0x7   : > { %110 = sbr.rel (%p107_p3) target bundleno = 78 (0x4e), region = 24 }
   0xc   : > { %v573_v0 = vmov 0.0   ;;  %s628_s6 = smov (!%p130_p4, %s563_s6), 1  ;;  %v436_v54 = vlaneseq  ;;  %vm441_vm0 = vcmask 1040384  }
   0xd   : > { %147 = vst [vmem:[#allocation2] sm:$0x1] %v573_v0  ;;  %148 = vst [vmem:[#allocation3] sm:$0x1] %v573_v0  ;;  %s521_s10 = sshll.u32 %s628_s6, 8  ;;  %s518_s14 = sshll.u32 %s628_s6, 1 }
   0xe   : > { %s137_s13 = scalar_lea.vmem %s621_s0, %s521_s10  ;;  %v437_v55 = vshrl.u32 %v436_v54, 7  ;;  %s142_s17 = scalar_lea.vmem %s622_s1, %s518_s14 }
   0xf   : > { %v149_v1 = vld [vmem:[%s137_s13] sm:$0xff]  ;;  %v150_v2 = vld [vmem:[%s137_s13 + $0x8] sm:$0xff]  ;;  %v151_v3 = vld [vmem:[%s137_s13 + $0x10] sm:$0xff] }
  0x10   : > { %v152_v4 = vld [vmem:[%s137_s13 + $0x18] sm:$0xff]  ;;  %v313_v5 = vadd.f32 %v150_v2, %v149_v1  ;;  %v353_v6 = vmul.f32 %v149_v1, %v149_v1  ;;  %v354_v7 = vmul.f32 %v150_v2, %v150_v2  ;;  %v355_v8 = vmul.f32 %v151_v3, %v151_v3  ;;  %v153_v9 = vld [vmem:[%s137_s13 + $0x20] sm:$0xff]  ;;  %v154_v13 = vld [vmem:[%s137_s13 + $0x28] sm:$0xff] }
  0x11   : > { %v356_v11 = vmul.f32 %v152_v4, %v152_v4  ;;  %v357_v15 = vmul.f32 %v153_v9, %v153_v9  ;;  %v155_v17 = vld [vmem:[%s137_s13 + $0x30] sm:$0xff]  ;;  %v358_v19 = vmul.f32 %v154_v13, %v154_v13  ;;  %v156_v21 = vld [vmem:[%s137_s13 + $0x38] sm:$0xff]  ;;  %v438_v56 = vsub.s32 0, %v437_v55 }
  0x12   : > { %v314_v10 = vadd.f32 %v313_v5, %v151_v3  ;;  %v385_v12 = vadd.f32 %v354_v7, %v353_v6  ;;  %v359_v23 = vmul.f32 %v155_v17, %v155_v17  ;;  %v360_v26 = vmul.f32 %v156_v21, %v156_v21 }
  0x14   : > { %v315_v14 = vadd.f32 %v314_v10, %v152_v4  ;;  %v386_v16 = vadd.f32 %v385_v12, %v355_v8  ;;  %v312_v40 = vld [vmem:[#allocation2] sm:$0x1]  ;;  %v352_v43 = vld [vmem:[#allocation3] sm:$0x1] }
  0x16   : > { %v316_v18 = vadd.f32 %v315_v14, %v153_v9  ;;  %v387_v20 = vadd.f32 %v386_v16, %v356_v11 }
  0x18   : > { %v317_v22 = vadd.f32 %v316_v18, %v154_v13  ;;  %v388_v24 = vadd.f32 %v387_v20, %v357_v15 }
  0x1a   : > { %v318_v25 = vadd.f32 %v317_v22, %v155_v17  ;;  %v389_v27 = vadd.f32 %v388_v24, %v358_v19 }
  0x1c   : > { %v319_v28 = vadd.f32 %v318_v25, %v156_v21  ;;  %v390_v29 = vadd.f32 %v389_v27, %v359_v23 }
  0x1e   : > { %v344_v30 = vrot.slane %v319_v28, 4  ;;  %v391_v31 = vadd.f32 %v390_v29, %v360_v26 }
  0x20   : > { %v345_v32 = vadd.f32 %v344_v30, %v319_v28  ;;  %v416_v33 = vrot.slane %v391_v31, 4 }
  0x22   : > { %v346_v34 = vrot.slane %v345_v32, 2  ;;  %v417_v35 = vadd.f32 %v416_v33, %v391_v31 }
  0x24   : > { %v347_v36 = vadd.f32 %v346_v34, %v345_v32  ;;  %v418_v37 = vrot.slane %v417_v35, 2 }
  0x26   : > { %v348_v38 = vrot.slane %v347_v36, 1  ;;  %v419_v39 = vadd.f32 %v418_v37, %v417_v35 }
  0x28   : > { %v349_v41 = vadd.f32 %v348_v38, %v347_v36  ;;  %v420_v42 = vrot.slane %v419_v39, 1 }
  0x2a   : > { %v350_v44 = vadd.f32 %v349_v41, %v312_v40  ;;  %v421_v45 = vadd.f32 %v420_v42, %v419_v39 }
  0x2c   : > { %351 = vst [vmem:[#allocation2] sm:$0x1] %v350_v44  ;;  %v422_v46 = vadd.f32 %v421_v45, %v352_v43 }
  0x2e   : > { %423 = vst [vmem:[#allocation3] sm:$0x1] %v422_v46 }
  0x33   : > { %v427_v47 = vld [vmem:[#allocation2] sm:$0x1] }
  0x34   : > { %v428_v48 = vmul.f32 0.015625, %v427_v47 }
  0x35   : > { %v429_v49 = vld [vmem:[#allocation3] sm:$0x1] }
  0x36   : > { %v430_v50 = vmul.f32 0.015625, %v429_v49  ;;  %v431_v51 = vmul.f32 %v428_v48, %v428_v48 }
  0x38   : > { %v432_v52 = vsub.f32 %v430_v50, %v431_v51 }
  0x3a   : > { %v433_v53 = vadd.f32 1e-05, %v432_v52 }
  0x3c   : > { %547 = vrsqrt.f32 %v433_v53 }
  0x49   : > { %v548_v57 = vpop.eup %547 }
  0x4a   : > { %v439_v58 = vrot.slane %v548_v57, %v438_v56 }
  0x4c   : > { %v442_v59 = vsel %vm441_vm0, %v428_v48, %v439_v58 }
  0x4d   : > { %443 = vst [vmem:[%s142_s17] sm:$0x3] %v442_v59 }
  0x4e PF: > { %s11_s8 = sadd.s32 1, %s571_s8   ;;  %s623_s6 = smov %s567_s7 }
  0x4f   : > { %p8_p5 = scmp.ge.s32.totalorder %s11_s8, 4   ;;  %s624_s7 = smov %s626_s9 }
  0x51   :  { %10 = sbr.rel (!%p8_p5) target bundleno = 2 (0x2), region = 62 }

// kernel: discriminator_forward.14
= control target key start
LH: loop header
LB: loop body
LE: loop exit
PB: predicated region body
PF: predicated region fallthrough
CT: control target
= control target key end

     0   :  { %s609_s9 = smov 0   ;;  %s611_s10 = smov 0   ;;  %s789_s0 = inlined_call_operand.vmem [shape: f32[2,256,128], index: 0, kind: input, shape index: {}]   ;;  %s790_s1 = inlined_call_operand.vmem [shape: f32[2,2,128], index: 1, kind: input, shape index: {}]   ;;  %s791_s2 = inlined_call_operand.vmem [shape: f32[2,256,128], index: 2, kind: output, shape index: {}]  }
   0x1   :  { %s613_s11 = smov 0  }
   0x2 LB: > { %s24_s12 = sadd.s32 1, %s588_s10  ;;  %p536_p0 = scmp.ge.s32.totalorder %s592_s11, 1  ;;  %s592_s11 = sphi %s613_s11, %s12_s11   ;;  %s588_s10 = sphi %s611_s10, %s793_s10   ;;  %s584_s9 = sphi %s609_s9, %s792_s9  }
   0x3   : > { %p26_p1 = scmp.ge.s32.totalorder %s24_s12, 2  ;;  %p142_p2 = scmp.lt.s32.totalorder %s592_s11, 3 }
   0x5   : > { %s795_s12 = smov (%p26_p1, %s24_s12), 0  ;;  %p143_p3 = pnand %p536_p0, %p142_p2 }
   0x6   : > { %p177_p4 = scmp.lt.s32.totalorder (!%p143_p3), %s584_s9, 1 }
   0x7   : > { %146 = sbr.rel (%p143_p3) target bundleno = 65 (0x41), region = 28 }
   0xc   : > { %v233_v0 = vlaneseq  ;;  %s797_s9 = smov (!%p177_p4, %s584_s9), 1 }
   0xd   : > { %s544_s13 = sshll.u32 %s797_s9, 8  ;;  %s539_s14 = sshll.u32 %s797_s9, 1 }
   0xe   : > { %v234_v1 = vshrl.u32 %v233_v0, 7  ;;  %s636_s17 = scalar_lea.vmem %s789_s0, %s544_s13  ;;  %s189_s20 = scalar_lea.vmem %s790_s1, %s539_s14 }
   0xf   : > { %v200_v4 = vld [vmem:[%s636_s17] sm:$0xff]  ;;  %v201_v6 = vld [vmem:[%s636_s17 + $0x8] sm:$0xff]  ;;  %v202_v9 = vld [vmem:[%s636_s17 + $0x10] sm:$0xff]  ;;  %s674_s23 = scalar_lea.vmem %s791_s2, %s544_s13 }
  0x10   : > { %v235_v2 = vsub.s32 0, %v234_v1  ;;  %v271_v3 = vsub.s32 1, %v234_v1  ;;  %v232_v5 = vld [vmem:[%s189_s20] sm:$0x3]  ;;  %v203_v10 = vld [vmem:[%s636_s17 + $0x18] sm:$0xff]  ;;  %v205_v12 = vld [vmem:[%s636_s17 + $0x28] sm:$0xff] }
  0x11   : > { %v204_v11 = vld [vmem:[%s636_s17 + $0x20] sm:$0xff]  ;;  %v206_v13 = vld [vmem:[%s636_s17 + $0x30] sm:$0xff]  ;;  %v207_v14 = vld [vmem:[%s636_s17 + $0x38] sm:$0xff] }
  0x12   : > { %v643_v7 = vrot.slane %v232_v5, %v235_v2  ;;  %v645_v8 = vrot.slane %v232_v5, %v271_v3  ;;  %v208_v38 = vld [vmem:[%s636_s17 + $0x40] sm:$0xff]  ;;  %v209_v39 = vld [vmem:[%s636_s17 + $0x48] sm:$0xff]  ;;  %v210_v43 = vld [vmem:[%s636_s17 + $0x50] sm:$0xff] }
  0x13   : > { %v211_v44 = vld [vmem:[%s636_s17 + $0x58] sm:$0xff]  ;;  %v212_v45 = vld [vmem:[%s636_s17 + $0x60] sm:$0xff]  ;;  %v213_v48 = vld [vmem:[%s636_s17 + $0x68] sm:$0xff] }
  0x14   : > { %v237_v15 = vsub.f32 %v200_v4, %v643_v7  ;;  %v238_v16 = vsub.f32 %v201_v6, %v643_v7  ;;  %v239_v17 = vsub.f32 %v202_v9, %v643_v7  ;;  %v240_v18 = vsub.f32 %v203_v10, %v643_v7  ;;  %v214_v53 = vld [vmem:[%s636_s17 + $0x70] sm:$0xff]  ;;  %v215_v2 = vld [vmem:[%s636_s17 + $0x78] sm:$0xff]  ;;  %v216_v3 = vld [vmem:[%s636_s17 + $0x80] sm:$0xff] }
  0x15   : > { %v241_v19 = vsub.f32 %v204_v11, %v643_v7  ;;  %v242_v20 = vsub.f32 %v205_v12, %v643_v7  ;;  %v243_v21 = vsub.f32 %v206_v13, %v643_v7  ;;  %v244_v22 = vsub.f32 %v207_v14, %v643_v7  ;;  %v217_v4 = vld [vmem:[%s636_s17 + $0x88] sm:$0xff] }
  0x16   : > { %v273_v23 = vmul.f32 %v645_v8, %v237_v15  ;;  %v274_v24 = vmul.f32 %v645_v8, %v238_v16  ;;  %v275_v25 = vmul.f32 %v645_v8, %v239_v17  ;;  %v276_v26 = vmul.f32 %v645_v8, %v240_v18  ;;  %v218_v18 = vld [vmem:[%s636_s17 + $0x90] sm:$0xff] }
  0x17   : > { %v277_v27 = vmul.f32 %v645_v8, %v241_v19  ;;  %v278_v28 = vmul.f32 %v645_v8, %v242_v20  ;;  %v279_v29 = vmul.f32 %v645_v8, %v243_v21  ;;  %v280_v30 = vmul.f32 %v645_v8, %v244_v22 }
  0x18   : > { %vm305_vm0 = vcmp.ge.f32.partialorder %v273_v23, 0.0  ;;  %v337_v31 = vmul.f32 0.2, %v273_v23  ;;  %vm306_vm1 = vcmp.ge.f32.partialorder %v274_v24, 0.0  ;;  %v338_v32 = vmul.f32 0.2, %v274_v24 }
  0x19   : > { %vm307_vm2 = vcmp.ge.f32.partialorder %v275_v25, 0.0  ;;  %v339_v33 = vmul.f32 0.2, %v275_v25  ;;  %vm308_vm3 = vcmp.ge.f32.partialorder %v276_v26, 0.0  ;;  %v340_v34 = vmul.f32 0.2, %v276_v26 }
  0x1a   : > { %v369_v35 = vsel %vm305_vm0, %v273_v23, %v337_v31  ;;  %v370_v36 = vsel %vm306_vm1, %v274_v24, %v338_v32  ;;  %vm309_vm4 = vcmp.ge.f32.partialorder %v277_v27, 0.0  ;;  %v341_v37 = vmul.f32 0.2, %v277_v27  ;;  %v219_v23 = vld [vmem:[%s636_s17 + $0x98] sm:$0xff]  ;;  %v220_v24 = vld [vmem:[%s636_s17 + $0xa0] sm:$0xff] }
  0x1b   : > { %401 = vst [vmem:[%s674_s23] sm:$0xff] %v369_v35  ;;  %402 = vst [vmem:[%s674_s23 + $0x8] sm:$0xff] %v370_v36  ;;  %v371_v40 = vsel %vm307_vm2, %v275_v25, %v339_v33  ;;  %v372_v41 = vsel %vm308_vm3, %v276_v26, %v340_v34  ;;  %vm310_vm5 = vcmp.ge.f32.partialorder %v278_v28, 0.0  ;;  %v342_v42 = vmul.f32 0.2, %v278_v28  ;;  %v221_v35 = vld [vmem:[%s636_s17 + $0xa8] sm:$0xff] }
  0x1c   : > { %403 = vst [vmem:[%s674_s23 + $0x10] sm:$0xff] %v371_v40  ;;  %404 = vst [vmem:[%s674_s23 + $0x18] sm:$0xff] %v372_v41  ;;  %v373_v46 = vsel %vm309_vm4, %v277_v27, %v341_v37  ;;  %vm311_vm6 = vcmp.ge.f32.partialorder %v279_v29, 0.0  ;;  %v343_v47 = vmul.f32 0.2, %v279_v29  ;;  %vm312_vm7 = vcmp.ge.f32.partialorder %v280_v30, 0.0 }
  0x1d   : > { %405 = vst [vmem:[%s674_s23 + $0x20] sm:$0xff] %v373_v46  ;;  %v374_v49 = vsel %vm310_vm5, %v278_v28, %v342_v42  ;;  %v344_v50 = vmul.f32 0.2, %v280_v30  ;;  %v245_v51 = vsub.f32 %v208_v38, %v643_v7  ;;  %v246_v52 = vsub.f32 %v209_v39, %v643_v7  ;;  %v223_v46 = vld [vmem:[%s636_s17 + $0xb8] sm:$0xff] }
  0x1e   : > { %406 = vst [vmem:[%s674_s23 + $0x28] sm:$0xff] %v374_v49  ;;  %v375_v54 = vsel %vm311_vm6, %v279_v29, %v343_v47  ;;  %v247_v55 = vsub.f32 %v210_v43, %v643_v7  ;;  %v248_v56 = vsub.f32 %v211_v44, %v643_v7  ;;  %v249_v57 = vsub.f32 %v212_v45, %v643_v7  ;;  %v222_v45 = vld [vmem:[%s636_s17 + $0xb0] sm:$0xff]  ;;  %v224_v47 = vld [vmem:[%s636_s17 + $0xc0] sm:$0xff] }
  0x1f   : > { %407 = vst [vmem:[%s674_s23 + $0x30] sm:$0xff] %v375_v54  ;;  %v376_v58 = vsel %vm312_vm7, %v280_v30, %v344_v50  ;;  %v281_v59 = vmul.f32 %v645_v8, %v245_v51  ;;  %v282_v60 = vmul.f32 %v645_v8, %v246_v52  ;;  %v250_v61 = vsub.f32 %v213_v48, %v643_v7 }
  0x20   : > { %408 = vst [vmem:[%s674_s23 + $0x38] sm:$0xff] %v376_v58  ;;  %v283_v62 = vmul.f32 %v645_v8, %v247_v55  ;;  %v284_v63 = vmul.f32 %v645_v8, %v248_v56  ;;  %v285_v0 = vmul.f32 %v645_v8, %v249_v57  ;;  %v251_v1 = vsub.f32 %v214_v53, %v643_v7  ;;  %v225_v53 = vld [vmem:[%s636_s17 + $0xc8] sm:$0xff]  ;;  %v226_v58 = vld [vmem:[%s636_s17 + $0xd0] sm:$0xff] }
  0x21   : > { %vm313_vm8 = vcmp.ge.f32.partialorder %v281_v59, 0.0  ;;  %v345_v5 = vmul.f32 0.2, %v281_v59  ;;  %vm314_vm9 = vcmp.ge.f32.partialorder %v282_v60, 0.0  ;;  %v346_v6 = vmul.f32 0.2, %v282_v60 }
  0x22   : > { %vm315_vm10 = vcmp.ge.f32.partialorder %v283_v62, 0.0  ;;  %v347_v9 = vmul.f32 0.2, %v283_v62  ;;  %vm316_vm11 = vcmp.ge.f32.partialorder %v284_v63, 0.0  ;;  %v348_v10 = vmul.f32 0.2, %v284_v63 }
  0x23   : > { %v377_v11 = vsel %vm313_vm8, %v281_v59, %v345_v5  ;;  %v378_v12 = vsel %vm314_vm9, %v282_v60, %v346_v6  ;;  %vm317_vm12 = vcmp.ge.f32.partialorder %v285_v0, 0.0  ;;  %v349_v13 = vmul.f32 0.2, %v285_v0  ;;  %v227_v59 = vld [vmem:[%s636_s17 + $0xd8] sm:$0xff]  ;;  %v228_v60 = vld [vmem:[%s636_s17 + $0xe0] sm:$0xff] }
  0x24   : > { %409 = vst [vmem:[%s674_s23 + $0x40] sm:$0xff] %v377_v11  ;;  %410 = vst [vmem:[%s674_s23 + $0x48] sm:$0xff] %v378_v12  ;;  %v379_v14 = vsel %vm315_vm10, %v283_v62, %v347_v9  ;;  %v380_v15 = vsel %vm316_vm11, %v284_v63, %v348_v10  ;;  %v286_v16 = vmul.f32 %v645_v8, %v250_v61 }
  0x25   : > { %v287_v17 = vmul.f32 %v645_v8, %v251_v1  ;;  %411 = vst [vmem:[%s674_s23 + $0x50] sm:$0xff] %v379_v14  ;;  %412 = vst [vmem:[%s674_s23 + $0x58] sm:$0xff] %v380_v15  ;;  %v381_v19 = vsel %vm317_vm12, %v285_v0, %v349_v13  ;;  %v252_v20 = vsub.f32 %v215_v2, %v643_v7 }
  0x26   : > { %v253_v21 = vsub.f32 %v216_v3, %v643_v7  ;;  %v254_v22 = vsub.f32 %v217_v4, %v643_v7  ;;  %413 = vst [vmem:[%s674_s23 + $0x60] sm:$0xff] %v381_v19  ;;  %vm318_vm13 = vcmp.ge.f32.partialorder %v286_v16, 0.0  ;;  %v350_v25 = vmul.f32 0.2, %v286_v16  ;;  %v229_v19 = vld [vmem:[%s636_s17 + $0xe8] sm:$0xff] }
  0x27   : > { %vm319_vm14 = vcmp.ge.f32.partialorder %v287_v17, 0.0  ;;  %v351_v26 = vmul.f32 0.2, %v287_v17  ;;  %v288_v27 = vmul.f32 %v645_v8, %v252_v20  ;;  %v255_v30 = vsub.f32 %v218_v18, %v643_v7  ;;  %v230_v20 = vld [vmem:[%s636_s17 + $0xf0] sm:$0xff] }
  0x28   : > { %v289_v28 = vmul.f32 %v645_v8, %v253_v21  ;;  %v290_v29 = vmul.f32 %v645_v8, %v254_v22  ;;  %v382_v31 = vsel %vm318_vm13, %v286_v16, %v350_v25  ;;  %v256_v33 = vsub.f32 %v219_v23, %v643_v7  ;;  %v231_v23 = vld [vmem:[%s636_s17 + $0xf8] sm:$0xff] }
  0x29   : > { %v383_v32 = vsel %vm319_vm14, %v287_v17, %v351_v26  ;;  %v257_v34 = vsub.f32 %v220_v24, %v643_v7  ;;  %414 = vst [vmem:[%s674_s23 + $0x68] sm:$0xff] %v382_v31  ;;  %vm320_vm15 = vcmp.ge.f32.partialorder %v288_v27, 0.0  ;;  %v352_v36 = vmul.f32 0.2, %v288_v27 }
  0x2a   : > { %415 = vst [vmem:[%s674_s23 + $0x70] sm:$0xff] %v383_v32  ;;  %vm321_vm0 = vcmp.ge.f32.partialorder %v289_v28, 0.0  ;;  %v353_v37 = vmul.f32 0.2, %v289_v28  ;;  %vm322_vm1 = vcmp.ge.f32.partialorder %v290_v29, 0.0  ;;  %v291_v39 = vmul.f32 %v645_v8, %v255_v30 }
  0x2b   : > { %v354_v38 = vmul.f32 0.2, %v290_v29  ;;  %v292_v40 = vmul.f32 %v645_v8, %v256_v33  ;;  %v384_v41 = vsel %vm320_vm15, %v288_v27, %v352_v36  ;;  %v293_v43 = vmul.f32 %v645_v8, %v257_v34 }
  0x2c   : > { %v385_v42 = vsel %vm321_vm0, %v289_v28, %v353_v37  ;;  %v258_v44 = vsub.f32 %v221_v35, %v643_v7  ;;  %416 = vst [vmem:[%s674_s23 + $0x78] sm:$0xff] %v384_v41  ;;  %vm323_vm2 = vcmp.ge.f32.partialorder %v291_v39, 0.0  ;;  %v355_v49 = vmul.f32 0.2, %v291_v39 }
  0x2d   : > { %417 = vst [vmem:[%s674_s23 + $0x80] sm:$0xff] %v385_v42  ;;  %v386_v48 = vsel %vm322_vm1, %v290_v29, %v354_v38  ;;  %vm324_vm3 = vcmp.ge.f32.partialorder %v292_v40, 0.0  ;;  %v356_v50 = vmul.f32 0.2, %v292_v40  ;;  %vm325_vm4 = vcmp.ge.f32.partialorder %v293_v43, 0.0 }
  0x2e   : > { %418 = vst [vmem:[%s674_s23 + $0x88] sm:$0xff] %v386_v48  ;;  %v357_v51 = vmul.f32 0.2, %v293_v43  ;;  %v294_v52 = vmul.f32 %v645_v8, %v258_v44  ;;  %v387_v54 = vsel %vm323_vm2, %v291_v39, %v355_v49  ;;  %v259_v55 = vsub.f32 %v222_v45, %v643_v7 }
  0x2f   : > { %v260_v56 = vsub.f32 %v223_v46, %v643_v7  ;;  %v261_v57 = vsub.f32 %v224_v47, %v643_v7  ;;  %419 = vst [vmem:[%s674_s23 + $0x90] sm:$0xff] %v387_v54  ;;  %v388_v61 = vsel %vm324_vm3, %v292_v40, %v356_v50  ;;  %v262_v3 = vsub.f32 %v225_v53, %v643_v7 }
  0x30   : > { %v389_v62 = vsel %vm325_vm4, %v293_v43, %v357_v51  ;;  %vm326_vm5 = vcmp.ge.f32.partialorder %v294_v52, 0.0  ;;  %v358_v63 = vmul.f32 0.2, %v294_v52  ;;  %420 = vst [vmem:[%s674_s23 + $0x98] sm:$0xff] %v388_v61  ;;  %v295_v0 = vmul.f32 %v645_v8, %v259_v55 }
  0x31   : > { %421 = vst [vmem:[%s674_s23 + $0xa0] sm:$0xff] %v389_v62  ;;  %v296_v1 = vmul.f32 %v645_v8, %v260_v56  ;;  %v297_v2 = vmul.f32 %v645_v8, %v261_v57  ;;  %v263_v5 = vsub.f32 %v226_v58, %v643_v7  ;;  %v264_v6 = vsub.f32 %v227_v59, %v643_v7 }
  0x32   : > { %v390_v4 = vsel %vm326_vm5, %v294_v52, %v358_v63  ;;  %v265_v9 = vsub.f32 %v228_v60, %v643_v7  ;;  %vm327_vm6 = vcmp.ge.f32.partialorder %v295_v0, 0.0  ;;  %v359_v10 = vmul.f32 0.2, %v295_v0 }
  0x33   : > { %422 = vst [vmem:[%s674_s23 + $0xa8] sm:$0xff] %v390_v4  ;;  %vm328_vm7 = vcmp.ge.f32.partialorder %v296_v1, 0.0  ;;  %v360_v11 = vmul.f32 0.2, %v296_v1  ;;  %vm329_vm8 = vcmp.ge.f32.partialorder %v297_v2, 0.0  ;;  %v298_v13 = vmul.f32 %v645_v8, %v262_v3 }
  0x34   : > { %v361_v12 = vmul.f32 0.2, %v297_v2  ;;  %v299_v14 = vmul.f32 %v645_v8, %v263_v5  ;;  %v391_v15 = vsel %vm327_vm6, %v295_v0, %v359_v10  ;;  %v300_v17 = vmul.f32 %v645_v8, %v264_v6 }
  0x35   : > { %v392_v16 = vsel %vm328_vm7, %v296_v1, %v360_v11  ;;  %v301_v18 = vmul.f32 %v645_v8, %v265_v9  ;;  %423 = vst [vmem:[%s674_s23 + $0xb0] sm:$0xff] %v391_v15  ;;  %vm330_vm9 = vcmp.ge.f32.partialorder %v298_v13, 0.0  ;;  %v362_v22 = vmul.f32 0.2, %v298_v13 }
  0x36   : > { %424 = vst [vmem:[%s674_s23 + $0xb8] sm:$0xff] %v392_v16  ;;  %v393_v21 = vsel %vm329_vm8, %v297_v2, %v361_v12  ;;  %vm331_vm10 = vcmp.ge.f32.partialorder %v299_v14, 0.0  ;;  %v363_v24 = vmul.f32 0.2, %v299_v14  ;;  %vm332_vm11 = vcmp.ge.f32.partialorder %v300_v17, 0.0 }
  0x37   : > { %425 = vst [vmem:[%s674_s23 + $0xc0] sm:$0xff] %v393_v21  ;;  %v364_v25 = vmul.f32 0.2, %v300_v17  ;;  %vm333_vm12 = vcmp.ge.f32.partialorder %v301_v18, 0.0  ;;  %v394_v26 = vsel %vm330_vm9, %v298_v13, %v362_v22  ;;  %v365_v27 = vmul.f32 0.2, %v301_v18 }
  0x38   : > { %v266_v28 = vsub.f32 %v229_v19, %v643_v7  ;;  %v267_v29 = vsub.f32 %v230_v20, %v643_v7  ;;  %426 = vst [vmem:[%s674_s23 + $0xc8] sm:$0xff] %v394_v26  ;;  %v395_v30 = vsel %vm331_vm10, %v299_v14, %v363_v24  ;;  %v268_v32 = vsub.f32 %v231_v23, %v643_v7 }
  0x39   : > { %v396_v31 = vsel %vm332_vm11, %v300_v17, %v364_v25  ;;  %427 = vst [vmem:[%s674_s23 + $0xd0] sm:$0xff] %v395_v30  ;;  %v397_v33 = vsel %vm333_vm12, %v301_v18, %v365_v27 }
  0x3a   : > { %428 = vst [vmem:[%s674_s23 + $0xd8] sm:$0xff] %v396_v31  ;;  %v302_v34 = vmul.f32 %v645_v8, %v266_v28  ;;  %v303_v35 = vmul.f32 %v645_v8, %v267_v29  ;;  %429 = vst [vmem:[%s674_s23 + $0xe0] sm:$0xff] %v397_v33  ;;  %v304_v36 = vmul.f32 %v645_v8, %v268_v32 }
  0x3c   : > { %vm334_vm13 = vcmp.ge.f32.partialorder %v302_v34, 0.0  ;;  %v366_v37 = vmul.f32 0.2, %v302_v34  ;;  %vm335_vm14 = vcmp.ge.f32.partialorder %v303_v35, 0.0  ;;  %v367_v38 = vmul.f32 0.2, %v303_v35 }
  0x3d   : > { %vm336_vm15 = vcmp.ge.f32.partialorder %v304_v36, 0.0  ;;  %v368_v39 = vmul.f32 0.2, %v304_v36 }
  0x3e   : > { %v398_v7 = vsel %vm334_vm13, %v302_v34, %v366_v37  ;;  %v399_v40 = vsel %vm335_vm14, %v303_v35, %v367_v38 }
  0x3f   : > { %430 = vst [vmem:[%s674_s23 + $0xe8] sm:$0xff] %v398_v7  ;;  %431 = vst [vmem:[%s674_s23 + $0xf0] sm:$0xff] %v399_v40  ;;  %v400_v41 = vsel %vm336_vm15, %v304_v36, %v368_v39 }
  0x40   : > { %432 = vst [vmem:[%s674_s23 + $0xf8] sm:$0xff] %v400_v41 }
  0x41 PF: > { %s12_s11 = sadd.s32 1, %s592_s11   ;;  %s792_s9 = smov %s588_s10 }
  0x42   : > { %p9_p5 = scmp.ge.s32.totalorder %s12_s11, 4   ;;  %s793_s10 = smov %s795_s12 }
  0x44   :  { %11 = sbr.rel (!%p9_p5) target bundleno = 2 (0x2), region = 61 }

// kernel: discriminator_forward.16
= control target key start
LH: loop header
LB: loop body
LE: loop exit
PB: predicated region body
PF: predicated region fallthrough
CT: control target
= control target key end

     0   :  { %s584_s6 = smov 0   ;;  %s586_s7 = smov 0   ;;  %s621_s0 = inlined_call_operand.vmem [shape: f32[2,256,128], index: 0, kind: input, shape index: {}]   ;;  %s622_s1 = inlined_call_operand.vmem [shape: f32[2,2,128], index: 1, kind: output, shape index: {}]  }
   0x1   :  { %s588_s8 = smov 0  }
   0x2 LB: > { %s23_s9 = sadd.s32 1, %s567_s7  ;;  %p515_p0 = scmp.ge.s32.totalorder %s571_s8, 1  ;;  %s571_s8 = sphi %s588_s8, %s11_s8   ;;  %s567_s7 = sphi %s586_s7, %s624_s7   ;;  %s563_s6 = sphi %s584_s6, %s623_s6  }
   0x3   : > { %p25_p1 = scmp.ge.s32.totalorder %s23_s9, 2  ;;  %p106_p2 = scmp.lt.s32.totalorder %s571_s8, 3 }
   0x5   : > { %s626_s9 = smov (%p25_p1, %s23_s9), 0  ;;  %p107_p3 = pnand %p515_p0, %p106_p2 }
   0x6   : > { %p130_p4 = scmp.lt.s32.totalorder (!%p107_p3), %s563_s6, 1 }
   0x7   : > { %110 = sbr.rel (%p107_p3) target bundleno = 66 (0x42), region = 24 }
   0xc   : > { %v573_v0 = vmov 0.0   ;;  %s628_s6 = smov (!%p130_p4, %s563_s6), 1  ;;  %v436_v30 = vlaneseq  ;;  %vm441_vm0 = vcmask 1040384  }
   0xd   : > { %147 = vst [vmem:[#allocation2] sm:$0x1] %v573_v0  ;;  %148 = vst [vmem:[#allocation3] sm:$0x1] %v573_v0  ;;  %s521_s10 = sshll.u32 %s628_s6, 8  ;;  %s518_s14 = sshll.u32 %s628_s6, 1 }
   0xe   : > { %s137_s13 = scalar_lea.vmem %s621_s0, %s521_s10  ;;  %v437_v31 = vshrl.u32 %v436_v30, 7  ;;  %s142_s17 = scalar_lea.vmem %s622_s1, %s518_s14 }
   0xf   : > { %v149_v1 = vld [vmem:[%s137_s13] sm:$0xff]  ;;  %v150_v2 = vld [vmem:[%s137_s13 + $0x8] sm:$0xff] }
  0x10   : > { %v313_v3 = vadd.f32 %v150_v2, %v149_v1  ;;  %v353_v4 = vmul.f32 %v149_v1, %v149_v1  ;;  %v354_v5 = vmul.f32 %v150_v2, %v150_v2  ;;  %v438_v32 = vsub.s32 0, %v437_v31 }
  0x12   : > { %v344_v6 = vrot.slane %v313_v3, 4  ;;  %v385_v7 = vadd.f32 %v354_v5, %v353_v4 }
  0x14   : > { %v345_v8 = vadd.f32 %v344_v6, %v313_v3  ;;  %v416_v9 = vrot.slane %v385_v7, 4  ;;  %v312_v16 = vld [vmem:[#allocation2] sm:$0x1]  ;;  %v352_v19 = vld [vmem:[#allocation3] sm:$0x1] }
  0x16   : > { %v346_v10 = vrot.slane %v345_v8, 2  ;;  %v417_v11 = vadd.f32 %v416_v9, %v385_v7 }
  0x18   : > { %v347_v12 = vadd.f32 %v346_v10, %v345_v8  ;;  %v418_v13 = vrot.slane %v417_v11, 2 }
  0x1a   : > { %v348_v14 = vrot.slane %v347_v12, 1  ;;  %v419_v15 = vadd.f32 %v418_v13, %v417_v11 }
  0x1c   : > { %v349_v17 = vadd.f32 %v348_v14, %v347_v12  ;;  %v420_v18 = vrot.slane %v419_v15, 1 }
  0x1e   : > { %v350_v20 = vadd.f32 %v349_v17, %v312_v16  ;;  %v421_v21 = vadd.f32 %v420_v18, %v419_v15 }
  0x20   : > { %351 = vst [vmem:[#allocation2] sm:$0x1] %v350_v20  ;;  %v422_v22 = vadd.f32 %v421_v21, %v352_v19 }
  0x22   : > { %423 = vst [vmem:[#allocation3] sm:$0x1] %v422_v22 }
  0x27   : > { %v427_v23 = vld [vmem:[#allocation2] sm:$0x1] }
  0x28   : > { %v428_v24 = vmul.f32 0.0625, %v427_v23 }
  0x29   : > { %v429_v25 = vld [vmem:[#allocation3] sm:$0x1] }
  0x2a   : > { %v430_v26 = vmul.f32 0.0625, %v429_v25  ;;  %v431_v27 = vmul.f32 %v428_v24, %v428_v24 }
  0x2c   : > { %v432_v28 = vsub.f32 %v430_v26, %v431_v27 }
  0x2e   : > { %v433_v29 = vadd.f32 1e-05, %v432_v28 }
  0x30   : > { %547 = vrsqrt.f32 %v433_v29 }
  0x3d   : > { %v548_v33 = vpop.eup %547 }
  0x3e   : > { %v439_v34 = vrot.slane %v548_v33, %v438_v32 }
  0x40   : > { %v442_v35 = vsel %vm441_vm0, %v428_v24, %v439_v34 }
  0x41   : > { %443 = vst [vmem:[%s142_s17] sm:$0x3] %v442_v35 }
  0x42 PF: > { %s11_s8 = sadd.s32 1, %s571_s8   ;;  %s623_s6 = smov %s567_s7 }
  0x43   : > { %p8_p5 = scmp.ge.s32.totalorder %s11_s8, 4   ;;  %s624_s7 = smov %s626_s9 }
  0x45   :  { %10 = sbr.rel (!%p8_p5) target bundleno = 2 (0x2), region = 62 }

// kernel: discriminator_forward.15
= control target key start
LH: loop header
LB: loop body
LE: loop exit
PB: predicated region body
PF: predicated region fallthrough
CT: control target
= control target key end

     0   :  { %s2170_s12 = smov 0   ;;  %s2172_s13 = smov 0   ;;  %s2444_s0 = inlined_call_operand.vmem [shape: bf16[2,256,512], index: 0, kind: input, shape index: {}]   ;;  %s2445_s1 = inlined_call_operand.vmem [shape: bf16[512,128], index: 1, kind: input, shape index: {}]   ;;  %s2446_s2 = inlined_call_operand.vmem [shape: f32[1,128], index: 2, kind: input, shape index: {}]   ;;  %s2447_s3 = inlined_call_operand.vmem [shape: f32[2,256,128], index: 3, kind: output, shape index: {}]  }
   0x1   :  { %s2174_s14 = smov 0  }
   0x2 LB: > { %s39_s15 = sadd.s32 1, %s2144_s13  ;;  %p1644_p0 = scmp.ge.s32.totalorder %s2148_s14, 1  ;;  %s2148_s14 = sphi %s2174_s14, %s13_s14   ;;  %s2144_s13 = sphi %s2172_s13, %s2449_s13   ;;  %s2140_s12 = sphi %s2170_s12, %s2448_s12  }
   0x3   : > { %p41_p1 = scmp.ge.s32.totalorder %s39_s15, 2  ;;  %p206_p2 = scmp.lt.s32.totalorder %s2148_s14, 3 }
   0x5   : > { %s2451_s15 = smov (%p41_p1, %s39_s15), 0  ;;  %p207_p3 = pnand %p1644_p0, %p206_p2 }
   0x6   : > { %p259_p4 = scmp.lt.s32.totalorder (!%p207_p3), %s2140_s12, 1 }
   0x7   : > { %210 = sbr.rel (%p207_p3) target bundleno = 373 (0x175), region = 32 }
   0xc   : > { %v1998_v0 = vld [vmem:[%s2445_s1 + $0x78] sm:$0xff]   ;;  %v2002_v4 = vld [vmem:[%s2445_s1 + $0x70] sm:$0xff]   ;;  %v2006_v8 = vld [vmem:[%s2445_s1 + $0x68] sm:$0xff]   ;;  %s2453_s12 = smov (!%p259_p4, %s2140_s12), 1 }
   0xd   : > { %v1999_v1 = vld [vmem:[%s2445_s1 + $0xf8] sm:$0xff]   ;;  %1750 = vmatprep.subr.bf16.mxu0 %v1998_v0  ;;  %v2003_v5 = vld [vmem:[%s2445_s1 + $0xf0] sm:$0xff]   ;;  %v2007_v9 = vld [vmem:[%s2445_s1 + $0xe8] sm:$0xff]   ;;  %s1748_s24 = sshll.u32 %s2453_s12, 9  ;;  %s1749_s11 = sshll.u32 %s2453_s12, 8 }
   0xe   : > { %v2000_v2 = vld [vmem:[%s2445_s1 + $0x38] sm:$0xff]   ;;  %1862 = vmatprep.subr.bf16.mxu1 %v1999_v1  ;;  %v2004_v6 = vld [vmem:[%s2445_s1 + $0x30] sm:$0xff]   ;;  %v2008_v10 = vld [vmem:[%s2445_s1 + $0x28] sm:$0xff]   ;;  %s2288_s6 = scalar_lea.vmem %s2444_s0, %s1748_s24  ;;  %s2369_s20 = scalar_lea.vmem %s2447_s3, %s1749_s11 }
   0xf   : > { %v2001_v3 = vld [vmem:[%s2445_s1 + $0xb8] sm:$0xff]   ;;  %1751 = vmatpush3.bf16.msra.mxu0 %v2000_v2  ;;  %v2005_v7 = vld [vmem:[%s2445_s1 + $0xb0] sm:$0xff]   ;;  %v2009_v11 = vld [vmem:[%s2445_s1 + $0xa8] sm:$0xff]  }
  0x10   : > { %1863 = vmatpush3.bf16.msra.mxu1 %v2001_v3  ;;  %1752 = vmatprep.subr.bf16.mxu0 %v2002_v4  ;;  %v2010_v12 = vld [vmem:[%s2445_s1 + $0x60] sm:$0xff]   ;;  %v2014_v16 = vld [vmem:[%s2445_s1 + $0x58] sm:$0xff]   ;;  %v2018_v20 = vld [vmem:[%s2445_s1 + $0x50] sm:$0xff]  }
  0x11   : > { %1864 = vmatprep.subr.bf16.mxu1 %v2003_v5  ;;  %v2011_v13 = vld [vmem:[%s2445_s1 + $0xe0] sm:$0xff]   ;;  %v2015_v17 = vld [vmem:[%s2445_s1 + $0xd8] sm:$0xff]   ;;  %v2019_v21 = vld [vmem:[%s2445_s1 + $0xd0] sm:$0xff]  }
  0x12   : > { %v2012_v14 = vld [vmem:[%s2445_s1 + $0x20] sm:$0xff]   ;;  %v2016_v18 = vld [vmem:[%s2445_s1 + $0x18] sm:$0xff]   ;;  %v2020_v22 = vld [vmem:[%s2445_s1 + $0x10] sm:$0xff]  }
  0x13   : > { %1753 = vmatpush3.bf16.msra.mxu0 %v2004_v6  ;;  %v2013_v15 = vld [vmem:[%s2445_s1 + $0xa0] sm:$0xff]   ;;  %v2017_v19 = vld [vmem:[%s2445_s1 + $0x98] sm:$0xff]   ;;  %v2021_v23 = vld [vmem:[%s2445_s1 + $0x90] sm:$0xff]  }
  0x14   : > { %1865 = vmatpush3.bf16.msra.mxu1 %v2005_v7  ;;  %1754 = vmatprep.subr.bf16.mxu0 %v2006_v8  ;;  %v2022_v24 = vld [vmem:[%s2445_s1 + $0x48] sm:$0xff]   ;;  %v2026_v28 = vld [vmem:[%s2445_s1 + $0x40] sm:$0xff]  }
  0x15   : > { %1866 = vmatprep.subr.bf16.mxu1 %v2007_v9  ;;  %v2023_v25 = vld [vmem:[%s2445_s1 + $0xc8] sm:$0xff]   ;;  %v2027_v29 = vld [vmem:[%s2445_s1 + $0xc0] sm:$0xff]  }
  0x16   : > { %v2024_v26 = vld [vmem:[%s2445_s1 + $0x8] sm:$0xff]   ;;  %v2028_v30 = vld [vmem:[%s2445_s1] sm:$0xff]  }
  0x17   : > { %1755 = vmatpush3.bf16.msra.mxu0 %v2008_v10  ;;  %v2025_v27 = vld [vmem:[%s2445_s1 + $0x88] sm:$0xff]   ;;  %v2029_v31 = vld [vmem:[%s2445_s1 + $0x80] sm:$0xff]  }
  0x18   : > { %1867 = vmatpush3.bf16.msra.mxu1 %v2009_v11  ;;  %1756 = vmatprep.subr.bf16.mxu0 %v2010_v12  ;;  %v2030_v32 = vld [vmem:[%s2288_s6] ss:$16 sps:$4 sm:$0xff]   ;;  %v2032_v33 = vld [vmem:[%s2288_s6 + $0x4] ss:$16 sps:$4 sm:$0xff]   ;;  %v2033_v34 = vld [vmem:[%s2288_s6 + $0x8] ss:$16 sps:$4 sm:$0xff]  }
  0x19   : > { %1868 = vmatprep.subr.bf16.mxu1 %v2011_v13  ;;  %v2035_v35 = vld [vmem:[%s2288_s6 + $0xc] ss:$16 sps:$4 sm:$0xff]   ;;  %1039 = vmatprep.mubr.bf16.mxu0 %v2032_v33  ;;  %v2036_v36 = vld [vmem:[%s2288_s6 + $0x24] ss:$16 sps:$4 sm:$0xff]   ;;  %v2040_v38 = vld [vmem:[%s2288_s6 + $0x20] ss:$16 sps:$4 sm:$0xff]  }
  0x1a   : > { %1200 = vmatprep.mubr.bf16.mxu1 %v2035_v35  ;;  %v2038_v37 = vld [vmem:[%s2288_s6 + $0x2c] ss:$16 sps:$4 sm:$0xff]   ;;  %v2041_v39 = vld [vmem:[%s2288_s6 + $0x28] ss:$16 sps:$4 sm:$0xff]   ;;  %v2042_v40 = vld [vmem:[%s2288_s6 + $0x44] ss:$16 sps:$4 sm:$0xff]  }
  0x1b   : > { %1757 = vmatpush3.bf16.msra.mxu0 %v2012_v14  ;;  %v2044_v41 = vld [vmem:[%s2288_s6 + $0x4c] ss:$16 sps:$4 sm:$0xff]   ;;  %v2046_v42 = vld [vmem:[%s2288_s6 + $0x40] ss:$16 sps:$4 sm:$0xff]   ;;  %v2047_v43 = vld [vmem:[%s2288_s6 + $0x48] ss:$16 sps:$4 sm:$0xff]  }
  0x1c   : > { %1869 = vmatpush3.bf16.msra.mxu1 %v2013_v15  ;;  %1758 = vmatprep.subr.bf16.mxu0 %v2014_v16  ;;  %v2048_v44 = vld [vmem:[%s2288_s6 + $0x64] ss:$16 sps:$4 sm:$0xff]   ;;  %v2050_v45 = vld [vmem:[%s2288_s6 + $0x6c] ss:$16 sps:$4 sm:$0xff]   ;;  %v2052_v46 = vld [vmem:[%s2288_s6 + $0x60] ss:$16 sps:$4 sm:$0xff]  }
  0x1d   : > { %1870 = vmatprep.subr.bf16.mxu1 %v2015_v17  ;;  %v2053_v47 = vld [vmem:[%s2288_s6 + $0x68] ss:$16 sps:$4 sm:$0xff]   ;;  %v2054_v48 = vld [vmem:[%s2288_s6 + $0x84] ss:$16 sps:$4 sm:$0xff]   ;;  %v2056_v49 = vld [vmem:[%s2288_s6 + $0x8c] ss:$16 sps:$4 sm:$0xff]  }
  0x1e   : > { %v2058_v50 = vld [vmem:[%s2288_s6 + $0x80] ss:$16 sps:$4 sm:$0xff]   ;;  %v2059_v51 = vld [vmem:[%s2288_s6 + $0x88] ss:$16 sps:$4 sm:$0xff]   ;;  %v2060_v52 = vld [vmem:[%s2288_s6 + $0xa4] ss:$16 sps:$4 sm:$0xff]  }
  0x1f   : > { %1759 = vmatpush3.bf16.msra.mxu0 %v2016_v18  ;;  %v2062_v53 = vld [vmem:[%s2288_s6 + $0xac] ss:$16 sps:$4 sm:$0xff]   ;;  %v2064_v54 = vld [vmem:[%s2288_s6 + $0xa0] ss:$16 sps:$4 sm:$0xff]   ;;  %v2065_v55 = vld [vmem:[%s2288_s6 + $0xa8] ss:$16 sps:$4 sm:$0xff]  }
  0x20   : > { %1871 = vmatpush3.bf16.msra.mxu1 %v2017_v19  ;;  %1760 = vmatprep.subr.bf16.mxu0 %v2018_v20  ;;  %v2066_v56 = vld [vmem:[%s2288_s6 + $0xc4] ss:$16 sps:$4 sm:$0xff]   ;;  %v2068_v57 = vld [vmem:[%s2288_s6 + $0xcc] ss:$16 sps:$4 sm:$0xff]   ;;  %v2070_v58 = vld [vmem:[%s2288_s6 + $0xc0] ss:$16 sps:$4 sm:$0xff]  }
  0x21   : > { %1872 = vmatprep.subr.bf16.mxu1 %v2019_v21  ;;  %v2071_v59 = vld [vmem:[%s2288_s6 + $0xc8] ss:$16 sps:$4 sm:$0xff]   ;;  %v2072_v60 = vld [vmem:[%s2288_s6 + $0xe4] ss:$16 sps:$4 sm:$0xff]   ;;  %v2074_v61 = vld [vmem:[%s2288_s6 + $0xec] ss:$16 sps:$4 sm:$0xff]  }
  0x22   : > { %v2076_v62 = vld [vmem:[%s2288_s6 + $0xe0] ss:$16 sps:$4 sm:$0xff]   ;;  %v2077_v63 = vld [vmem:[%s2288_s6 + $0xe8] ss:$16 sps:$4 sm:$0xff]   ;;  %v2078_v0 = vld [vmem:[%s2288_s6 + $0x104] ss:$16 sps:$4 sm:$0xff]  }
  0x23   : > { %1761 = vmatpush3.bf16.msra.mxu0 %v2020_v22  ;;  %v2080_v1 = vld [vmem:[%s2288_s6 + $0x10c] ss:$16 sps:$4 sm:$0xff]   ;;  %v2082_v2 = vld [vmem:[%s2288_s6 + $0x100] ss:$16 sps:$4 sm:$0xff]   ;;  %v2083_v3 = vld [vmem:[%s2288_s6 + $0x108] ss:$16 sps:$4 sm:$0xff]  }
  0x24   : > { %1873 = vmatpush3.bf16.msra.mxu1 %v2021_v23  ;;  %1762 = vmatprep.subr.bf16.mxu0 %v2022_v24  ;;  %v2084_v4 = vld [vmem:[%s2288_s6 + $0x124] ss:$16 sps:$4 sm:$0xff]   ;;  %v2086_v5 = vld [vmem:[%s2288_s6 + $0x12c] ss:$16 sps:$4 sm:$0xff]   ;;  %v2088_v6 = vld [vmem:[%s2288_s6 + $0x120] ss:$16 sps:$4 sm:$0xff]  }
  0x25   : > { %1874 = vmatprep.subr.bf16.mxu1 %v2023_v25  ;;  %v2089_v7 = vld [vmem:[%s2288_s6 + $0x128] ss:$16 sps:$4 sm:$0xff]   ;;  %v2090_v8 = vld [vmem:[%s2288_s6 + $0x144] ss:$16 sps:$4 sm:$0xff]   ;;  %v2092_v9 = vld [vmem:[%s2288_s6 + $0x14c] ss:$16 sps:$4 sm:$0xff]  }
  0x26   : > { %v2094_v10 = vld [vmem:[%s2288_s6 + $0x140] ss:$16 sps:$4 sm:$0xff]   ;;  %v2095_v11 = vld [vmem:[%s2288_s6 + $0x148] ss:$16 sps:$4 sm:$0xff]   ;;  %v2096_v12 = vld [vmem:[%s2288_s6 + $0x164] ss:$16 sps:$4 sm:$0xff]  }
  0x27   : > { %1763 = vmatpush3.bf16.msra.mxu0 %v2024_v26  ;;  %v2098_v13 = vld [vmem:[%s2288_s6 + $0x16c] ss:$16 sps:$4 sm:$0xff]   ;;  %v2100_v14 = vld [vmem:[%s2288_s6 + $0x160] ss:$16 sps:$4 sm:$0xff]   ;;  %v2101_v15 = vld [vmem:[%s2288_s6 + $0x168] ss:$16 sps:$4 sm:$0xff]  }
  0x28   : > { %1875 = vmatpush3.bf16.msra.mxu1 %v2025_v27  ;;  %1764 = vmatprep.subr.bf16.mxu0 %v2026_v28  ;;  %v2102_v16 = vld [vmem:[%s2288_s6 + $0x184] ss:$16 sps:$4 sm:$0xff]   ;;  %v2104_v17 = vld [vmem:[%s2288_s6 + $0x18c] ss:$16 sps:$4 sm:$0xff]   ;;  %v2106_v18 = vld [vmem:[%s2288_s6 + $0x180] ss:$16 sps:$4 sm:$0xff]  }
  0x29   : > { %1876 = vmatprep.subr.bf16.mxu1 %v2027_v29  ;;  %v2107_v19 = vld [vmem:[%s2288_s6 + $0x188] ss:$16 sps:$4 sm:$0xff]   ;;  %v2108_v20 = vld [vmem:[%s2288_s6 + $0x1a4] ss:$16 sps:$4 sm:$0xff]   ;;  %v2110_v21 = vld [vmem:[%s2288_s6 + $0x1ac] ss:$16 sps:$4 sm:$0xff]  }
  0x2a   : > { %v2112_v22 = vld [vmem:[%s2288_s6 + $0x1a0] ss:$16 sps:$4 sm:$0xff]   ;;  %v2113_v23 = vld [vmem:[%s2288_s6 + $0x1a8] ss:$16 sps:$4 sm:$0xff]   ;;  %v2114_v24 = vld [vmem:[%s2288_s6 + $0x1c4] ss:$16 sps:$4 sm:$0xff]  }
  0x2b   : > { %1765 = vmatpush3.bf16.msra.mxu0 %v2028_v30  ;;  %v2116_v25 = vld [vmem:[%s2288_s6 + $0x1cc] ss:$16 sps:$4 sm:$0xff]   ;;  %v2118_v26 = vld [vmem:[%s2288_s6 + $0x1c0] ss:$16 sps:$4 sm:$0xff]   ;;  %v2119_v27 = vld [vmem:[%s2288_s6 + $0x1c8] ss:$16 sps:$4 sm:$0xff]  }
  0x2c   : > { %1877 = vmatpush3.bf16.msra.mxu1 %v2029_v31  ;;  %v2120_v28 = vld [vmem:[%s2288_s6 + $0x1e4] ss:$16 sps:$4 sm:$0xff]   ;;  %v2122_v29 = vld [vmem:[%s2288_s6 + $0x1ec] ss:$16 sps:$4 sm:$0xff]   ;;  %v2124_v30 = vld [vmem:[%s2288_s6 + $0x1e0] ss:$16 sps:$4 sm:$0xff]  }
  0x2d   : > { %v2125_v31 = vld [vmem:[%s2288_s6 + $0x1e8] ss:$16 sps:$4 sm:$0xff]  }
  0x2e   : > { %1040 = vmatmul.mubr.bf16.vlgmr.msra.gmra.mxu0 %v2030_v32 }
  0x2f   : > { %1201 = vmatmul.mubr.bf16.vlgmr.msra.gmra.mxu1 %v2033_v34  ;;  %1047 = vmatprep.mubr.bf16.mxu0 %v2036_v36 }
  0x30   : > { %1208 = vmatprep.mubr.bf16.mxu1 %v2038_v37 }
  0x36   : > { %1048 = vmatmul.mubr.bf16.gmra.mxu0 %v2040_v38 }
  0x37   : > { %1209 = vmatmul.mubr.bf16.gmra.mxu1 %v2041_v39  ;;  %1055 = vmatprep.mubr.bf16.mxu0 %v2042_v40  ;;  %v2364_v39 = vld [vmem:[%s2446_s2] ss:$0 sm:$0xff] }
  0x38   : > { %1216 = vmatprep.mubr.bf16.mxu1 %v2044_v41 }
  0x3e   : > { %1056 = vmatmul.mubr.bf16.gmra.mxu0 %v2046_v42 }
  0x3f   : > { %1217 = vmatmul.mubr.bf16.gmra.mxu1 %v2047_v43  ;;  %1063 = vmatprep.mubr.bf16.mxu0 %v2048_v44 }
  0x40   : > { %1224 = vmatprep.mubr.bf16.mxu1 %v2050_v45 }
  0x46   : > { %1064 = vmatmul.mubr.bf16.gmra.mxu0 %v2052_v46 }
  0x47   : > { %1225 = vmatmul.mubr.bf16.gmra.mxu1 %v2053_v47  ;;  %1071 = vmatprep.mubr.bf16.mxu0 %v2054_v48 }
  0x48   : > { %1232 = vmatprep.mubr.bf16.mxu1 %v2056_v49 }
  0x4e   : > { %1072 = vmatmul.mubr.bf16.gmra.mxu0 %v2058_v50 }
  0x4f   : > { %1233 = vmatmul.mubr.bf16.gmra.mxu1 %v2059_v51  ;;  %1079 = vmatprep.mubr.bf16.mxu0 %v2060_v52 }
  0x50   : > { %1240 = vmatprep.mubr.bf16.mxu1 %v2062_v53 }
  0x56   : > { %1080 = vmatmul.mubr.bf16.gmra.mxu0 %v2064_v54 }
  0x57   : > { %1241 = vmatmul.mubr.bf16.gmra.mxu1 %v2065_v55  ;;  %1087 = vmatprep.mubr.bf16.mxu0 %v2066_v56 }
  0x58   : > { %1248 = vmatprep.mubr.bf16.mxu1 %v2068_v57 }
  0x5e   : > { %1088 = vmatmul.mubr.bf16.gmra.mxu0 %v2070_v58 }
  0x5f   : > { %1249 = vmatmul.mubr.bf16.gmra.mxu1 %v2071_v59  ;;  %1095 = vmatprep.mubr.bf16.mxu0 %v2072_v60 }
  0x60   : > { %1256 = vmatprep.mubr.bf16.mxu1 %v2074_v61 }
  0x66   : > { %1096 = vmatmul.mubr.bf16.gmra.mxu0 %v2076_v62 }
  0x67   : > { %1257 = vmatmul.mubr.bf16.gmra.mxu1 %v2077_v63  ;;  %1103 = vmatprep.mubr.bf16.mxu0 %v2078_v0 }
  0x68   : > { %1264 = vmatprep.mubr.bf16.mxu1 %v2080_v1 }
  0x6e   : > { %1104 = vmatmul.mubr.bf16.gmra.mxu0 %v2082_v2 }
  0x6f   : > { %1265 = vmatmul.mubr.bf16.gmra.mxu1 %v2083_v3  ;;  %1111 = vmatprep.mubr.bf16.mxu0 %v2084_v4 }
  0x70   : > { %1272 = vmatprep.mubr.bf16.mxu1 %v2086_v5 }
  0x76   : > { %1112 = vmatmul.mubr.bf16.gmra.mxu0 %v2088_v6 }
  0x77   : > { %1273 = vmatmul.mubr.bf16.gmra.mxu1 %v2089_v7  ;;  %1119 = vmatprep.mubr.bf16.mxu0 %v2090_v8 }
  0x78   : > { %1280 = vmatprep.mubr.bf16.mxu1 %v2092_v9 }
  0x7e   : > { %1120 = vmatmul.mubr.bf16.gmra.mxu0 %v2094_v10 }
  0x7f   : > { %1281 = vmatmul.mubr.bf16.gmra.mxu1 %v2095_v11  ;;  %1127 = vmatprep.mubr.bf16.mxu0 %v2096_v12 }
  0x80   : > { %1288 = vmatprep.mubr.bf16.mxu1 %v2098_v13 }
  0x86   : > { %1128 = vmatmul.mubr.bf16.gmra.mxu0 %v2100_v14 }
  0x87   : > { %1289 = vmatmul.mubr.bf16.gmra.mxu1 %v2101_v15  ;;  %1135 = vmatprep.mubr.bf16.mxu0 %v2102_v16 }
  0x88   : > { %1296 = vmatprep.mubr.bf16.mxu1 %v2104_v17 }
  0x8e   : > { %1136 = vmatmul.mubr.bf16.gmra.mxu0 %v2106_v18 }
  0x8f   : > { %1297 = vmatmul.mubr.bf16.gmra.mxu1 %v2107_v19  ;;  %1143 = vmatprep.mubr.bf16.mxu0 %v2108_v20 }
  0x90   : > { %1304 = vmatprep.mubr.bf16.mxu1 %v2110_v21 }
  0x96   : > { %1144 = vmatmul.mubr.bf16.gmra.mxu0 %v2112_v22 }
  0x97   : > { %1305 = vmatmul.mubr.bf16.gmra.mxu1 %v2113_v23  ;;  %1151 = vmatprep.mubr.bf16.mxu0 %v2114_v24 }
  0x98   : > { %1312 = vmatprep.mubr.bf16.mxu1 %v2116_v25 }
  0x9e   : > { %1152 = vmatmul.mubr.bf16.gmra.mxu0 %v2118_v26 }
  0x9f   : > { %1313 = vmatmul.mubr.bf16.gmra.mxu1 %v2119_v27  ;;  %1159 = vmatprep.mubr.bf16.mxu0 %v2120_v28 }
  0xa0   : > { %1320 = vmatprep.mubr.bf16.mxu1 %v2122_v29 }
  0xa6   : > { %1160 = vmatmul.mubr.bf16.gmra.mxu0 %v2124_v30 }
  0xa7   : > { %1321 = vmatmul.mubr.bf16.gmra.mxu1 %v2125_v31 }
  0xee   : > { %v1766_v32 = vpop.f32.mrf.mxu0 }
  0xef   : > { %v1878_v33 = vpop.f32.mrf.mxu1 }
  0xf0   : > { %v1767_v34 = vpop.f32.mrf.mxu0 }
  0xf1   : > { %v1768_v35 = vadd.f32 %v1767_v34, %v1766_v32  ;;  %v1879_v36 = vpop.f32.mrf.mxu1 }
  0xf2   : > { %v1880_v37 = vadd.f32 %v1879_v36, %v1878_v33  ;;  %v1769_v38 = vpop.f32.mrf.mxu0 }
  0xf3   : > { %v1881_v40 = vpop.f32.mrf.mxu1 }
  0xf4   : > { %v1203_v41 = vadd.f32 %v1880_v37, %v1768_v35  ;;  %v1770_v42 = vpop.f32.mrf.mxu0 }
  0xf5   : > { %v1771_v43 = vadd.f32 %v1770_v42, %v1769_v38  ;;  %v1882_v44 = vpop.f32.mrf.mxu1 }
  0xf6   : > { %v1435_v45 = vadd.f32 %v2364_v39, %v1203_v41  ;;  %v1883_v46 = vadd.f32 %v1882_v44, %v1881_v40  ;;  %v1772_v47 = vpop.f32.mrf.mxu0 }
  0xf7   : > { %v1884_v48 = vpop.f32.mrf.mxu1 }
  0xf8   : > { %1467 = vst [vmem:[%s2369_s20] sm:$0xff] %v1435_v45  ;;  %v1206_v49 = vadd.f32 %v1883_v46, %v1771_v43  ;;  %v1773_v50 = vpop.f32.mrf.mxu0 }
  0xf9   : > { %v1774_v51 = vadd.f32 %v1773_v50, %v1772_v47  ;;  %v1885_v52 = vpop.f32.mrf.mxu1 }
  0xfa   : > { %v1436_v53 = vadd.f32 %v2364_v39, %v1206_v49  ;;  %v1886_v54 = vadd.f32 %v1885_v52, %v1884_v48  ;;  %v1775_v55 = vpop.f32.mrf.mxu0 }
  0xfb   : > { %v1887_v56 = vpop.f32.mrf.mxu1 }
  0xfc   : > { %1468 = vst [vmem:[%s2369_s20 + $0x8] sm:$0xff] %v1436_v53  ;;  %v1211_v57 = vadd.f32 %v1886_v54, %v1774_v51  ;;  %v1776_v58 = vpop.f32.mrf.mxu0 }
  0xfd   : > { %v1777_v59 = vadd.f32 %v1776_v58, %v1775_v55  ;;  %v1888_v60 = vpop.f32.mrf.mxu1 }
  0xfe   : > { %v1437_v61 = vadd.f32 %v2364_v39, %v1211_v57  ;;  %v1889_v62 = vadd.f32 %v1888_v60, %v1887_v56  ;;  %v1778_v63 = vpop.f32.mrf.mxu0 }
  0xff   : > { %v1890_v0 = vpop.f32.mrf.mxu1 }
 0x100   : > { %1469 = vst [vmem:[%s2369_s20 + $0x10] sm:$0xff] %v1437_v61  ;;  %v1214_v1 = vadd.f32 %v1889_v62, %v1777_v59  ;;  %v1779_v2 = vpop.f32.mrf.mxu0 }
 0x101   : > { %v1780_v3 = vadd.f32 %v1779_v2, %v1778_v63  ;;  %v1891_v4 = vpop.f32.mrf.mxu1 }
 0x102   : > { %v1438_v5 = vadd.f32 %v2364_v39, %v1214_v1  ;;  %v1892_v6 = vadd.f32 %v1891_v4, %v1890_v0  ;;  %v1781_v7 = vpop.f32.mrf.mxu0 }
 0x103   : > { %v1893_v8 = vpop.f32.mrf.mxu1 }
 0x104   : > { %1470 = vst [vmem:[%s2369_s20 + $0x18] sm:$0xff] %v1438_v5  ;;  %v1219_v9 = vadd.f32 %v1892_v6, %v1780_v3  ;;  %v1782_v10 = vpop.f32.mrf.mxu0 }
 0x105   : > { %v1783_v11 = vadd.f32 %v1782_v10, %v1781_v7  ;;  %v1894_v12 = vpop.f32.mrf.mxu1 }
 0x106   : > { %v1439_v13 = vadd.f32 %v2364_v39, %v1219_v9  ;;  %v1895_v14 = vadd.f32 %v1894_v12, %v1893_v8  ;;  %v1784_v15 = vpop.f32.mrf.mxu0 }
 0x107   : > { %v1896_v16 = vpop.f32.mrf.mxu1 }
 0x108   : > { %1471 = vst [vmem:[%s2369_s20 + $0x20] sm:$0xff] %v1439_v13  ;;  %v1222_v17 = vadd.f32 %v1895_v14, %v1783_v11  ;;  %v1785_v18 = vpop.f32.mrf.mxu0 }
 0x109   : > { %v1786_v19 = vadd.f32 %v1785_v18, %v1784_v15  ;;  %v1897_v20 = vpop.f32.mrf.mxu1 }
 0x10a   : > { %v1440_v21 = vadd.f32 %v2364_v39, %v1222_v17  ;;  %v1898_v22 = vadd.f32 %v1897_v20, %v1896_v16  ;;  %v1787_v23 = vpop.f32.mrf.mxu0 }
 0x10b   : > { %v1899_v24 = vpop.f32.mrf.mxu1 }
 0x10c   : > { %1472 = vst [vmem:[%s2369_s20 + $0x28] sm:$0xff] %v1440_v21  ;;  %v1227_v25 = vadd.f32 %v1898_v22, %v1786_v19  ;;  %v1788_v26 = vpop.f32.mrf.mxu0 }
 0x10d   : > { %v1789_v27 = vadd.f32 %v1788_v26, %v1787_v23  ;;  %v1900_v28 = vpop.f32.mrf.mxu1 }
 0x10e   : > { %v1441_v29 = vadd.f32 %v2364_v39, %v1227_v25  ;;  %v1901_v30 = vadd.f32 %v1900_v28, %v1899_v24  ;;  %v1790_v31 = vpop.f32.mrf.mxu0 }
 0x10f   : > { %v1902_v32 = vpop.f32.mrf.mxu1 }
 0x110   : > { %1473 = vst [vmem:[%s2369_s20 + $0x30] sm:$0xff] %v1441_v29  ;;  %v1230_v33 = vadd.f32 %v1901_v30, %v1789_v27  ;;  %v1791_v34 = vpop.f32.mrf.mxu0 }
 0x111   : > { %v1792_v35 = vadd.f32 %v1791_v34, %v1790_v31  ;;  %v1903_v36 = vpop.f32.mrf.mxu1 }
 0x112   : > { %v1442_v37 = vadd.f32 %v2364_v39, %v1230_v33  ;;  %v1904_v38 = vadd.f32 %v1903_v36, %v1902_v32  ;;  %v1793_v40 = vpop.f32.mrf.mxu0 }
 0x113   : > { %v1905_v41 = vpop.f32.mrf.mxu1 }
 0x114   : > { %1474 = vst [vmem:[%s2369_s20 + $0x38] sm:$0xff] %v1442_v37  ;;  %v1235_v42 = vadd.f32 %v1904_v38, %v1792_v35  ;;  %v1794_v43 = vpop.f32.mrf.mxu0 }
 0x115   : > { %v1795_v44 = vadd.f32 %v1794_v43, %v1793_v40  ;;  %v1906_v45 = vpop.f32.mrf.mxu1 }
 0x116   : > { %v1443_v46 = vadd.f32 %v2364_v39, %v1235_v42  ;;  %v1907_v47 = vadd.f32 %v1906_v45, %v1905_v41  ;;  %v1796_v48 = vpop.f32.mrf.mxu0 }
 0x117   : > { %v1908_v49 = vpop.f32.mrf.mxu1 }
 0x118   : > { %1475 = vst [vmem:[%s2369_s20 + $0x40] sm:$0xff] %v1443_v46  ;;  %v1238_v50 = vadd.f32 %v1907_v47, %v1795_v44  ;;  %v1797_v51 = vpop.f32.mrf.mxu0 }
 0x119   : > { %v1798_v52 = vadd.f32 %v1797_v51, %v1796_v48  ;;  %v1909_v53 = vpop.f32.mrf.mxu1 }
 0x11a   : > { %v1444_v54 = vadd.f32 %v2364_v39, %v1238_v50  ;;  %v1910_v55 = vadd.f32 %v1909_v53, %v1908_v49  ;;  %v1799_v56 = vpop.f32.mrf.mxu0 }
 0x11b   : > { %v1911_v57 = vpop.f32.mrf.mxu1 }
 0x11c   : > { %1476 = vst [vmem:[%s2369_s20 + $0x48] sm:$0xff] %v1444_v54  ;;  %v1243_v58 = vadd.f32 %v1910_v55, %v1798_v52  ;;  %v1800_v59 = vpop.f32.mrf.mxu0 }
 0x11d   : > { %v1801_v60 = vadd.f32 %v1800_v59, %v1799_v56  ;;  %v1912_v61 = vpop.f32.mrf.mxu1 }
 0x11e   : > { %v1445_v62 = vadd.f32 %v2364_v39, %v1243_v58  ;;  %v1913_v63 = vadd.f32 %v1912_v61, %v1911_v57  ;;  %v1802_v0 = vpop.f32.mrf.mxu0 }
 0x11f   : > { %v1914_v1 = vpop.f32.mrf.mxu1 }
 0x120   : > { %1477 = vst [vmem:[%s2369_s20 + $0x50] sm:$0xff] %v1445_v62  ;;  %v1246_v2 = vadd.f32 %v1913_v63, %v1801_v60  ;;  %v1803_v3 = vpop.f32.mrf.mxu0 }
 0x121   : > { %v1804_v4 = vadd.f32 %v1803_v3, %v1802_v0  ;;  %v1915_v5 = vpop.f32.mrf.mxu1 }
 0x122   : > { %v1446_v6 = vadd.f32 %v2364_v39, %v1246_v2  ;;  %v1916_v7 = vadd.f32 %v1915_v5, %v1914_v1  ;;  %v1805_v8 = vpop.f32.mrf.mxu0 }
 0x123   : > { %v1917_v9 = vpop.f32.mrf.mxu1 }
 0x124   : > { %1478 = vst [vmem:[%s2369_s20 + $0x58] sm:$0xff] %v1446_v6  ;;  %v1251_v10 = vadd.f32 %v1916_v7, %v1804_v4  ;;  %v1806_v11 = vpop.f32.mrf.mxu0 }
 0x125   : > { %v1807_v12 = vadd.f32 %v1806_v11, %v1805_v8  ;;  %v1918_v13 = vpop.f32.mrf.mxu1 }
 0x126   : > { %v1447_v14 = vadd.f32 %v2364_v39, %v1251_v10  ;;  %v1919_v15 = vadd.f32 %v1918_v13, %v1917_v9  ;;  %v1808_v16 = vpop.f32.mrf.mxu0 }
 0x127   : > { %v1920_v17 = vpop.f32.mrf.mxu1 }
 0x128   : > { %1479 = vst [vmem:[%s2369_s20 + $0x60] sm:$0xff] %v1447_v14  ;;  %v1254_v18 = vadd.f32 %v1919_v15, %v1807_v12  ;;  %v1809_v19 = vpop.f32.mrf.mxu0 }
 0x129   : > { %v1810_v20 = vadd.f32 %v1809_v19, %v1808_v16  ;;  %v1921_v21 = vpop.f32.mrf.mxu1 }
 0x12a   : > { %v1448_v22 = vadd.f32 %v2364_v39, %v1254_v18  ;;  %v1922_v23 = vadd.f32 %v1921_v21, %v1920_v17  ;;  %v1811_v24 = vpop.f32.mrf.mxu0 }
 0x12b   : > { %v1923_v25 = vpop.f32.mrf.mxu1 }
 0x12c   : > { %1480 = vst [vmem:[%s2369_s20 + $0x68] sm:$0xff] %v1448_v22  ;;  %v1259_v26 = vadd.f32 %v1922_v23, %v1810_v20  ;;  %v1812_v27 = vpop.f32.mrf.mxu0 }
 0x12d   : > { %v1813_v28 = vadd.f32 %v1812_v27, %v1811_v24  ;;  %v1924_v29 = vpop.f32.mrf.mxu1 }
 0x12e   : > { %v1449_v30 = vadd.f32 %v2364_v39, %v1259_v26  ;;  %v1925_v31 = vadd.f32 %v1924_v29, %v1923_v25  ;;  %v1814_v32 = vpop.f32.mrf.mxu0 }
 0x12f   : > { %v1926_v33 = vpop.f32.mrf.mxu1 }
 0x130   : > { %1481 = vst [vmem:[%s2369_s20 + $0x70] sm:$0xff] %v1449_v30  ;;  %v1262_v34 = vadd.f32 %v1925_v31, %v1813_v28  ;;  %v1815_v35 = vpop.f32.mrf.mxu0 }
 0x131   : > { %v1816_v36 = vadd.f32 %v1815_v35, %v1814_v32  ;;  %v1927_v37 = vpop.f32.mrf.mxu1 }
 0x132   : > { %v1450_v38 = vadd.f32 %v2364_v39, %v1262_v34  ;;  %v1928_v40 = vadd.f32 %v1927_v37, %v1926_v33  ;;  %v1817_v41 = vpop.f32.mrf.mxu0 }
 0x133   : > { %v1929_v42 = vpop.f32.mrf.mxu1 }
 0x134   : > { %1482 = vst [vmem:[%s2369_s20 + $0x78] sm:$0xff] %v1450_v38  ;;  %v1267_v43 = vadd.f32 %v1928_v40, %v1816_v36  ;;  %v1818_v44 = vpop.f32.mrf.mxu0 }
 0x135   : > { %v1819_v45 = vadd.f32 %v1818_v44, %v1817_v41  ;;  %v1930_v46 = vpop.f32.mrf.mxu1 }
 0x136   : > { %v1451_v47 = vadd.f32 %v2364_v39, %v1267_v43  ;;  %v1931_v48 = vadd.f32 %v1930_v46, %v1929_v42  ;;  %v1820_v49 = vpop.f32.mrf.mxu0 }
 0x137   : > { %v1932_v50 = vpop.f32.mrf.mxu1 }
 0x138   : > { %1483 = vst [vmem:[%s2369_s20 + $0x80] sm:$0xff] %v1451_v47  ;;  %v1270_v51 = vadd.f32 %v1931_v48, %v1819_v45  ;;  %v1821_v52 = vpop.f32.mrf.mxu0 }
 0x139   : > { %v1822_v53 = vadd.f32 %v1821_v52, %v1820_v49  ;;  %v1933_v54 = vpop.f32.mrf.mxu1 }
 0x13a   : > { %v1452_v55 = vadd.f32 %v2364_v39, %v1270_v51  ;;  %v1934_v56 = vadd.f32 %v1933_v54, %v1932_v50  ;;  %v1823_v57 = vpop.f32.mrf.mxu0 }
 0x13b   : > { %v1935_v58 = vpop.f32.mrf.mxu1 }
 0x13c   : > { %1484 = vst [vmem:[%s2369_s20 + $0x88] sm:$0xff] %v1452_v55  ;;  %v1275_v59 = vadd.f32 %v1934_v56, %v1822_v53  ;;  %v1824_v60 = vpop.f32.mrf.mxu0 }
 0x13d   : > { %v1825_v61 = vadd.f32 %v1824_v60, %v1823_v57  ;;  %v1936_v62 = vpop.f32.mrf.mxu1 }
 0x13e   : > { %v1453_v63 = vadd.f32 %v2364_v39, %v1275_v59  ;;  %v1937_v0 = vadd.f32 %v1936_v62, %v1935_v58  ;;  %v1826_v1 = vpop.f32.mrf.mxu0 }
 0x13f   : > { %v1938_v2 = vpop.f32.mrf.mxu1 }
 0x140   : > { %1485 = vst [vmem:[%s2369_s20 + $0x90] sm:$0xff] %v1453_v63  ;;  %v1278_v3 = vadd.f32 %v1937_v0, %v1825_v61  ;;  %v1827_v4 = vpop.f32.mrf.mxu0 }
 0x141   : > { %v1828_v5 = vadd.f32 %v1827_v4, %v1826_v1  ;;  %v1939_v6 = vpop.f32.mrf.mxu1 }
 0x142   : > { %v1454_v7 = vadd.f32 %v2364_v39, %v1278_v3  ;;  %v1940_v8 = vadd.f32 %v1939_v6, %v1938_v2  ;;  %v1829_v9 = vpop.f32.mrf.mxu0 }
 0x143   : > { %v1941_v10 = vpop.f32.mrf.mxu1 }
 0x144   : > { %1486 = vst [vmem:[%s2369_s20 + $0x98] sm:$0xff] %v1454_v7  ;;  %v1283_v11 = vadd.f32 %v1940_v8, %v1828_v5  ;;  %v1830_v12 = vpop.f32.mrf.mxu0 }
 0x145   : > { %v1831_v13 = vadd.f32 %v1830_v12, %v1829_v9  ;;  %v1942_v14 = vpop.f32.mrf.mxu1 }
 0x146   : > { %v1455_v15 = vadd.f32 %v2364_v39, %v1283_v11  ;;  %v1943_v16 = vadd.f32 %v1942_v14, %v1941_v10  ;;  %v1832_v17 = vpop.f32.mrf.mxu0 }
 0x147   : > { %v1944_v18 = vpop.f32.mrf.mxu1 }
 0x148   : > { %1487 = vst [vmem:[%s2369_s20 + $0xa0] sm:$0xff] %v1455_v15  ;;  %v1286_v19 = vadd.f32 %v1943_v16, %v1831_v13  ;;  %v1833_v20 = vpop.f32.mrf.mxu0 }
 0x149   : > { %v1834_v21 = vadd.f32 %v1833_v20, %v1832_v17  ;;  %v1945_v22 = vpop.f32.mrf.mxu1 }
 0x14a   : > { %v1456_v23 = vadd.f32 %v2364_v39, %v1286_v19  ;;  %v1946_v24 = vadd.f32 %v1945_v22, %v1944_v18  ;;  %v1835_v25 = vpop.f32.mrf.mxu0 }
 0x14b   : > { %v1947_v26 = vpop.f32.mrf.mxu1 }
 0x14c   : > { %1488 = vst [vmem:[%s2369_s20 + $0xa8] sm:$0xff] %v1456_v23  ;;  %v1291_v27 = vadd.f32 %v1946_v24, %v1834_v21  ;;  %v1836_v28 = vpop.f32.mrf.mxu0 }
 0x14d   : > { %v1837_v29 = vadd.f32 %v1836_v28, %v1835_v25  ;;  %v1948_v30 = vpop.f32.mrf.mxu1 }
 0x14e   : > { %v1457_v31 = vadd.f32 %v2364_v39, %v1291_v27  ;;  %v1949_v32 = vadd.f32 %v1948_v30, %v1947_v26  ;;  %v1838_v33 = vpop.f32.mrf.mxu0 }
 0x14f   : > { %v1950_v34 = vpop.f32.mrf.mxu1 }
 0x150   : > { %1489 = vst [vmem:[%s2369_s20 + $0xb0] sm:$0xff] %v1457_v31  ;;  %v1294_v35 = vadd.f32 %v1949_v32, %v1837_v29  ;;  %v1839_v36 = vpop.f32.mrf.mxu0 }
 0x151   : > { %v1840_v37 = vadd.f32 %v1839_v36, %v1838_v33  ;;  %v1951_v38 = vpop.f32.mrf.mxu1 }
 0x152   : > { %v1458_v40 = vadd.f32 %v2364_v39, %v1294_v35  ;;  %v1952_v41 = vadd.f32 %v1951_v38, %v1950_v34  ;;  %v1841_v42 = vpop.f32.mrf.mxu0 }
 0x153   : > { %v1953_v43 = vpop.f32.mrf.mxu1 }
 0x154   : > { %1490 = vst [vmem:[%s2369_s20 + $0xb8] sm:$0xff] %v1458_v40  ;;  %v1299_v44 = vadd.f32 %v1952_v41, %v1840_v37  ;;  %v1842_v45 = vpop.f32.mrf.mxu0 }
 0x155   : > { %v1843_v46 = vadd.f32 %v1842_v45, %v1841_v42  ;;  %v1954_v47 = vpop.f32.mrf.mxu1 }
 0x156   : > { %v1459_v48 = vadd.f32 %v2364_v39, %v1299_v44  ;;  %v1955_v49 = vadd.f32 %v1954_v47, %v1953_v43  ;;  %v1844_v50 = vpop.f32.mrf.mxu0 }
 0x157   : > { %v1956_v51 = vpop.f32.mrf.mxu1 }
 0x158   : > { %1491 = vst [vmem:[%s2369_s20 + $0xc0] sm:$0xff] %v1459_v48  ;;  %v1302_v52 = vadd.f32 %v1955_v49, %v1843_v46  ;;  %v1845_v53 = vpop.f32.mrf.mxu0 }
 0x159   : > { %v1846_v54 = vadd.f32 %v1845_v53, %v1844_v50  ;;  %v1957_v55 = vpop.f32.mrf.mxu1 }
 0x15a   : > { %v1460_v56 = vadd.f32 %v2364_v39, %v1302_v52  ;;  %v1958_v57 = vadd.f32 %v1957_v55, %v1956_v51  ;;  %v1847_v58 = vpop.f32.mrf.mxu0 }
 0x15b   : > { %v1959_v59 = vpop.f32.mrf.mxu1 }
 0x15c   : > { %1492 = vst [vmem:[%s2369_s20 + $0xc8] sm:$0xff] %v1460_v56  ;;  %v1307_v60 = vadd.f32 %v1958_v57, %v1846_v54  ;;  %v1848_v61 = vpop.f32.mrf.mxu0 }
 0x15d   : > { %v1849_v62 = vadd.f32 %v1848_v61, %v1847_v58  ;;  %v1960_v63 = vpop.f32.mrf.mxu1 }
 0x15e   : > { %v1461_v0 = vadd.f32 %v2364_v39, %v1307_v60  ;;  %v1961_v1 = vadd.f32 %v1960_v63, %v1959_v59  ;;  %v1850_v2 = vpop.f32.mrf.mxu0 }
 0x15f   : > { %v1962_v3 = vpop.f32.mrf.mxu1 }
 0x160   : > { %1493 = vst [vmem:[%s2369_s20 + $0xd0] sm:$0xff] %v1461_v0  ;;  %v1310_v4 = vadd.f32 %v1961_v1, %v1849_v62  ;;  %v1851_v5 = vpop.f32.mrf.mxu0 }
 0x161   : > { %v1852_v6 = vadd.f32 %v1851_v5, %v1850_v2  ;;  %v1963_v7 = vpop.f32.mrf.mxu1 }
 0x162   : > { %v1462_v8 = vadd.f32 %v2364_v39, %v1310_v4  ;;  %v1964_v9 = vadd.f32 %v1963_v7, %v1962_v3  ;;  %v1853_v10 = vpop.f32.mrf.mxu0 }
 0x163   : > { %v1965_v11 = vpop.f32.mrf.mxu1 }
 0x164   : > { %1494 = vst [vmem:[%s2369_s20 + $0xd8] sm:$0xff] %v1462_v8  ;;  %v1315_v12 = vadd.f32 %v1964_v9, %v1852_v6  ;;  %v1854_v13 = vpop.f32.mrf.mxu0 }
 0x165   : > { %v1855_v14 = vadd.f32 %v1854_v13, %v1853_v10  ;;  %v1966_v15 = vpop.f32.mrf.mxu1 }
 0x166   : > { %v1463_v16 = vadd.f32 %v2364_v39, %v1315_v12  ;;  %v1967_v17 = vadd.f32 %v1966_v15, %v1965_v11  ;;  %v1856_v18 = vpop.f32.mrf.mxu0 }
 0x167   : > { %v1968_v19 = vpop.f32.mrf.mxu1 }
 0x168   : > { %1495 = vst [vmem:[%s2369_s20 + $0xe0] sm:$0xff] %v1463_v16  ;;  %v1318_v20 = vadd.f32 %v1967_v17, %v1855_v14  ;;  %v1857_v21 = vpop.f32.mrf.mxu0 }
 0x169   : > { %v1858_v22 = vadd.f32 %v1857_v21, %v1856_v18  ;;  %v1969_v23 = vpop.f32.mrf.mxu1 }
 0x16a   : > { %v1464_v24 = vadd.f32 %v2364_v39, %v1318_v20  ;;  %v1970_v25 = vadd.f32 %v1969_v23, %v1968_v19  ;;  %v1859_v26 = vpop.f32.mrf.mxu0 }
 0x16b   : > { %v1971_v27 = vpop.f32.mrf.mxu1 }
 0x16c   : > { %1496 = vst [vmem:[%s2369_s20 + $0xe8] sm:$0xff] %v1464_v24  ;;  %v1323_v28 = vadd.f32 %v1970_v25, %v1858_v22  ;;  %v1860_v29 = vpop.f32.mrf.mxu0 }
 0x16d   : > { %v1861_v30 = vadd.f32 %v1860_v29, %v1859_v26  ;;  %v1972_v31 = vpop.f32.mrf.mxu1 }
 0x16e   : > { %v1465_v32 = vadd.f32 %v2364_v39, %v1323_v28  ;;  %v1973_v33 = vadd.f32 %v1972_v31, %v1971_v27 }
 0x170   : > { %1497 = vst [vmem:[%s2369_s20 + $0xf0] sm:$0xff] %v1465_v32  ;;  %v1326_v34 = vadd.f32 %v1973_v33, %v1861_v30 }
 0x172   : > { %v1466_v35 = vadd.f32 %v2364_v39, %v1326_v34 }
 0x174   : > { %1498 = vst [vmem:[%s2369_s20 + $0xf8] sm:$0xff] %v1466_v35 }
 0x175 PF: > { %s13_s14 = sadd.s32 1, %s2148_s14   ;;  %s2448_s12 = smov %s2144_s13 }
 0x176   : > { %p10_p5 = scmp.ge.s32.totalorder %s13_s14, 4   ;;  %s2449_s13 = smov %s2451_s15 }
 0x178   :  { %12 = sbr.rel (!%p10_p5) target bundleno = 2 (0x2), region = 76 }

// kernel: discriminator_forward.19
= control target key start
LH: loop header
LB: loop body
LE: loop exit
PB: predicated region body
PF: predicated region fallthrough
CT: control target
= control target key end

     0   :  { %s584_s6 = smov 0   ;;  %s586_s7 = smov 0   ;;  %s621_s0 = inlined_call_operand.vmem [shape: f32[2,256,128], index: 0, kind: input, shape index: {}]   ;;  %s622_s1 = inlined_call_operand.vmem [shape: f32[2,2,128], index: 1, kind: output, shape index: {}]  }
   0x1   :  { %s588_s8 = smov 0  }
   0x2 LB: > { %s23_s9 = sadd.s32 1, %s567_s7  ;;  %p515_p0 = scmp.ge.s32.totalorder %s571_s8, 1  ;;  %s571_s8 = sphi %s588_s8, %s11_s8   ;;  %s567_s7 = sphi %s586_s7, %s624_s7   ;;  %s563_s6 = sphi %s584_s6, %s623_s6  }
   0x3   : > { %p25_p1 = scmp.ge.s32.totalorder %s23_s9, 2  ;;  %p106_p2 = scmp.lt.s32.totalorder %s571_s8, 3 }
   0x5   : > { %s626_s9 = smov (%p25_p1, %s23_s9), 0  ;;  %p107_p3 = pnand %p515_p0, %p106_p2 }
   0x6   : > { %p130_p4 = scmp.lt.s32.totalorder (!%p107_p3), %s563_s6, 1 }
   0x7   : > { %110 = sbr.rel (%p107_p3) target bundleno = 70 (0x46), region = 24 }
   0xc   : > { %v182_v0 = vlaneseq  ;;  %v573_v1 = vmov 0.0   ;;  %s628_s6 = smov (!%p130_p4, %s563_s6), 1  ;;  %vm441_vm1 = vcmask 1040384  }
   0xd   : > { %147 = vst [vmem:[#allocation2] sm:$0x1] %v573_v1  ;;  %148 = vst [vmem:[#allocation3] sm:$0x1] %v573_v1  ;;  %s521_s10 = sshll.u32 %s628_s6, 8  ;;  %s518_s14 = sshll.u32 %s628_s6, 1 }
   0xe   : > { %v183_v2 = vshrl.u32 %v182_v0, 7  ;;  %s137_s13 = scalar_lea.vmem %s621_s0, %s521_s10  ;;  %s142_s17 = scalar_lea.vmem %s622_s1, %s518_s14 }
   0xf   : > { %v149_v4 = vld [vmem:[%s137_s13] sm:$0xff]  ;;  %v150_v5 = vld [vmem:[%s137_s13 + $0x8] sm:$0xff] }
  0x10   : > { %v184_v3 = vadd.s32 8, %v183_v2  ;;  %v353_v7 = vmul.f32 %v149_v4, %v149_v4  ;;  %v438_v34 = vsub.s32 0, %v183_v2 }
  0x12   : > { %vm249_vm0 = vcmp.lt.s32.totalorder %v184_v3, 9 }
  0x13   : > { %v281_v6 = vsel %vm249_vm0, %v150_v5, 0.0 }
  0x14   : > { %v313_v8 = vadd.f32 %v281_v6, %v149_v4  ;;  %v354_v9 = vmul.f32 %v281_v6, %v281_v6  ;;  %v312_v20 = vld [vmem:[#allocation2] sm:$0x1]  ;;  %v352_v23 = vld [vmem:[#allocation3] sm:$0x1] }
  0x16   : > { %v344_v10 = vrot.slane %v313_v8, 4  ;;  %v385_v11 = vadd.f32 %v354_v9, %v353_v7 }
  0x18   : > { %v345_v12 = vadd.f32 %v344_v10, %v313_v8  ;;  %v416_v13 = vrot.slane %v385_v11, 4 }
  0x1a   : > { %v346_v14 = vrot.slane %v345_v12, 2  ;;  %v417_v15 = vadd.f32 %v416_v13, %v385_v11 }
  0x1c   : > { %v347_v16 = vadd.f32 %v346_v14, %v345_v12  ;;  %v418_v17 = vrot.slane %v417_v15, 2 }
  0x1e   : > { %v348_v18 = vrot.slane %v347_v16, 1  ;;  %v419_v19 = vadd.f32 %v418_v17, %v417_v15 }
  0x20   : > { %v349_v21 = vadd.f32 %v348_v18, %v347_v16  ;;  %v420_v22 = vrot.slane %v419_v19, 1 }
  0x22   : > { %v350_v24 = vadd.f32 %v349_v21, %v312_v20  ;;  %v421_v25 = vadd.f32 %v420_v22, %v419_v19 }
  0x24   : > { %351 = vst [vmem:[#allocation2] sm:$0x1] %v350_v24  ;;  %v422_v26 = vadd.f32 %v421_v25, %v352_v23 }
  0x26   : > { %423 = vst [vmem:[#allocation3] sm:$0x1] %v422_v26 }
  0x2b   : > { %v427_v27 = vld [vmem:[#allocation2] sm:$0x1] }
  0x2c   : > { %v428_v28 = vmul.f32 0.11111111, %v427_v27 }
  0x2d   : > { %v429_v29 = vld [vmem:[#allocation3] sm:$0x1] }
  0x2e   : > { %v430_v30 = vmul.f32 0.11111111, %v429_v29  ;;  %v431_v31 = vmul.f32 %v428_v28, %v428_v28 }
  0x30   : > { %v432_v32 = vsub.f32 %v430_v30, %v431_v31 }
  0x32   : > { %v433_v33 = vadd.f32 1e-05, %v432_v32 }
  0x34   : > { %547 = vrsqrt.f32 %v433_v33 }
  0x41   : > { %v548_v35 = vpop.eup %547 }
  0x42   : > { %v439_v36 = vrot.slane %v548_v35, %v438_v34 }
  0x44   : > { %v442_v37 = vsel %vm441_vm1, %v428_v28, %v439_v36 }
  0x45   : > { %443 = vst [vmem:[%s142_s17] sm:$0x3] %v442_v37 }
  0x46 PF: > { %s11_s8 = sadd.s32 1, %s571_s8   ;;  %s623_s6 = smov %s567_s7 }
  0x47   : > { %p8_p5 = scmp.ge.s32.totalorder %s11_s8, 4   ;;  %s624_s7 = smov %s626_s9 }
  0x49   :  { %10 = sbr.rel (!%p8_p5) target bundleno = 2 (0x2), region = 62 }

// kernel: discriminator_forward.18
= control target key start
LH: loop header
LB: loop body
LE: loop exit
PB: predicated region body
PF: predicated region fallthrough
CT: control target
= control target key end

     0   :  { %s2363_s12 = smov 0   ;;  %s2365_s13 = smov 0   ;;  %s2761_s0 = inlined_call_operand.vmem [shape: bf16[2,256,1024], index: 0, kind: input, shape index: {}]   ;;  %s2762_s1 = inlined_call_operand.vmem [shape: bf16[1024,128], index: 1, kind: input, shape index: {}]   ;;  %s2763_s2 = inlined_call_operand.vmem [shape: f32[1,128], index: 2, kind: input, shape index: {}]   ;;  %s2764_s3 = inlined_call_operand.vmem [shape: f32[2,256,128], index: 3, kind: output, shape index: {}]  }
   0x1   :  { %s2367_s14 = smov 0   ;;  %s2369_s15 = smov 0  }
   0x2   :  { %s2371_s16 = smov 0   ;;  %s2373_s17 = smov 0  }
   0x3   :  { %s2375_s18 = smov 0  }
   0x4 LB: > { %s28_s19 = sadd.s32 1, %s2332_s16  ;;  %s39_s20 = sadd.s32 1, %s2336_s17  ;;  %s2340_s18 = sphi %s2375_s18, %s13_s18   ;;  %s2336_s17 = sphi %s2373_s17, %s2770_s17   ;;  %s2332_s16 = sphi %s2371_s16, %s2769_s16   ;;  %s2328_s15 = sphi %s2369_s15, %s2768_s15   ;;  %s2324_s14 = sphi %s2367_s14, %s2767_s14   ;;  %s2320_s13 = sphi %s2365_s13, %s2766_s13   ;;  %s2316_s12 = sphi %s2363_s12, %s2765_s12  }
   0x5   : > { %p29_p0 = scmp.ge.s32.totalorder %s28_s19, 2  ;;  %p57_p1 = scmp.ne.s32.totalorder %s2320_s13, %s2316_s12 }
   0x6   : > { %p58_p2 = scmp.eq.s32.totalorder %s2340_s18, 0  ;;  %s50_s24 = sadd.s32 1, %s2320_s13 }
   0x7   : > { %s2772_s19 = smov (%p29_p0, %s28_s19), 0  ;;  %s2774_s20 = smov (!%p29_p0, %s39_s20), %s2336_s17 }
   0x8   : > { %p59_p3 = por %p58_p2, %p57_p1  ;;  %p41_p4 = scmp.ge.s32.totalorder %s2774_s20, 2 }
   0x9   : > { %s46_s21 = ssub.s32 %s2332_s16, %s2772_s19  ;;  %p1764_p6 = scmp.ge.s32.totalorder %s2340_s18, 4 }
   0xa   : > { %s2776_s20 = smov (%p41_p4, %s2774_s20), 0 }
   0xb   : > { %s43_s22 = ssub.s32 %s2336_s17, %s2776_s20  ;;  %173 = sbr.rel (%p1764_p6) target bundleno = 55 (0x37), region = 20 }
   0xc   : > { %s47_s23 = sor.u32 %s46_s21, %s43_s22 }
   0xd   : > { %p48_p5 = scmp.eq.s32.totalorder %s47_s23, 0 }
   0xf   : > { %s2414_s25 = scalar_select %p48_p5, %s2320_s13, %s50_s24  }
  0x10   : > { %176 = sbr.rel (!%p59_p3) target bundleno = 55 (0x37), region = 24  ;;  %s178_s26 = sand.u32 (%p59_p3), 1, %s2320_s13  }
  0x11   : > { %s1766_s27 = sshll.u32 (%p59_p3), %s2332_s16, 2  ;;  %s1765_s28 = sshll.u32 (%p59_p3), %s178_s26, 9 }
  0x12   : > { %s1767_s29 = sshll.u32 (%p59_p3), %s2336_s17, 8  ;;  %s2428_s8 = scalar_lea.vmem (%p59_p3), [#allocation3], %s1765_s28 }
  0x13   : > { %s186_s30 = sadd.s32 (%p59_p3), %s1767_s29, %s1766_s27 }
  0x14   : > { %s1768_s4 = sshll.u32 (%p59_p3), %s186_s30, 2 }
  0x15   : > { %s2423_s7 = scalar_lea.vmem %s2761_s0, %s1768_s4 }
  0x16   : > { %v201_v0 = vld [vmem:[%s2423_s7] sm:$0xff]  ;;  %v203_v1 = vld [vmem:[%s2423_s7 + $0x8] sm:$0xff] }
  0x17   : > { %v205_v2 = vld [vmem:[%s2423_s7 + $0x20] sm:$0xff]  ;;  %202 = vst [vmem:[%s2428_s8] sm:$0xff] %v201_v0  ;;  %204 = vst [vmem:[%s2428_s8 + $0x8] sm:$0xff] %v203_v1  ;;  %v207_v3 = vld [vmem:[%s2423_s7 + $0x28] sm:$0xff] }
  0x18   : > { %206 = vst [vmem:[%s2428_s8 + $0x10] sm:$0xff] %v205_v2  ;;  %v209_v4 = vld [vmem:[%s2423_s7 + $0x40] sm:$0xff]  ;;  %v211_v5 = vld [vmem:[%s2423_s7 + $0x48] sm:$0xff]  ;;  %208 = vst [vmem:[%s2428_s8 + $0x18] sm:$0xff] %v207_v3 }
  0x19   : > { %210 = vst [vmem:[%s2428_s8 + $0x20] sm:$0xff] %v209_v4  ;;  %212 = vst [vmem:[%s2428_s8 + $0x28] sm:$0xff] %v211_v5  ;;  %v213_v6 = vld [vmem:[%s2423_s7 + $0x60] sm:$0xff]  ;;  %v215_v7 = vld [vmem:[%s2423_s7 + $0x68] sm:$0xff] }
  0x1a   : > { %v217_v8 = vld [vmem:[%s2423_s7 + $0x80] sm:$0xff]  ;;  %214 = vst [vmem:[%s2428_s8 + $0x30] sm:$0xff] %v213_v6  ;;  %216 = vst [vmem:[%s2428_s8 + $0x38] sm:$0xff] %v215_v7  ;;  %v219_v9 = vld [vmem:[%s2423_s7 + $0x88] sm:$0xff] }
  0x1b   : > { %218 = vst [vmem:[%s2428_s8 + $0x40] sm:$0xff] %v217_v8  ;;  %v221_v10 = vld [vmem:[%s2423_s7 + $0xa0] sm:$0xff]  ;;  %v223_v11 = vld [vmem:[%s2423_s7 + $0xa8] sm:$0xff]  ;;  %220 = vst [vmem:[%s2428_s8 + $0x48] sm:$0xff] %v219_v9 }
  0x1c   : > { %222 = vst [vmem:[%s2428_s8 + $0x50] sm:$0xff] %v221_v10  ;;  %224 = vst [vmem:[%s2428_s8 + $0x58] sm:$0xff] %v223_v11  ;;  %v225_v12 = vld [vmem:[%s2423_s7 + $0xc0] sm:$0xff]  ;;  %v227_v13 = vld [vmem:[%s2423_s7 + $0xc8] sm:$0xff] }
  0x1d   : > { %v229_v14 = vld [vmem:[%s2423_s7 + $0xe0] sm:$0xff]  ;;  %226 = vst [vmem:[%s2428_s8 + $0x60] sm:$0xff] %v225_v12  ;;  %228 = vst [vmem:[%s2428_s8 + $0x68] sm:$0xff] %v227_v13  ;;  %v231_v15 = vld [vmem:[%s2423_s7 + $0xe8] sm:$0xff] }
  0x1e   : > { %230 = vst [vmem:[%s2428_s8 + $0x70] sm:$0xff] %v229_v14  ;;  %v233_v16 = vld [vmem:[%s2423_s7 + $0x100] sm:$0xff]  ;;  %v235_v17 = vld [vmem:[%s2423_s7 + $0x108] sm:$0xff]  ;;  %232 = vst [vmem:[%s2428_s8 + $0x78] sm:$0xff] %v231_v15 }
  0x1f   : > { %234 = vst [vmem:[%s2428_s8 + $0x80] sm:$0xff] %v233_v16  ;;  %236 = vst [vmem:[%s2428_s8 + $0x88] sm:$0xff] %v235_v17  ;;  %v237_v18 = vld [vmem:[%s2423_s7 + $0x120] sm:$0xff]  ;;  %v239_v19 = vld [vmem:[%s2423_s7 + $0x128] sm:$0xff] }
  0x20   : > { %v241_v20 = vld [vmem:[%s2423_s7 + $0x140] sm:$0xff]  ;;  %238 = vst [vmem:[%s2428_s8 + $0x90] sm:$0xff] %v237_v18  ;;  %240 = vst [vmem:[%s2428_s8 + $0x98] sm:$0xff] %v239_v19  ;;  %v243_v21 = vld [vmem:[%s2423_s7 + $0x148] sm:$0xff] }
  0x21   : > { %242 = vst [vmem:[%s2428_s8 + $0xa0] sm:$0xff] %v241_v20  ;;  %v245_v22 = vld [vmem:[%s2423_s7 + $0x160] sm:$0xff]  ;;  %v247_v23 = vld [vmem:[%s2423_s7 + $0x168] sm:$0xff]  ;;  %244 = vst [vmem:[%s2428_s8 + $0xa8] sm:$0xff] %v243_v21 }
  0x22   : > { %246 = vst [vmem:[%s2428_s8 + $0xb0] sm:$0xff] %v245_v22  ;;  %248 = vst [vmem:[%s2428_s8 + $0xb8] sm:$0xff] %v247_v23  ;;  %v249_v24 = vld [vmem:[%s2423_s7 + $0x180] sm:$0xff]  ;;  %v251_v25 = vld [vmem:[%s2423_s7 + $0x188] sm:$0xff] }
  0x23   : > { %v253_v26 = vld [vmem:[%s2423_s7 + $0x1a0] sm:$0xff]  ;;  %250 = vst [vmem:[%s2428_s8 + $0xc0] sm:$0xff] %v249_v24  ;;  %252 = vst [vmem:[%s2428_s8 + $0xc8] sm:$0xff] %v251_v25  ;;  %v255_v27 = vld [vmem:[%s2423_s7 + $0x1a8] sm:$0xff] }
  0x24   : > { %254 = vst [vmem:[%s2428_s8 + $0xd0] sm:$0xff] %v253_v26  ;;  %v257_v28 = vld [vmem:[%s2423_s7 + $0x1c0] sm:$0xff]  ;;  %v259_v29 = vld [vmem:[%s2423_s7 + $0x1c8] sm:$0xff]  ;;  %256 = vst [vmem:[%s2428_s8 + $0xd8] sm:$0xff] %v255_v27 }
  0x25   : > { %258 = vst [vmem:[%s2428_s8 + $0xe0] sm:$0xff] %v257_v28  ;;  %260 = vst [vmem:[%s2428_s8 + $0xe8] sm:$0xff] %v259_v29  ;;  %v261_v30 = vld [vmem:[%s2423_s7 + $0x1e0] sm:$0xff]  ;;  %v263_v31 = vld [vmem:[%s2423_s7 + $0x1e8] sm:$0xff] }
  0x26   : > { %v265_v32 = vld [vmem:[%s2423_s7 + $0x200] sm:$0xff]  ;;  %262 = vst [vmem:[%s2428_s8 + $0xf0] sm:$0xff] %v261_v30  ;;  %264 = vst [vmem:[%s2428_s8 + $0xf8] sm:$0xff] %v263_v31  ;;  %v267_v33 = vld [vmem:[%s2423_s7 + $0x208] sm:$0xff] }
  0x27   : > { %266 = vst [vmem:[%s2428_s8 + $0x100] sm:$0xff] %v265_v32  ;;  %v269_v34 = vld [vmem:[%s2423_s7 + $0x220] sm:$0xff]  ;;  %v271_v35 = vld [vmem:[%s2423_s7 + $0x228] sm:$0xff]  ;;  %268 = vst [vmem:[%s2428_s8 + $0x108] sm:$0xff] %v267_v33 }
  0x28   : > { %270 = vst [vmem:[%s2428_s8 + $0x110] sm:$0xff] %v269_v34  ;;  %272 = vst [vmem:[%s2428_s8 + $0x118] sm:$0xff] %v271_v35  ;;  %v273_v36 = vld [vmem:[%s2423_s7 + $0x240] sm:$0xff]  ;;  %v275_v37 = vld [vmem:[%s2423_s7 + $0x248] sm:$0xff] }
  0x29   : > { %v277_v38 = vld [vmem:[%s2423_s7 + $0x260] sm:$0xff]  ;;  %274 = vst [vmem:[%s2428_s8 + $0x120] sm:$0xff] %v273_v36  ;;  %276 = vst [vmem:[%s2428_s8 + $0x128] sm:$0xff] %v275_v37  ;;  %v279_v39 = vld [vmem:[%s2423_s7 + $0x268] sm:$0xff] }
  0x2a   : > { %278 = vst [vmem:[%s2428_s8 + $0x130] sm:$0xff] %v277_v38  ;;  %v281_v40 = vld [vmem:[%s2423_s7 + $0x280] sm:$0xff]  ;;  %v283_v41 = vld [vmem:[%s2423_s7 + $0x288] sm:$0xff]  ;;  %280 = vst [vmem:[%s2428_s8 + $0x138] sm:$0xff] %v279_v39 }
  0x2b   : > { %282 = vst [vmem:[%s2428_s8 + $0x140] sm:$0xff] %v281_v40  ;;  %284 = vst [vmem:[%s2428_s8 + $0x148] sm:$0xff] %v283_v41  ;;  %v285_v42 = vld [vmem:[%s2423_s7 + $0x2a0] sm:$0xff]  ;;  %v287_v43 = vld [vmem:[%s2423_s7 + $0x2a8] sm:$0xff] }
  0x2c   : > { %v289_v44 = vld [vmem:[%s2423_s7 + $0x2c0] sm:$0xff]  ;;  %286 = vst [vmem:[%s2428_s8 + $0x150] sm:$0xff] %v285_v42  ;;  %288 = vst [vmem:[%s2428_s8 + $0x158] sm:$0xff] %v287_v43  ;;  %v291_v45 = vld [vmem:[%s2423_s7 + $0x2c8] sm:$0xff] }
  0x2d   : > { %290 = vst [vmem:[%s2428_s8 + $0x160] sm:$0xff] %v289_v44  ;;  %v293_v46 = vld [vmem:[%s2423_s7 + $0x2e0] sm:$0xff]  ;;  %v295_v47 = vld [vmem:[%s2423_s7 + $0x2e8] sm:$0xff]  ;;  %292 = vst [vmem:[%s2428_s8 + $0x168] sm:$0xff] %v291_v45 }
  0x2e   : > { %294 = vst [vmem:[%s2428_s8 + $0x170] sm:$0xff] %v293_v46  ;;  %296 = vst [vmem:[%s2428_s8 + $0x178] sm:$0xff] %v295_v47  ;;  %v297_v48 = vld [vmem:[%s2423_s7 + $0x300] sm:$0xff]  ;;  %v299_v49 = vld [vmem:[%s2423_s7 + $0x308] sm:$0xff] }
  0x2f   : > { %v301_v50 = vld [vmem:[%s2423_s7 + $0x320] sm:$0xff]  ;;  %298 = vst [vmem:[%s2428_s8 + $0x180] sm:$0xff] %v297_v48  ;;  %300 = vst [vmem:[%s2428_s8 + $0x188] sm:$0xff] %v299_v49  ;;  %v303_v51 = vld [vmem:[%s2423_s7 + $0x328] sm:$0xff] }
  0x30   : > { %302 = vst [vmem:[%s2428_s8 + $0x190] sm:$0xff] %v301_v50  ;;  %v305_v52 = vld [vmem:[%s2423_s7 + $0x340] sm:$0xff]  ;;  %v307_v53 = vld [vmem:[%s2423_s7 + $0x348] sm:$0xff]  ;;  %304 = vst [vmem:[%s2428_s8 + $0x198] sm:$0xff] %v303_v51 }
  0x31   : > { %306 = vst [vmem:[%s2428_s8 + $0x1a0] sm:$0xff] %v305_v52  ;;  %308 = vst [vmem:[%s2428_s8 + $0x1a8] sm:$0xff] %v307_v53  ;;  %v309_v54 = vld [vmem:[%s2423_s7 + $0x360] sm:$0xff]  ;;  %v311_v55 = vld [vmem:[%s2423_s7 + $0x368] sm:$0xff] }
  0x32   : > { %v313_v56 = vld [vmem:[%s2423_s7 + $0x380] sm:$0xff]  ;;  %310 = vst [vmem:[%s2428_s8 + $0x1b0] sm:$0xff] %v309_v54  ;;  %312 = vst [vmem:[%s2428_s8 + $0x1b8] sm:$0xff] %v311_v55  ;;  %v315_v57 = vld [vmem:[%s2423_s7 + $0x388] sm:$0xff] }
  0x33   : > { %314 = vst [vmem:[%s2428_s8 + $0x1c0] sm:$0xff] %v313_v56  ;;  %v317_v58 = vld [vmem:[%s2423_s7 + $0x3a0] sm:$0xff]  ;;  %v319_v59 = vld [vmem:[%s2423_s7 + $0x3a8] sm:$0xff]  ;;  %316 = vst [vmem:[%s2428_s8 + $0x1c8] sm:$0xff] %v315_v57 }
  0x34   : > { %318 = vst [vmem:[%s2428_s8 + $0x1d0] sm:$0xff] %v317_v58  ;;  %320 = vst [vmem:[%s2428_s8 + $0x1d8] sm:$0xff] %v319_v59  ;;  %v321_v60 = vld [vmem:[%s2423_s7 + $0x3c0] sm:$0xff]  ;;  %v323_v61 = vld [vmem:[%s2423_s7 + $0x3c8] sm:$0xff] }
  0x35   : > { %v325_v62 = vld [vmem:[%s2423_s7 + $0x3e0] sm:$0xff]  ;;  %322 = vst [vmem:[%s2428_s8 + $0x1e0] sm:$0xff] %v321_v60  ;;  %324 = vst [vmem:[%s2428_s8 + $0x1e8] sm:$0xff] %v323_v61  ;;  %v327_v63 = vld [vmem:[%s2423_s7 + $0x3e8] sm:$0xff] }
  0x36   : > { %326 = vst [vmem:[%s2428_s8 + $0x1f0] sm:$0xff] %v325_v62  ;;  %328 = vst [vmem:[%s2428_s8 + $0x1f8] sm:$0xff] %v327_v63 }
  0x37 PF: > { %p1769_p7 = scmp.ge.s32.totalorder %s2340_s18, 1  ;;  %p345_p8 = scmp.lt.s32.totalorder %s2340_s18, 5 }
  0x39   : > { %p346_p9 = pnand %p1769_p7, %p345_p8 }
  0x3a   : > { %s352_s9 = sand.u32 (!%p346_p9), 1, %s2316_s12   ;;  %s1771_s10 = sshll.u32 (!%p346_p9), %s2324_s14, 6 }
  0x3b   : > { %349 = sbr.rel (%p346_p9) target bundleno = 469 (0x1d5), region = 51  ;;  %s1770_s11 = sshll.u32 (!%p346_p9), %s352_s9, 9 }
  0x3c   : > { %p396_p10 = scmp.lt.s32.totalorder (!%p346_p9), %s1771_s10, 127  ;;  %p408_p11 = scmp.lt.s32.totalorder (!%p346_p9), %s2328_s15, 1 }
  0x3d   : > { %s2571_s30 = scalar_lea.vmem (!%p346_p9), [#allocation3], %s1770_s11  ;;  %p1775_p12 = scmp.ne.s32.totalorder (!%p346_p9), %s2324_s14, 0 }
  0x40   : > { %s2778_s10 = smov (!%p396_p10, %s1771_s10), 127  ;;  %s2780_s15 = smov (!%p408_p11, %s2328_s15), 1 }
  0x41   : > { %s1772_s21 = sshll.u32 %s2778_s10, 2  ;;  %s1876_s26 = sshll.u32 %s2780_s15, 8 }
  0x42   : > { %s2564_s24 = scalar_lea.vmem %s2762_s1, %s1772_s21  ;;  %s2569_s29 = scalar_lea.vmem %s2764_s3, %s1876_s26 }
  0x43   : > { %424 = sbr.rel (%p1775_p12) target bundleno = 89 (0x59), region = 59 }
  0x48   : > { %v2342_v0 = vmov 0.0  }
  0x49   : > { %425 = vst [vmem:[#allocation2 + $0xb0] sm:$0xff] %v2342_v0  ;;  %426 = vst [vmem:[#allocation2] sm:$0xff] %v2342_v0 }
  0x4a   : > { %427 = vst [vmem:[#allocation2 + $0xd8] sm:$0xff] %v2342_v0  ;;  %428 = vst [vmem:[#allocation2 + $0x18] sm:$0xff] %v2342_v0 }
  0x4b   : > { %429 = vst [vmem:[#allocation2 + $0x50] sm:$0xff] %v2342_v0  ;;  %430 = vst [vmem:[#allocation2 + $0x68] sm:$0xff] %v2342_v0 }
  0x4c   : > { %431 = vst [vmem:[#allocation2 + $0x30] sm:$0xff] %v2342_v0  ;;  %432 = vst [vmem:[#allocation2 + $0x48] sm:$0xff] %v2342_v0 }
  0x4d   : > { %433 = vst [vmem:[#allocation2 + $0x80] sm:$0xff] %v2342_v0  ;;  %434 = vst [vmem:[#allocation2 + $0x88] sm:$0xff] %v2342_v0 }
  0x4e   : > { %435 = vst [vmem:[#allocation2 + $0xe8] sm:$0xff] %v2342_v0  ;;  %436 = vst [vmem:[#allocation2 + $0xb8] sm:$0xff] %v2342_v0 }
  0x4f   : > { %437 = vst [vmem:[#allocation2 + $0x60] sm:$0xff] %v2342_v0  ;;  %438 = vst [vmem:[#allocation2 + $0xf0] sm:$0xff] %v2342_v0 }
  0x50   : > { %439 = vst [vmem:[#allocation2 + $0x8] sm:$0xff] %v2342_v0  ;;  %440 = vst [vmem:[#allocation2 + $0x78] sm:$0xff] %v2342_v0 }
  0x51   : > { %441 = vst [vmem:[#allocation2 + $0x38] sm:$0xff] %v2342_v0  ;;  %442 = vst [vmem:[#allocation2 + $0x58] sm:$0xff] %v2342_v0 }
  0x52   : > { %443 = vst [vmem:[#allocation2 + $0x40] sm:$0xff] %v2342_v0  ;;  %444 = vst [vmem:[#allocation2 + $0xc8] sm:$0xff] %v2342_v0 }
  0x53   : > { %445 = vst [vmem:[#allocation2 + $0xe0] sm:$0xff] %v2342_v0  ;;  %446 = vst [vmem:[#allocation2 + $0x90] sm:$0xff] %v2342_v0 }
  0x54   : > { %447 = vst [vmem:[#allocation2 + $0x70] sm:$0xff] %v2342_v0  ;;  %448 = vst [vmem:[#allocation2 + $0xc0] sm:$0xff] %v2342_v0 }
  0x55   : > { %449 = vst [vmem:[#allocation2 + $0xa8] sm:$0xff] %v2342_v0  ;;  %450 = vst [vmem:[#allocation2 + $0xd0] sm:$0xff] %v2342_v0 }
  0x56   : > { %451 = vst [vmem:[#allocation2 + $0x10] sm:$0xff] %v2342_v0  ;;  %452 = vst [vmem:[#allocation2 + $0x28] sm:$0xff] %v2342_v0 }
  0x57   : > { %453 = vst [vmem:[#allocation2 + $0xa0] sm:$0xff] %v2342_v0  ;;  %454 = vst [vmem:[#allocation2 + $0xf8] sm:$0xff] %v2342_v0 }
  0x58   : > { %455 = vst [vmem:[#allocation2 + $0x20] sm:$0xff] %v2342_v0  ;;  %456 = vst [vmem:[#allocation2 + $0x98] sm:$0xff] %v2342_v0 }
  0x59 PF: > { %v2158_v1 = vld [vmem:[%s2564_s24 + $0x78] sm:$0xff]   ;;  %v2162_v5 = vld [vmem:[%s2564_s24 + $0x70] sm:$0xff]   ;;  %v2166_v9 = vld [vmem:[%s2564_s24 + $0x68] sm:$0xff]   ;;  %p1872_p13 = scmp.ne.s32.totalorder %s2324_s14, 1 }
  0x5a   : > { %v2159_v2 = vld [vmem:[%s2564_s24 + $0xf8] sm:$0xff]   ;;  %1877 = vmatprep.subr.bf16.mxu0 %v2158_v1  ;;  %v2163_v6 = vld [vmem:[%s2564_s24 + $0xf0] sm:$0xff]   ;;  %v2167_v10 = vld [vmem:[%s2564_s24 + $0xe8] sm:$0xff]  }
  0x5b   : > { %v2160_v3 = vld [vmem:[%s2564_s24 + $0x38] sm:$0xff]   ;;  %1989 = vmatprep.subr.bf16.mxu1 %v2159_v2  ;;  %v2164_v7 = vld [vmem:[%s2564_s24 + $0x30] sm:$0xff]   ;;  %v2168_v11 = vld [vmem:[%s2564_s24 + $0x28] sm:$0xff]  }
  0x5c   : > { %v2161_v4 = vld [vmem:[%s2564_s24 + $0xb8] sm:$0xff]   ;;  %1878 = vmatpush3.bf16.msra.mxu0 %v2160_v3  ;;  %v2165_v8 = vld [vmem:[%s2564_s24 + $0xb0] sm:$0xff]   ;;  %v2169_v12 = vld [vmem:[%s2564_s24 + $0xa8] sm:$0xff]  }
  0x5d   : > { %1990 = vmatpush3.bf16.msra.mxu1 %v2161_v4  ;;  %1879 = vmatprep.subr.bf16.mxu0 %v2162_v5  ;;  %v2170_v13 = vld [vmem:[%s2564_s24 + $0x60] sm:$0xff]   ;;  %v2174_v17 = vld [vmem:[%s2564_s24 + $0x58] sm:$0xff]   ;;  %v2178_v21 = vld [vmem:[%s2564_s24 + $0x50] sm:$0xff]  }
  0x5e   : > { %1991 = vmatprep.subr.bf16.mxu1 %v2163_v6  ;;  %v2171_v14 = vld [vmem:[%s2564_s24 + $0xe0] sm:$0xff]   ;;  %v2175_v18 = vld [vmem:[%s2564_s24 + $0xd8] sm:$0xff]   ;;  %v2179_v22 = vld [vmem:[%s2564_s24 + $0xd0] sm:$0xff]  }
  0x5f   : > { %v2172_v15 = vld [vmem:[%s2564_s24 + $0x20] sm:$0xff]   ;;  %v2176_v19 = vld [vmem:[%s2564_s24 + $0x18] sm:$0xff]   ;;  %v2180_v23 = vld [vmem:[%s2564_s24 + $0x10] sm:$0xff]  }
  0x60   : > { %1880 = vmatpush3.bf16.msra.mxu0 %v2164_v7  ;;  %v2173_v16 = vld [vmem:[%s2564_s24 + $0xa0] sm:$0xff]   ;;  %v2177_v20 = vld [vmem:[%s2564_s24 + $0x98] sm:$0xff]   ;;  %v2181_v24 = vld [vmem:[%s2564_s24 + $0x90] sm:$0xff]  }
  0x61   : > { %1992 = vmatpush3.bf16.msra.mxu1 %v2165_v8  ;;  %1881 = vmatprep.subr.bf16.mxu0 %v2166_v9  ;;  %v2182_v25 = vld [vmem:[%s2564_s24 + $0x48] sm:$0xff]   ;;  %v2186_v29 = vld [vmem:[%s2564_s24 + $0x40] sm:$0xff]  }
  0x62   : > { %1993 = vmatprep.subr.bf16.mxu1 %v2167_v10  ;;  %v2183_v26 = vld [vmem:[%s2564_s24 + $0xc8] sm:$0xff]   ;;  %v2187_v30 = vld [vmem:[%s2564_s24 + $0xc0] sm:$0xff]  }
  0x63   : > { %v2184_v27 = vld [vmem:[%s2564_s24 + $0x8] sm:$0xff]   ;;  %v2188_v31 = vld [vmem:[%s2564_s24] sm:$0xff]  }
  0x64   : > { %1882 = vmatpush3.bf16.msra.mxu0 %v2168_v11  ;;  %v2185_v28 = vld [vmem:[%s2564_s24 + $0x88] sm:$0xff]   ;;  %v2189_v32 = vld [vmem:[%s2564_s24 + $0x80] sm:$0xff]  }
  0x65   : > { %1994 = vmatpush3.bf16.msra.mxu1 %v2169_v12  ;;  %1883 = vmatprep.subr.bf16.mxu0 %v2170_v13  ;;  %v2190_v33 = vld [vmem:[%s2571_s30] ss:$16 sps:$4 sm:$0xff]   ;;  %v2192_v34 = vld [vmem:[%s2571_s30 + $0x4] ss:$16 sps:$4 sm:$0xff]   ;;  %v2193_v35 = vld [vmem:[%s2571_s30 + $0x8] ss:$16 sps:$4 sm:$0xff]  }
  0x66   : > { %1995 = vmatprep.subr.bf16.mxu1 %v2171_v14  ;;  %v2195_v36 = vld [vmem:[%s2571_s30 + $0xc] ss:$16 sps:$4 sm:$0xff]   ;;  %1161 = vmatprep.mubr.bf16.mxu0 %v2192_v34  ;;  %v2196_v37 = vld [vmem:[%s2571_s30 + $0x24] ss:$16 sps:$4 sm:$0xff]   ;;  %v2200_v39 = vld [vmem:[%s2571_s30 + $0x20] ss:$16 sps:$4 sm:$0xff]  }
  0x67   : > { %1322 = vmatprep.mubr.bf16.mxu1 %v2195_v36  ;;  %v2198_v38 = vld [vmem:[%s2571_s30 + $0x2c] ss:$16 sps:$4 sm:$0xff]   ;;  %v2201_v40 = vld [vmem:[%s2571_s30 + $0x28] ss:$16 sps:$4 sm:$0xff]   ;;  %v2202_v41 = vld [vmem:[%s2571_s30 + $0x44] ss:$16 sps:$4 sm:$0xff]  }
  0x68   : > { %1884 = vmatpush3.bf16.msra.mxu0 %v2172_v15  ;;  %v2204_v42 = vld [vmem:[%s2571_s30 + $0x4c] ss:$16 sps:$4 sm:$0xff]   ;;  %v2206_v43 = vld [vmem:[%s2571_s30 + $0x40] ss:$16 sps:$4 sm:$0xff]   ;;  %v2207_v44 = vld [vmem:[%s2571_s30 + $0x48] ss:$16 sps:$4 sm:$0xff]  }
  0x69   : > { %1996 = vmatpush3.bf16.msra.mxu1 %v2173_v16  ;;  %1885 = vmatprep.subr.bf16.mxu0 %v2174_v17  ;;  %v2208_v45 = vld [vmem:[%s2571_s30 + $0x64] ss:$16 sps:$4 sm:$0xff]   ;;  %v2210_v46 = vld [vmem:[%s2571_s30 + $0x6c] ss:$16 sps:$4 sm:$0xff]   ;;  %v2212_v47 = vld [vmem:[%s2571_s30 + $0x60] ss:$16 sps:$4 sm:$0xff]  }
  0x6a   : > { %1997 = vmatprep.subr.bf16.mxu1 %v2175_v18  ;;  %v2213_v48 = vld [vmem:[%s2571_s30 + $0x68] ss:$16 sps:$4 sm:$0xff]   ;;  %v2214_v49 = vld [vmem:[%s2571_s30 + $0x84] ss:$16 sps:$4 sm:$0xff]   ;;  %v2216_v50 = vld [vmem:[%s2571_s30 + $0x8c] ss:$16 sps:$4 sm:$0xff]  }
  0x6b   : > { %v2218_v51 = vld [vmem:[%s2571_s30 + $0x80] ss:$16 sps:$4 sm:$0xff]   ;;  %v2219_v52 = vld [vmem:[%s2571_s30 + $0x88] ss:$16 sps:$4 sm:$0xff]   ;;  %v2220_v53 = vld [vmem:[%s2571_s30 + $0xa4] ss:$16 sps:$4 sm:$0xff]  }
  0x6c   : > { %1886 = vmatpush3.bf16.msra.mxu0 %v2176_v19  ;;  %v2222_v54 = vld [vmem:[%s2571_s30 + $0xac] ss:$16 sps:$4 sm:$0xff]   ;;  %v2224_v55 = vld [vmem:[%s2571_s30 + $0xa0] ss:$16 sps:$4 sm:$0xff]   ;;  %v2225_v56 = vld [vmem:[%s2571_s30 + $0xa8] ss:$16 sps:$4 sm:$0xff]  }
  0x6d   : > { %1998 = vmatpush3.bf16.msra.mxu1 %v2177_v20  ;;  %1887 = vmatprep.subr.bf16.mxu0 %v2178_v21  ;;  %v2226_v57 = vld [vmem:[%s2571_s30 + $0xc4] ss:$16 sps:$4 sm:$0xff]   ;;  %v2228_v58 = vld [vmem:[%s2571_s30 + $0xcc] ss:$16 sps:$4 sm:$0xff]   ;;  %v2230_v59 = vld [vmem:[%s2571_s30 + $0xc0] ss:$16 sps:$4 sm:$0xff]  }
  0x6e   : > { %1999 = vmatprep.subr.bf16.mxu1 %v2179_v22  ;;  %v2231_v60 = vld [vmem:[%s2571_s30 + $0xc8] ss:$16 sps:$4 sm:$0xff]   ;;  %v2232_v61 = vld [vmem:[%s2571_s30 + $0xe4] ss:$16 sps:$4 sm:$0xff]   ;;  %v2234_v62 = vld [vmem:[%s2571_s30 + $0xec] ss:$16 sps:$4 sm:$0xff]  }
  0x6f   : > { %v2236_v63 = vld [vmem:[%s2571_s30 + $0xe0] ss:$16 sps:$4 sm:$0xff]   ;;  %v2237_v0 = vld [vmem:[%s2571_s30 + $0xe8] ss:$16 sps:$4 sm:$0xff]   ;;  %v2238_v1 = vld [vmem:[%s2571_s30 + $0x104] ss:$16 sps:$4 sm:$0xff]  }
  0x70   : > { %1888 = vmatpush3.bf16.msra.mxu0 %v2180_v23  ;;  %v2240_v2 = vld [vmem:[%s2571_s30 + $0x10c] ss:$16 sps:$4 sm:$0xff]   ;;  %v2242_v3 = vld [vmem:[%s2571_s30 + $0x100] ss:$16 sps:$4 sm:$0xff]   ;;  %v2243_v4 = vld [vmem:[%s2571_s30 + $0x108] ss:$16 sps:$4 sm:$0xff]  }
  0x71   : > { %2000 = vmatpush3.bf16.msra.mxu1 %v2181_v24  ;;  %1889 = vmatprep.subr.bf16.mxu0 %v2182_v25  ;;  %v2244_v5 = vld [vmem:[%s2571_s30 + $0x124] ss:$16 sps:$4 sm:$0xff]   ;;  %v2246_v6 = vld [vmem:[%s2571_s30 + $0x12c] ss:$16 sps:$4 sm:$0xff]   ;;  %v2248_v7 = vld [vmem:[%s2571_s30 + $0x120] ss:$16 sps:$4 sm:$0xff]  }
  0x72   : > { %2001 = vmatprep.subr.bf16.mxu1 %v2183_v26  ;;  %v2249_v8 = vld [vmem:[%s2571_s30 + $0x128] ss:$16 sps:$4 sm:$0xff]   ;;  %v2250_v9 = vld [vmem:[%s2571_s30 + $0x144] ss:$16 sps:$4 sm:$0xff]   ;;  %v2252_v10 = vld [vmem:[%s2571_s30 + $0x14c] ss:$16 sps:$4 sm:$0xff]  }
  0x73   : > { %v2254_v11 = vld [vmem:[%s2571_s30 + $0x140] ss:$16 sps:$4 sm:$0xff]   ;;  %v2255_v12 = vld [vmem:[%s2571_s30 + $0x148] ss:$16 sps:$4 sm:$0xff]   ;;  %v2256_v13 = vld [vmem:[%s2571_s30 + $0x164] ss:$16 sps:$4 sm:$0xff]  }
  0x74   : > { %1890 = vmatpush3.bf16.msra.mxu0 %v2184_v27  ;;  %v2258_v14 = vld [vmem:[%s2571_s30 + $0x16c] ss:$16 sps:$4 sm:$0xff]   ;;  %v2260_v15 = vld [vmem:[%s2571_s30 + $0x160] ss:$16 sps:$4 sm:$0xff]   ;;  %v2261_v16 = vld [vmem:[%s2571_s30 + $0x168] ss:$16 sps:$4 sm:$0xff]  }
  0x75   : > { %2002 = vmatpush3.bf16.msra.mxu1 %v2185_v28  ;;  %1891 = vmatprep.subr.bf16.mxu0 %v2186_v29  ;;  %v2262_v17 = vld [vmem:[%s2571_s30 + $0x184] ss:$16 sps:$4 sm:$0xff]   ;;  %v2264_v18 = vld [vmem:[%s2571_s30 + $0x18c] ss:$16 sps:$4 sm:$0xff]   ;;  %v2266_v19 = vld [vmem:[%s2571_s30 + $0x180] ss:$16 sps:$4 sm:$0xff]  }
  0x76   : > { %2003 = vmatprep.subr.bf16.mxu1 %v2187_v30  ;;  %v2267_v20 = vld [vmem:[%s2571_s30 + $0x188] ss:$16 sps:$4 sm:$0xff]   ;;  %v2268_v21 = vld [vmem:[%s2571_s30 + $0x1a4] ss:$16 sps:$4 sm:$0xff]   ;;  %v2270_v22 = vld [vmem:[%s2571_s30 + $0x1ac] ss:$16 sps:$4 sm:$0xff]  }
  0x77   : > { %v2272_v23 = vld [vmem:[%s2571_s30 + $0x1a0] ss:$16 sps:$4 sm:$0xff]   ;;  %v2273_v24 = vld [vmem:[%s2571_s30 + $0x1a8] ss:$16 sps:$4 sm:$0xff]   ;;  %v2274_v25 = vld [vmem:[%s2571_s30 + $0x1c4] ss:$16 sps:$4 sm:$0xff]  }
  0x78   : > { %1892 = vmatpush3.bf16.msra.mxu0 %v2188_v31  ;;  %v2276_v26 = vld [vmem:[%s2571_s30 + $0x1cc] ss:$16 sps:$4 sm:$0xff]   ;;  %v2278_v27 = vld [vmem:[%s2571_s30 + $0x1c0] ss:$16 sps:$4 sm:$0xff]   ;;  %v2279_v28 = vld [vmem:[%s2571_s30 + $0x1c8] ss:$16 sps:$4 sm:$0xff]  }
  0x79   : > { %2004 = vmatpush3.bf16.msra.mxu1 %v2189_v32  ;;  %v2280_v29 = vld [vmem:[%s2571_s30 + $0x1e4] ss:$16 sps:$4 sm:$0xff]   ;;  %v2282_v30 = vld [vmem:[%s2571_s30 + $0x1ec] ss:$16 sps:$4 sm:$0xff]   ;;  %v2284_v31 = vld [vmem:[%s2571_s30 + $0x1e0] ss:$16 sps:$4 sm:$0xff]  }
  0x7a   : > { %v2285_v32 = vld [vmem:[%s2571_s30 + $0x1e8] ss:$16 sps:$4 sm:$0xff]  }
  0x7b   : > { %1162 = vmatmul.mubr.bf16.vlgmr.msra.gmra.mxu0 %v2190_v33 }
  0x7c   : > { %1323 = vmatmul.mubr.bf16.vlgmr.msra.gmra.mxu1 %v2193_v35  ;;  %1169 = vmatprep.mubr.bf16.mxu0 %v2196_v37 }
  0x7d   : > { %1330 = vmatprep.mubr.bf16.mxu1 %v2198_v38 }
  0x83   : > { %1170 = vmatmul.mubr.bf16.gmra.mxu0 %v2200_v39 }
  0x84   : > { %1331 = vmatmul.mubr.bf16.gmra.mxu1 %v2201_v40  ;;  %1177 = vmatprep.mubr.bf16.mxu0 %v2202_v41  ;;  %v457_v40 = vld [vmem:[#allocation2 + $0xb0] sm:$0xff] }
  0x85   : > { %1338 = vmatprep.mubr.bf16.mxu1 %v2204_v42 }
  0x8b   : > { %1178 = vmatmul.mubr.bf16.gmra.mxu0 %v2206_v43 }
  0x8c   : > { %1339 = vmatmul.mubr.bf16.gmra.mxu1 %v2207_v44  ;;  %1185 = vmatprep.mubr.bf16.mxu0 %v2208_v45 }
  0x8d   : > { %1346 = vmatprep.mubr.bf16.mxu1 %v2210_v46 }
  0x93   : > { %1186 = vmatmul.mubr.bf16.gmra.mxu0 %v2212_v47 }
  0x94   : > { %1347 = vmatmul.mubr.bf16.gmra.mxu1 %v2213_v48  ;;  %1193 = vmatprep.mubr.bf16.mxu0 %v2214_v49  ;;  %v458_v49 = vld [vmem:[#allocation2] sm:$0xff] }
  0x95   : > { %1354 = vmatprep.mubr.bf16.mxu1 %v2216_v50 }
  0x9b   : > { %1194 = vmatmul.mubr.bf16.gmra.mxu0 %v2218_v51 }
  0x9c   : > { %1355 = vmatmul.mubr.bf16.gmra.mxu1 %v2219_v52  ;;  %1201 = vmatprep.mubr.bf16.mxu0 %v2220_v53 }
  0x9d   : > { %1362 = vmatprep.mubr.bf16.mxu1 %v2222_v54 }
  0xa3   : > { %1202 = vmatmul.mubr.bf16.gmra.mxu0 %v2224_v55 }
  0xa4   : > { %1363 = vmatmul.mubr.bf16.gmra.mxu1 %v2225_v56  ;;  %1209 = vmatprep.mubr.bf16.mxu0 %v2226_v57 }
  0xa5   : > { %1370 = vmatprep.mubr.bf16.mxu1 %v2228_v58  ;;  %v459_v58 = vld [vmem:[#allocation2 + $0xd8] sm:$0xff] }
  0xab   : > { %1210 = vmatmul.mubr.bf16.gmra.mxu0 %v2230_v59 }
  0xac   : > { %1371 = vmatmul.mubr.bf16.gmra.mxu1 %v2231_v60  ;;  %1217 = vmatprep.mubr.bf16.mxu0 %v2232_v61 }
  0xad   : > { %1378 = vmatprep.mubr.bf16.mxu1 %v2234_v62 }
  0xb3   : > { %1218 = vmatmul.mubr.bf16.gmra.mxu0 %v2236_v63 }
  0xb4   : > { %1379 = vmatmul.mubr.bf16.gmra.mxu1 %v2237_v0  ;;  %1225 = vmatprep.mubr.bf16.mxu0 %v2238_v1 }
  0xb5   : > { %1386 = vmatprep.mubr.bf16.mxu1 %v2240_v2 }
  0xbb   : > { %1226 = vmatmul.mubr.bf16.gmra.mxu0 %v2242_v3  ;;  %v460_v3 = vld [vmem:[#allocation2 + $0x18] sm:$0xff] }
  0xbc   : > { %1387 = vmatmul.mubr.bf16.gmra.mxu1 %v2243_v4  ;;  %1233 = vmatprep.mubr.bf16.mxu0 %v2244_v5 }
  0xbd   : > { %1394 = vmatprep.mubr.bf16.mxu1 %v2246_v6 }
  0xc3   : > { %1234 = vmatmul.mubr.bf16.gmra.mxu0 %v2248_v7 }
  0xc4   : > { %1395 = vmatmul.mubr.bf16.gmra.mxu1 %v2249_v8  ;;  %1241 = vmatprep.mubr.bf16.mxu0 %v2250_v9 }
  0xc5   : > { %1402 = vmatprep.mubr.bf16.mxu1 %v2252_v10 }
  0xcb   : > { %1242 = vmatmul.mubr.bf16.gmra.mxu0 %v2254_v11 }
  0xcc   : > { %1403 = vmatmul.mubr.bf16.gmra.mxu1 %v2255_v12  ;;  %1249 = vmatprep.mubr.bf16.mxu0 %v2256_v13  ;;  %v461_v12 = vld [vmem:[#allocation2 + $0x50] sm:$0xff] }
  0xcd   : > { %1410 = vmatprep.mubr.bf16.mxu1 %v2258_v14 }
  0xd3   : > { %1250 = vmatmul.mubr.bf16.gmra.mxu0 %v2260_v15 }
  0xd4   : > { %1411 = vmatmul.mubr.bf16.gmra.mxu1 %v2261_v16  ;;  %1257 = vmatprep.mubr.bf16.mxu0 %v2262_v17 }
  0xd5   : > { %1418 = vmatprep.mubr.bf16.mxu1 %v2264_v18 }
  0xdb   : > { %1258 = vmatmul.mubr.bf16.gmra.mxu0 %v2266_v19 }
  0xdc   : > { %1419 = vmatmul.mubr.bf16.gmra.mxu1 %v2267_v20  ;;  %1265 = vmatprep.mubr.bf16.mxu0 %v2268_v21  ;;  %v462_v21 = vld [vmem:[#allocation2 + $0x68] sm:$0xff] }
  0xdd   : > { %1426 = vmatprep.mubr.bf16.mxu1 %v2270_v22 }
  0xe3   : > { %1266 = vmatmul.mubr.bf16.gmra.mxu0 %v2272_v23 }
  0xe4   : > { %1427 = vmatmul.mubr.bf16.gmra.mxu1 %v2273_v24  ;;  %1273 = vmatprep.mubr.bf16.mxu0 %v2274_v25 }
  0xe5   : > { %1434 = vmatprep.mubr.bf16.mxu1 %v2276_v26 }
  0xeb   : > { %1274 = vmatmul.mubr.bf16.gmra.mxu0 %v2278_v27 }
  0xec   : > { %1435 = vmatmul.mubr.bf16.gmra.mxu1 %v2279_v28  ;;  %1281 = vmatprep.mubr.bf16.mxu0 %v2280_v29 }
  0xed   : > { %1442 = vmatprep.mubr.bf16.mxu1 %v2282_v30  ;;  %v463_v30 = vld [vmem:[#allocation2 + $0x30] sm:$0xff] }
  0xf3   : > { %1282 = vmatmul.mubr.bf16.gmra.mxu0 %v2284_v31 }
  0xf4   : > { %1443 = vmatmul.mubr.bf16.gmra.mxu1 %v2285_v32 }
 0x13b   : > { %v1893_v33 = vpop.f32.mrf.mxu0 }
 0x13c   : > { %v2005_v34 = vpop.f32.mrf.mxu1 }
 0x13d   : > { %v1894_v35 = vpop.f32.mrf.mxu0 }
 0x13e   : > { %v1895_v36 = vadd.f32 %v1894_v35, %v1893_v33  ;;  %v2006_v37 = vpop.f32.mrf.mxu1 }
 0x13f   : > { %v2007_v38 = vadd.f32 %v2006_v37, %v2005_v34  ;;  %v1896_v39 = vpop.f32.mrf.mxu0 }
 0x140   : > { %v2008_v41 = vpop.f32.mrf.mxu1 }
 0x141   : > { %v1325_v42 = vadd.f32 %v2007_v38, %v1895_v36  ;;  %v1897_v43 = vpop.f32.mrf.mxu0 }
 0x142   : > { %v1898_v44 = vadd.f32 %v1897_v43, %v1896_v39  ;;  %v2009_v45 = vpop.f32.mrf.mxu1  ;;  %v464_v39 = vld [vmem:[#allocation2 + $0x48] sm:$0xff] }
 0x143   : > { %v1451_v46 = vadd.f32 %v1325_v42, %v457_v40  ;;  %v2010_v47 = vadd.f32 %v2009_v45, %v2008_v41  ;;  %v1899_v48 = vpop.f32.mrf.mxu0 }
 0x144   : > { %v2011_v50 = vpop.f32.mrf.mxu1 }
 0x145   : > { %1483 = vst [vmem:[#allocation2 + $0xb0] sm:$0xff] %v1451_v46  ;;  %v1328_v51 = vadd.f32 %v2010_v47, %v1898_v44  ;;  %v1900_v52 = vpop.f32.mrf.mxu0 }
 0x146   : > { %v1901_v53 = vadd.f32 %v1900_v52, %v1899_v48  ;;  %v2012_v54 = vpop.f32.mrf.mxu1  ;;  %v465_v48 = vld [vmem:[#allocation2 + $0x80] sm:$0xff] }
 0x147   : > { %v1452_v55 = vadd.f32 %v1328_v51, %v458_v49  ;;  %v2013_v56 = vadd.f32 %v2012_v54, %v2011_v50  ;;  %v1902_v57 = vpop.f32.mrf.mxu0 }
 0x148   : > { %v2014_v59 = vpop.f32.mrf.mxu1 }
 0x149   : > { %1484 = vst [vmem:[#allocation2] sm:$0xff] %v1452_v55  ;;  %v1333_v60 = vadd.f32 %v2013_v56, %v1901_v53  ;;  %v1903_v61 = vpop.f32.mrf.mxu0 }
 0x14a   : > { %v1904_v62 = vadd.f32 %v1903_v61, %v1902_v57  ;;  %v2015_v63 = vpop.f32.mrf.mxu1  ;;  %v466_v57 = vld [vmem:[#allocation2 + $0x88] sm:$0xff] }
 0x14b   : > { %v1453_v0 = vadd.f32 %v1333_v60, %v459_v58  ;;  %v2016_v1 = vadd.f32 %v2015_v63, %v2014_v59  ;;  %v1905_v2 = vpop.f32.mrf.mxu0 }
 0x14c   : > { %v2017_v4 = vpop.f32.mrf.mxu1 }
 0x14d   : > { %1485 = vst [vmem:[#allocation2 + $0xd8] sm:$0xff] %v1453_v0  ;;  %v1336_v5 = vadd.f32 %v2016_v1, %v1904_v62  ;;  %v1906_v6 = vpop.f32.mrf.mxu0 }
 0x14e   : > { %v1907_v7 = vadd.f32 %v1906_v6, %v1905_v2  ;;  %v2018_v8 = vpop.f32.mrf.mxu1  ;;  %v467_v2 = vld [vmem:[#allocation2 + $0xe8] sm:$0xff] }
 0x14f   : > { %v1454_v9 = vadd.f32 %v1336_v5, %v460_v3  ;;  %v2019_v10 = vadd.f32 %v2018_v8, %v2017_v4  ;;  %v1908_v11 = vpop.f32.mrf.mxu0 }
 0x150   : > { %v2020_v13 = vpop.f32.mrf.mxu1 }
 0x151   : > { %1486 = vst [vmem:[#allocation2 + $0x18] sm:$0xff] %v1454_v9  ;;  %v1341_v14 = vadd.f32 %v2019_v10, %v1907_v7  ;;  %v1909_v15 = vpop.f32.mrf.mxu0 }
 0x152   : > { %v1910_v16 = vadd.f32 %v1909_v15, %v1908_v11  ;;  %v2021_v17 = vpop.f32.mrf.mxu1  ;;  %v468_v11 = vld [vmem:[#allocation2 + $0xb8] sm:$0xff] }
 0x153   : > { %v1455_v18 = vadd.f32 %v1341_v14, %v461_v12  ;;  %v2022_v19 = vadd.f32 %v2021_v17, %v2020_v13  ;;  %v1911_v20 = vpop.f32.mrf.mxu0 }
 0x154   : > { %v2023_v22 = vpop.f32.mrf.mxu1 }
 0x155   : > { %1487 = vst [vmem:[#allocation2 + $0x50] sm:$0xff] %v1455_v18  ;;  %v1344_v23 = vadd.f32 %v2022_v19, %v1910_v16  ;;  %v1912_v24 = vpop.f32.mrf.mxu0 }
 0x156   : > { %v1913_v25 = vadd.f32 %v1912_v24, %v1911_v20  ;;  %v2024_v26 = vpop.f32.mrf.mxu1  ;;  %v469_v20 = vld [vmem:[#allocation2 + $0x60] sm:$0xff] }
 0x157   : > { %v1456_v27 = vadd.f32 %v1344_v23, %v462_v21  ;;  %v2025_v28 = vadd.f32 %v2024_v26, %v2023_v22  ;;  %v1914_v29 = vpop.f32.mrf.mxu0 }
 0x158   : > { %v2026_v31 = vpop.f32.mrf.mxu1 }
 0x159   : > { %1488 = vst [vmem:[#allocation2 + $0x68] sm:$0xff] %v1456_v27  ;;  %v1349_v32 = vadd.f32 %v2025_v28, %v1913_v25  ;;  %v1915_v33 = vpop.f32.mrf.mxu0 }
 0x15a   : > { %v1916_v34 = vadd.f32 %v1915_v33, %v1914_v29  ;;  %v2027_v35 = vpop.f32.mrf.mxu1  ;;  %v470_v29 = vld [vmem:[#allocation2 + $0xf0] sm:$0xff] }
 0x15b   : > { %v1457_v36 = vadd.f32 %v1349_v32, %v463_v30  ;;  %v2028_v37 = vadd.f32 %v2027_v35, %v2026_v31  ;;  %v1917_v38 = vpop.f32.mrf.mxu0 }
 0x15c   : > { %v2029_v40 = vpop.f32.mrf.mxu1 }
 0x15d   : > { %1489 = vst [vmem:[#allocation2 + $0x30] sm:$0xff] %v1457_v36  ;;  %v1352_v41 = vadd.f32 %v2028_v37, %v1916_v34  ;;  %v1918_v42 = vpop.f32.mrf.mxu0 }
 0x15e   : > { %v1919_v43 = vadd.f32 %v1918_v42, %v1917_v38  ;;  %v2030_v44 = vpop.f32.mrf.mxu1  ;;  %v471_v38 = vld [vmem:[#allocation2 + $0x8] sm:$0xff] }
 0x15f   : > { %v1458_v45 = vadd.f32 %v1352_v41, %v464_v39  ;;  %v2031_v46 = vadd.f32 %v2030_v44, %v2029_v40  ;;  %v1920_v47 = vpop.f32.mrf.mxu0 }
 0x160   : > { %v2032_v49 = vpop.f32.mrf.mxu1 }
 0x161   : > { %1490 = vst [vmem:[#allocation2 + $0x48] sm:$0xff] %v1458_v45  ;;  %v1357_v50 = vadd.f32 %v2031_v46, %v1919_v43  ;;  %v1921_v51 = vpop.f32.mrf.mxu0 }
 0x162   : > { %v1922_v52 = vadd.f32 %v1921_v51, %v1920_v47  ;;  %v2033_v53 = vpop.f32.mrf.mxu1  ;;  %v472_v47 = vld [vmem:[#allocation2 + $0x78] sm:$0xff] }
 0x163   : > { %v1459_v54 = vadd.f32 %v1357_v50, %v465_v48  ;;  %v2034_v55 = vadd.f32 %v2033_v53, %v2032_v49  ;;  %v1923_v56 = vpop.f32.mrf.mxu0 }
 0x164   : > { %v2035_v58 = vpop.f32.mrf.mxu1 }
 0x165   : > { %1491 = vst [vmem:[#allocation2 + $0x80] sm:$0xff] %v1459_v54  ;;  %v1360_v59 = vadd.f32 %v2034_v55, %v1922_v52  ;;  %v1924_v60 = vpop.f32.mrf.mxu0 }
 0x166   : > { %v1925_v61 = vadd.f32 %v1924_v60, %v1923_v56  ;;  %v2036_v62 = vpop.f32.mrf.mxu1  ;;  %v473_v56 = vld [vmem:[#allocation2 + $0x38] sm:$0xff] }
 0x167   : > { %v1460_v63 = vadd.f32 %v1360_v59, %v466_v57  ;;  %v2037_v0 = vadd.f32 %v2036_v62, %v2035_v58  ;;  %v1926_v1 = vpop.f32.mrf.mxu0 }
 0x168   : > { %v2038_v3 = vpop.f32.mrf.mxu1 }
 0x169   : > { %1492 = vst [vmem:[#allocation2 + $0x88] sm:$0xff] %v1460_v63  ;;  %v1365_v4 = vadd.f32 %v2037_v0, %v1925_v61  ;;  %v1927_v5 = vpop.f32.mrf.mxu0 }
 0x16a   : > { %v1928_v6 = vadd.f32 %v1927_v5, %v1926_v1  ;;  %v2039_v7 = vpop.f32.mrf.mxu1  ;;  %v474_v1 = vld [vmem:[#allocation2 + $0x58] sm:$0xff] }
 0x16b   : > { %v1461_v8 = vadd.f32 %v1365_v4, %v467_v2  ;;  %v2040_v9 = vadd.f32 %v2039_v7, %v2038_v3  ;;  %v1929_v10 = vpop.f32.mrf.mxu0 }
 0x16c   : > { %v2041_v12 = vpop.f32.mrf.mxu1 }
 0x16d   : > { %1493 = vst [vmem:[#allocation2 + $0xe8] sm:$0xff] %v1461_v8  ;;  %v1368_v13 = vadd.f32 %v2040_v9, %v1928_v6  ;;  %v1930_v14 = vpop.f32.mrf.mxu0 }
 0x16e   : > { %v1931_v15 = vadd.f32 %v1930_v14, %v1929_v10  ;;  %v2042_v16 = vpop.f32.mrf.mxu1  ;;  %v475_v10 = vld [vmem:[#allocation2 + $0x40] sm:$0xff] }
 0x16f   : > { %v1462_v17 = vadd.f32 %v1368_v13, %v468_v11  ;;  %v2043_v18 = vadd.f32 %v2042_v16, %v2041_v12  ;;  %v1932_v19 = vpop.f32.mrf.mxu0 }
 0x170   : > { %v2044_v21 = vpop.f32.mrf.mxu1 }
 0x171   : > { %1494 = vst [vmem:[#allocation2 + $0xb8] sm:$0xff] %v1462_v17  ;;  %v1373_v22 = vadd.f32 %v2043_v18, %v1931_v15  ;;  %v1933_v23 = vpop.f32.mrf.mxu0 }
 0x172   : > { %v1934_v24 = vadd.f32 %v1933_v23, %v1932_v19  ;;  %v2045_v25 = vpop.f32.mrf.mxu1  ;;  %v476_v19 = vld [vmem:[#allocation2 + $0xc8] sm:$0xff] }
 0x173   : > { %v1463_v26 = vadd.f32 %v1373_v22, %v469_v20  ;;  %v2046_v27 = vadd.f32 %v2045_v25, %v2044_v21  ;;  %v1935_v28 = vpop.f32.mrf.mxu0 }
 0x174   : > { %v2047_v30 = vpop.f32.mrf.mxu1 }
 0x175   : > { %1495 = vst [vmem:[#allocation2 + $0x60] sm:$0xff] %v1463_v26  ;;  %v1376_v31 = vadd.f32 %v2046_v27, %v1934_v24  ;;  %v1936_v32 = vpop.f32.mrf.mxu0 }
 0x176   : > { %v1937_v33 = vadd.f32 %v1936_v32, %v1935_v28  ;;  %v2048_v34 = vpop.f32.mrf.mxu1  ;;  %v477_v28 = vld [vmem:[#allocation2 + $0xe0] sm:$0xff] }
 0x177   : > { %v1464_v35 = vadd.f32 %v1376_v31, %v470_v29  ;;  %v2049_v36 = vadd.f32 %v2048_v34, %v2047_v30  ;;  %v1938_v37 = vpop.f32.mrf.mxu0 }
 0x178   : > { %v2050_v39 = vpop.f32.mrf.mxu1 }
 0x179   : > { %1496 = vst [vmem:[#allocation2 + $0xf0] sm:$0xff] %v1464_v35  ;;  %v1381_v40 = vadd.f32 %v2049_v36, %v1937_v33  ;;  %v1939_v41 = vpop.f32.mrf.mxu0 }
 0x17a   : > { %v1940_v42 = vadd.f32 %v1939_v41, %v1938_v37  ;;  %v2051_v43 = vpop.f32.mrf.mxu1  ;;  %v478_v37 = vld [vmem:[#allocation2 + $0x90] sm:$0xff] }
 0x17b   : > { %v1465_v44 = vadd.f32 %v1381_v40, %v471_v38  ;;  %v2052_v45 = vadd.f32 %v2051_v43, %v2050_v39  ;;  %v1941_v46 = vpop.f32.mrf.mxu0 }
 0x17c   : > { %v2053_v48 = vpop.f32.mrf.mxu1 }
 0x17d   : > { %1497 = vst [vmem:[#allocation2 + $0x8] sm:$0xff] %v1465_v44  ;;  %v1384_v49 = vadd.f32 %v2052_v45, %v1940_v42  ;;  %v1942_v50 = vpop.f32.mrf.mxu0 }
 0x17e   : > { %v1943_v51 = vadd.f32 %v1942_v50, %v1941_v46  ;;  %v2054_v52 = vpop.f32.mrf.mxu1  ;;  %v479_v46 = vld [vmem:[#allocation2 + $0x70] sm:$0xff] }
 0x17f   : > { %v1466_v53 = vadd.f32 %v1384_v49, %v472_v47  ;;  %v2055_v54 = vadd.f32 %v2054_v52, %v2053_v48  ;;  %v1944_v55 = vpop.f32.mrf.mxu0 }
 0x180   : > { %v2056_v57 = vpop.f32.mrf.mxu1 }
 0x181   : > { %1498 = vst [vmem:[#allocation2 + $0x78] sm:$0xff] %v1466_v53  ;;  %v1389_v58 = vadd.f32 %v2055_v54, %v1943_v51  ;;  %v1945_v59 = vpop.f32.mrf.mxu0 }
 0x182   : > { %v1946_v60 = vadd.f32 %v1945_v59, %v1944_v55  ;;  %v2057_v61 = vpop.f32.mrf.mxu1  ;;  %v480_v55 = vld [vmem:[#allocation2 + $0xc0] sm:$0xff] }
 0x183   : > { %v1467_v62 = vadd.f32 %v1389_v58, %v473_v56  ;;  %v2058_v63 = vadd.f32 %v2057_v61, %v2056_v57  ;;  %v1947_v0 = vpop.f32.mrf.mxu0 }
 0x184   : > { %v2059_v2 = vpop.f32.mrf.mxu1 }
 0x185   : > { %1499 = vst [vmem:[#allocation2 + $0x38] sm:$0xff] %v1467_v62  ;;  %v1392_v3 = vadd.f32 %v2058_v63, %v1946_v60  ;;  %v1948_v4 = vpop.f32.mrf.mxu0 }
 0x186   : > { %v1949_v5 = vadd.f32 %v1948_v4, %v1947_v0  ;;  %v2060_v6 = vpop.f32.mrf.mxu1  ;;  %v481_v0 = vld [vmem:[#allocation2 + $0xa8] sm:$0xff] }
 0x187   : > { %v1468_v7 = vadd.f32 %v1392_v3, %v474_v1  ;;  %v2061_v8 = vadd.f32 %v2060_v6, %v2059_v2  ;;  %v1950_v9 = vpop.f32.mrf.mxu0 }
 0x188   : > { %v2062_v11 = vpop.f32.mrf.mxu1 }
 0x189   : > { %1500 = vst [vmem:[#allocation2 + $0x58] sm:$0xff] %v1468_v7  ;;  %v1397_v12 = vadd.f32 %v2061_v8, %v1949_v5  ;;  %v1951_v13 = vpop.f32.mrf.mxu0 }
 0x18a   : > { %v1952_v14 = vadd.f32 %v1951_v13, %v1950_v9  ;;  %v2063_v15 = vpop.f32.mrf.mxu1  ;;  %v482_v9 = vld [vmem:[#allocation2 + $0xd0] sm:$0xff] }
 0x18b   : > { %v1469_v16 = vadd.f32 %v1397_v12, %v475_v10  ;;  %v2064_v17 = vadd.f32 %v2063_v15, %v2062_v11  ;;  %v1953_v18 = vpop.f32.mrf.mxu0 }
 0x18c   : > { %v2065_v20 = vpop.f32.mrf.mxu1 }
 0x18d   : > { %1501 = vst [vmem:[#allocation2 + $0x40] sm:$0xff] %v1469_v16  ;;  %v1400_v21 = vadd.f32 %v2064_v17, %v1952_v14  ;;  %v1954_v22 = vpop.f32.mrf.mxu0 }
 0x18e   : > { %v1955_v23 = vadd.f32 %v1954_v22, %v1953_v18  ;;  %v2066_v24 = vpop.f32.mrf.mxu1  ;;  %v483_v18 = vld [vmem:[#allocation2 + $0x10] sm:$0xff] }
 0x18f   : > { %v1470_v25 = vadd.f32 %v1400_v21, %v476_v19  ;;  %v2067_v26 = vadd.f32 %v2066_v24, %v2065_v20  ;;  %v1956_v27 = vpop.f32.mrf.mxu0 }
 0x190   : > { %v2068_v29 = vpop.f32.mrf.mxu1 }
 0x191   : > { %1502 = vst [vmem:[#allocation2 + $0xc8] sm:$0xff] %v1470_v25  ;;  %v1405_v30 = vadd.f32 %v2067_v26, %v1955_v23  ;;  %v1957_v31 = vpop.f32.mrf.mxu0 }
 0x192   : > { %v1958_v32 = vadd.f32 %v1957_v31, %v1956_v27  ;;  %v2069_v33 = vpop.f32.mrf.mxu1  ;;  %v484_v27 = vld [vmem:[#allocation2 + $0x28] sm:$0xff] }
 0x193   : > { %v1471_v34 = vadd.f32 %v1405_v30, %v477_v28  ;;  %v2070_v35 = vadd.f32 %v2069_v33, %v2068_v29  ;;  %v1959_v36 = vpop.f32.mrf.mxu0 }
 0x194   : > { %v2071_v38 = vpop.f32.mrf.mxu1 }
 0x195   : > { %1503 = vst [vmem:[#allocation2 + $0xe0] sm:$0xff] %v1471_v34  ;;  %v1408_v39 = vadd.f32 %v2070_v35, %v1958_v32  ;;  %v1960_v40 = vpop.f32.mrf.mxu0 }
 0x196   : > { %v1961_v41 = vadd.f32 %v1960_v40, %v1959_v36  ;;  %v2072_v42 = vpop.f32.mrf.mxu1  ;;  %v485_v36 = vld [vmem:[#allocation2 + $0xa0] sm:$0xff] }
 0x197   : > { %v1472_v43 = vadd.f32 %v1408_v39, %v478_v37  ;;  %v2073_v44 = vadd.f32 %v2072_v42, %v2071_v38  ;;  %v1962_v45 = vpop.f32.mrf.mxu0 }
 0x198   : > { %v2074_v47 = vpop.f32.mrf.mxu1 }
 0x199   : > { %1504 = vst [vmem:[#allocation2 + $0x90] sm:$0xff] %v1472_v43  ;;  %v1413_v48 = vadd.f32 %v2073_v44, %v1961_v41  ;;  %v1963_v49 = vpop.f32.mrf.mxu0 }
 0x19a   : > { %v1964_v50 = vadd.f32 %v1963_v49, %v1962_v45  ;;  %v2075_v51 = vpop.f32.mrf.mxu1  ;;  %v486_v45 = vld [vmem:[#allocation2 + $0xf8] sm:$0xff] }
 0x19b   : > { %v1473_v52 = vadd.f32 %v1413_v48, %v479_v46  ;;  %v2076_v53 = vadd.f32 %v2075_v51, %v2074_v47  ;;  %v1965_v54 = vpop.f32.mrf.mxu0 }
 0x19c   : > { %v2077_v56 = vpop.f32.mrf.mxu1 }
 0x19d   : > { %1505 = vst [vmem:[#allocation2 + $0x70] sm:$0xff] %v1473_v52  ;;  %v1416_v57 = vadd.f32 %v2076_v53, %v1964_v50  ;;  %v1966_v58 = vpop.f32.mrf.mxu0 }
 0x19e   : > { %v1967_v59 = vadd.f32 %v1966_v58, %v1965_v54  ;;  %v2078_v60 = vpop.f32.mrf.mxu1  ;;  %v487_v54 = vld [vmem:[#allocation2 + $0x20] sm:$0xff] }
 0x19f   : > { %v1474_v61 = vadd.f32 %v1416_v57, %v480_v55  ;;  %v2079_v62 = vadd.f32 %v2078_v60, %v2077_v56  ;;  %v1968_v63 = vpop.f32.mrf.mxu0 }
 0x1a0   : > { %v2080_v1 = vpop.f32.mrf.mxu1 }
 0x1a1   : > { %1506 = vst [vmem:[#allocation2 + $0xc0] sm:$0xff] %v1474_v61  ;;  %v1421_v2 = vadd.f32 %v2079_v62, %v1967_v59  ;;  %v1969_v3 = vpop.f32.mrf.mxu0  ;;  %v488_v62 = vld [vmem:[#allocation2 + $0x98] sm:$0xff] }
 0x1a2   : > { %v1970_v4 = vadd.f32 %v1969_v3, %v1968_v63  ;;  %v2081_v5 = vpop.f32.mrf.mxu1 }
 0x1a3   : > { %v1475_v6 = vadd.f32 %v1421_v2, %v481_v0  ;;  %v2082_v7 = vadd.f32 %v2081_v5, %v2080_v1  ;;  %v1971_v8 = vpop.f32.mrf.mxu0 }
 0x1a4   : > { %v2083_v10 = vpop.f32.mrf.mxu1 }
 0x1a5   : > { %1507 = vst [vmem:[#allocation2 + $0xa8] sm:$0xff] %v1475_v6  ;;  %v1424_v11 = vadd.f32 %v2082_v7, %v1970_v4  ;;  %v1972_v12 = vpop.f32.mrf.mxu0 }
 0x1a6   : > { %v1973_v13 = vadd.f32 %v1972_v12, %v1971_v8  ;;  %v2084_v14 = vpop.f32.mrf.mxu1 }
 0x1a7   : > { %v1476_v15 = vadd.f32 %v1424_v11, %v482_v9  ;;  %v2085_v16 = vadd.f32 %v2084_v14, %v2083_v10  ;;  %v1974_v17 = vpop.f32.mrf.mxu0 }
 0x1a8   : > { %v2086_v19 = vpop.f32.mrf.mxu1 }
 0x1a9   : > { %1508 = vst [vmem:[#allocation2 + $0xd0] sm:$0xff] %v1476_v15  ;;  %v1429_v20 = vadd.f32 %v2085_v16, %v1973_v13  ;;  %v1975_v21 = vpop.f32.mrf.mxu0 }
 0x1aa   : > { %v1976_v22 = vadd.f32 %v1975_v21, %v1974_v17  ;;  %v2087_v23 = vpop.f32.mrf.mxu1 }
 0x1ab   : > { %v1477_v24 = vadd.f32 %v1429_v20, %v483_v18  ;;  %v2088_v25 = vadd.f32 %v2087_v23, %v2086_v19  ;;  %v1977_v26 = vpop.f32.mrf.mxu0 }
 0x1ac   : > { %v2089_v28 = vpop.f32.mrf.mxu1 }
 0x1ad   : > { %1509 = vst [vmem:[#allocation2 + $0x10] sm:$0xff] %v1477_v24  ;;  %v1432_v29 = vadd.f32 %v2088_v25, %v1976_v22  ;;  %v1978_v30 = vpop.f32.mrf.mxu0 }
 0x1ae   : > { %v1979_v31 = vadd.f32 %v1978_v30, %v1977_v26  ;;  %v2090_v32 = vpop.f32.mrf.mxu1 }
 0x1af   : > { %v1478_v33 = vadd.f32 %v1432_v29, %v484_v27  ;;  %v2091_v34 = vadd.f32 %v2090_v32, %v2089_v28  ;;  %v1980_v35 = vpop.f32.mrf.mxu0 }
 0x1b0   : > { %v2092_v37 = vpop.f32.mrf.mxu1 }
 0x1b1   : > { %1510 = vst [vmem:[#allocation2 + $0x28] sm:$0xff] %v1478_v33  ;;  %v1437_v38 = vadd.f32 %v2091_v34, %v1979_v31  ;;  %v1981_v39 = vpop.f32.mrf.mxu0 }
 0x1b2   : > { %v1982_v40 = vadd.f32 %v1981_v39, %v1980_v35  ;;  %v2093_v41 = vpop.f32.mrf.mxu1 }
 0x1b3   : > { %v1479_v42 = vadd.f32 %v1437_v38, %v485_v36  ;;  %v2094_v43 = vadd.f32 %v2093_v41, %v2092_v37  ;;  %v1983_v44 = vpop.f32.mrf.mxu0 }
 0x1b4   : > { %v2095_v46 = vpop.f32.mrf.mxu1 }
 0x1b5   : > { %1511 = vst [vmem:[#allocation2 + $0xa0] sm:$0xff] %v1479_v42  ;;  %v1440_v47 = vadd.f32 %v2094_v43, %v1982_v40  ;;  %v1984_v48 = vpop.f32.mrf.mxu0 }
 0x1b6   : > { %v1985_v49 = vadd.f32 %v1984_v48, %v1983_v44  ;;  %v2096_v50 = vpop.f32.mrf.mxu1 }
 0x1b7   : > { %v1480_v51 = vadd.f32 %v1440_v47, %v486_v45  ;;  %v2097_v52 = vadd.f32 %v2096_v50, %v2095_v46  ;;  %v1986_v53 = vpop.f32.mrf.mxu0 }
 0x1b8   : > { %v2098_v55 = vpop.f32.mrf.mxu1 }
 0x1b9   : > { %1512 = vst [vmem:[#allocation2 + $0xf8] sm:$0xff] %v1480_v51  ;;  %v1445_v56 = vadd.f32 %v2097_v52, %v1985_v49  ;;  %v1987_v57 = vpop.f32.mrf.mxu0 }
 0x1ba   : > { %v1988_v58 = vadd.f32 %v1987_v57, %v1986_v53  ;;  %v2099_v59 = vpop.f32.mrf.mxu1 }
 0x1bb   : > { %v1481_v60 = vadd.f32 %v1445_v56, %v487_v54  ;;  %v2100_v61 = vadd.f32 %v2099_v59, %v2098_v55 }
 0x1bd   : > { %1513 = vst [vmem:[#allocation2 + $0x20] sm:$0xff] %v1481_v60  ;;  %v1448_v63 = vadd.f32 %v2100_v61, %v1988_v58  ;;  %1518 = sbr.rel (%p1872_p13) target bundleno = 469 (0x1d5), region = 63 }
 0x1bf   : > { %v1482_v0 = vadd.f32 %v1448_v63, %v488_v62 }
 0x1c1   : > { %1514 = vst [vmem:[#allocation2 + $0x98] sm:$0xff] %v1482_v0 }
 0x1c2   : > { %v1519_v1 = vld [vmem:[#allocation2 + $0xb0] sm:$0xff]  ;;  %v2674_v2 = vld [vmem:[%s2763_s2] ss:$0 sm:$0xff]  ;;  %v1521_v6 = vld [vmem:[#allocation2 + $0xd8] sm:$0xff] }
 0x1c3   : > { %v1520_v3 = vld [vmem:[#allocation2] sm:$0xff]  ;;  %v1558_v4 = vadd.f32 %v2674_v2, %v1519_v1  ;;  %v1522_v7 = vld [vmem:[#allocation2 + $0x18] sm:$0xff]  ;;  %v1523_v8 = vld [vmem:[#allocation2 + $0x50] sm:$0xff]  ;;  %v1560_v9 = vadd.f32 %v2674_v2, %v1521_v6 }
 0x1c4   : > { %v1559_v5 = vadd.f32 %v2674_v2, %v1520_v3  ;;  %v1561_v10 = vadd.f32 %v2674_v2, %v1522_v7  ;;  %v1562_v11 = vadd.f32 %v2674_v2, %v1523_v8  ;;  %v1524_v12 = vld [vmem:[#allocation2 + $0x68] sm:$0xff]  ;;  %v1525_v13 = vld [vmem:[#allocation2 + $0x30] sm:$0xff]  ;;  %v1527_v18 = vld [vmem:[#allocation2 + $0x80] sm:$0xff] }
 0x1c5   : > { %v1526_v14 = vld [vmem:[#allocation2 + $0x48] sm:$0xff]  ;;  %1590 = vst [vmem:[%s2569_s29] sm:$0xff] %v1558_v4  ;;  %v1563_v15 = vadd.f32 %v2674_v2, %v1524_v12  ;;  %v1564_v16 = vadd.f32 %v2674_v2, %v1525_v13  ;;  %1592 = vst [vmem:[%s2569_s29 + $0x10] sm:$0xff] %v1560_v9  ;;  %v1566_v21 = vadd.f32 %v2674_v2, %v1527_v18  ;;  %v1530_v24 = vld [vmem:[#allocation2 + $0xb8] sm:$0xff] }
 0x1c6   : > { %1591 = vst [vmem:[%s2569_s29 + $0x8] sm:$0xff] %v1559_v5  ;;  %v1565_v17 = vadd.f32 %v2674_v2, %v1526_v14  ;;  %v1528_v19 = vld [vmem:[#allocation2 + $0x88] sm:$0xff]  ;;  %1593 = vst [vmem:[%s2569_s29 + $0x18] sm:$0xff] %v1561_v10  ;;  %v1531_v25 = vld [vmem:[#allocation2 + $0x60] sm:$0xff]  ;;  %v1569_v27 = vadd.f32 %v2674_v2, %v1530_v24 }
 0x1c7   : > { %v1529_v20 = vld [vmem:[#allocation2 + $0xe8] sm:$0xff]  ;;  %1594 = vst [vmem:[%s2569_s29 + $0x20] sm:$0xff] %v1562_v11  ;;  %v1567_v22 = vadd.f32 %v2674_v2, %v1528_v19  ;;  %v1532_v26 = vld [vmem:[#allocation2 + $0xf0] sm:$0xff]  ;;  %1595 = vst [vmem:[%s2569_s29 + $0x28] sm:$0xff] %v1563_v15  ;;  %v1570_v28 = vadd.f32 %v2674_v2, %v1531_v25 }
 0x1c8   : > { %v1568_v23 = vadd.f32 %v2674_v2, %v1529_v20  ;;  %1596 = vst [vmem:[%s2569_s29 + $0x30] sm:$0xff] %v1564_v16  ;;  %1597 = vst [vmem:[%s2569_s29 + $0x38] sm:$0xff] %v1565_v17  ;;  %v1571_v29 = vadd.f32 %v2674_v2, %v1532_v26  ;;  %v1533_v30 = vld [vmem:[#allocation2 + $0x8] sm:$0xff]  ;;  %v1534_v31 = vld [vmem:[#allocation2 + $0x78] sm:$0xff] }
 0x1c9   : > { %v1535_v32 = vld [vmem:[#allocation2 + $0x38] sm:$0xff]  ;;  %1598 = vst [vmem:[%s2569_s29 + $0x40] sm:$0xff] %v1566_v21  ;;  %1599 = vst [vmem:[%s2569_s29 + $0x48] sm:$0xff] %v1567_v22  ;;  %v1572_v33 = vadd.f32 %v2674_v2, %v1533_v30  ;;  %v1573_v34 = vadd.f32 %v2674_v2, %v1534_v31  ;;  %v1537_v37 = vld [vmem:[#allocation2 + $0x40] sm:$0xff] }
 0x1ca   : > { %1600 = vst [vmem:[%s2569_s29 + $0x50] sm:$0xff] %v1568_v23  ;;  %v1574_v35 = vadd.f32 %v2674_v2, %v1535_v32  ;;  %v1536_v36 = vld [vmem:[#allocation2 + $0x58] sm:$0xff]  ;;  %v1538_v38 = vld [vmem:[#allocation2 + $0xc8] sm:$0xff]  ;;  %1601 = vst [vmem:[%s2569_s29 + $0x58] sm:$0xff] %v1569_v27  ;;  %v1576_v40 = vadd.f32 %v2674_v2, %v1537_v37 }
 0x1cb   : > { %1602 = vst [vmem:[%s2569_s29 + $0x60] sm:$0xff] %v1570_v28  ;;  %1603 = vst [vmem:[%s2569_s29 + $0x68] sm:$0xff] %v1571_v29  ;;  %v1575_v39 = vadd.f32 %v2674_v2, %v1536_v36  ;;  %v1577_v41 = vadd.f32 %v2674_v2, %v1538_v38  ;;  %v1539_v42 = vld [vmem:[#allocation2 + $0xe0] sm:$0xff]  ;;  %v1540_v43 = vld [vmem:[#allocation2 + $0x90] sm:$0xff] }
 0x1cc   : > { %v1541_v44 = vld [vmem:[#allocation2 + $0x70] sm:$0xff]  ;;  %1604 = vst [vmem:[%s2569_s29 + $0x70] sm:$0xff] %v1572_v33  ;;  %1605 = vst [vmem:[%s2569_s29 + $0x78] sm:$0xff] %v1573_v34  ;;  %v1578_v45 = vadd.f32 %v2674_v2, %v1539_v42  ;;  %v1579_v46 = vadd.f32 %v2674_v2, %v1540_v43  ;;  %v1542_v48 = vld [vmem:[#allocation2 + $0xc0] sm:$0xff] }
 0x1cd   : > { %1606 = vst [vmem:[%s2569_s29 + $0x80] sm:$0xff] %v1574_v35  ;;  %v1580_v47 = vadd.f32 %v2674_v2, %v1541_v44  ;;  %v1543_v49 = vld [vmem:[#allocation2 + $0xa8] sm:$0xff]  ;;  %v1544_v50 = vld [vmem:[#allocation2 + $0xd0] sm:$0xff]  ;;  %1607 = vst [vmem:[%s2569_s29 + $0x88] sm:$0xff] %v1575_v39  ;;  %v1581_v51 = vadd.f32 %v2674_v2, %v1542_v48 }
 0x1ce   : > { %1608 = vst [vmem:[%s2569_s29 + $0x90] sm:$0xff] %v1576_v40  ;;  %1609 = vst [vmem:[%s2569_s29 + $0x98] sm:$0xff] %v1577_v41  ;;  %v1582_v52 = vadd.f32 %v2674_v2, %v1543_v49  ;;  %v1583_v53 = vadd.f32 %v2674_v2, %v1544_v50  ;;  %v1545_v54 = vld [vmem:[#allocation2 + $0x10] sm:$0xff]  ;;  %v1546_v55 = vld [vmem:[#allocation2 + $0x28] sm:$0xff] }
 0x1cf   : > { %v1547_v56 = vld [vmem:[#allocation2 + $0xa0] sm:$0xff]  ;;  %1610 = vst [vmem:[%s2569_s29 + $0xa0] sm:$0xff] %v1578_v45  ;;  %1611 = vst [vmem:[%s2569_s29 + $0xa8] sm:$0xff] %v1579_v46  ;;  %v1584_v57 = vadd.f32 %v2674_v2, %v1545_v54  ;;  %v1585_v58 = vadd.f32 %v2674_v2, %v1546_v55  ;;  %v1548_v60 = vld [vmem:[#allocation2 + $0xf8] sm:$0xff] }
 0x1d0   : > { %1612 = vst [vmem:[%s2569_s29 + $0xb0] sm:$0xff] %v1580_v47  ;;  %v1586_v59 = vadd.f32 %v2674_v2, %v1547_v56  ;;  %v1549_v61 = vld [vmem:[#allocation2 + $0x20] sm:$0xff]  ;;  %v1550_v62 = vld [vmem:[#allocation2 + $0x98] sm:$0xff]  ;;  %1613 = vst [vmem:[%s2569_s29 + $0xb8] sm:$0xff] %v1581_v51  ;;  %v1587_v63 = vadd.f32 %v2674_v2, %v1548_v60 }
 0x1d1   : > { %1614 = vst [vmem:[%s2569_s29 + $0xc0] sm:$0xff] %v1582_v52  ;;  %1615 = vst [vmem:[%s2569_s29 + $0xc8] sm:$0xff] %v1583_v53  ;;  %v1588_v0 = vadd.f32 %v2674_v2, %v1549_v61  ;;  %v1589_v1 = vadd.f32 %v2674_v2, %v1550_v62 }
 0x1d2   : > { %1616 = vst [vmem:[%s2569_s29 + $0xd0] sm:$0xff] %v1584_v57  ;;  %1617 = vst [vmem:[%s2569_s29 + $0xd8] sm:$0xff] %v1585_v58 }
 0x1d3   : > { %1618 = vst [vmem:[%s2569_s29 + $0xe0] sm:$0xff] %v1586_v59  ;;  %1619 = vst [vmem:[%s2569_s29 + $0xe8] sm:$0xff] %v1587_v63 }
 0x1d4   : > { %1620 = vst [vmem:[%s2569_s29 + $0xf0] sm:$0xff] %v1588_v0  ;;  %1621 = vst [vmem:[%s2569_s29 + $0xf8] sm:$0xff] %v1589_v1 }
 0x1d5 PF: > { %s13_s18 = sadd.s32 1, %s2340_s18   ;;  %s2765_s12 = smov %s2320_s13 }
 0x1d6   : > { %p10_p0 = scmp.ge.s32.totalorder %s13_s18, 6   ;;  %s2766_s13 = smov %s2414_s25 }
 0x1d7   : > { %s2767_s14 = smov %s2332_s16  ;;  %s2768_s15 = smov %s2336_s17 }
 0x1d8   : > { %s2769_s16 = smov %s2772_s19  ;;  %s2770_s17 = smov %s2776_s20 }
 0x1d9   :  { %12 = sbr.rel (!%p10_p0) target bundleno = 4 (0x4), region = 104 }

// kernel: discriminator_forward.21
= control target key start
LH: loop header
LB: loop body
LE: loop exit
PB: predicated region body
PF: predicated region fallthrough
CT: control target
= control target key end

     0   :  { %s2363_s12 = smov 0   ;;  %s2365_s13 = smov 0   ;;  %s2761_s0 = inlined_call_operand.vmem [shape: bf16[2,256,2048], index: 0, kind: input, shape index: {}]   ;;  %s2762_s1 = inlined_call_operand.vmem [shape: bf16[2048,128], index: 1, kind: input, shape index: {}]   ;;  %s2763_s2 = inlined_call_operand.vmem [shape: f32[1,128], index: 2, kind: input, shape index: {}]   ;;  %s2764_s3 = inlined_call_operand.vmem [shape: f32[2,256,128], index: 3, kind: output, shape index: {}]  }
   0x1   :  { %s2367_s14 = smov 0   ;;  %s2369_s15 = smov 0  }
   0x2   :  { %s2371_s16 = smov 0   ;;  %s2373_s17 = smov 0  }
   0x3   :  { %s2375_s18 = smov 0  }
   0x4 LB: > { %s28_s19 = sadd.s32 1, %s2332_s16  ;;  %s39_s20 = sadd.s32 1, %s2336_s17  ;;  %s2340_s18 = sphi %s2375_s18, %s13_s18   ;;  %s2336_s17 = sphi %s2373_s17, %s2770_s17   ;;  %s2332_s16 = sphi %s2371_s16, %s2769_s16   ;;  %s2328_s15 = sphi %s2369_s15, %s2768_s15   ;;  %s2324_s14 = sphi %s2367_s14, %s2767_s14   ;;  %s2320_s13 = sphi %s2365_s13, %s2766_s13   ;;  %s2316_s12 = sphi %s2363_s12, %s2765_s12  }
   0x5   : > { %p29_p0 = scmp.ge.s32.totalorder %s28_s19, 4  ;;  %p57_p1 = scmp.ne.s32.totalorder %s2320_s13, %s2316_s12 }
   0x6   : > { %p58_p2 = scmp.eq.s32.totalorder %s2340_s18, 0  ;;  %s50_s24 = sadd.s32 1, %s2320_s13 }
   0x7   : > { %s2772_s19 = smov (%p29_p0, %s28_s19), 0  ;;  %s2774_s20 = smov (!%p29_p0, %s39_s20), %s2336_s17 }
   0x8   : > { %p59_p3 = por %p58_p2, %p57_p1  ;;  %p41_p4 = scmp.ge.s32.totalorder %s2774_s20, 2 }
   0x9   : > { %s46_s21 = ssub.s32 %s2332_s16, %s2772_s19  ;;  %p1764_p6 = scmp.ge.s32.totalorder %s2340_s18, 8 }
   0xa   : > { %s2776_s20 = smov (%p41_p4, %s2774_s20), 0 }
   0xb   : > { %s43_s22 = ssub.s32 %s2336_s17, %s2776_s20  ;;  %173 = sbr.rel (%p1764_p6) target bundleno = 55 (0x37), region = 20 }
   0xc   : > { %s47_s23 = sor.u32 %s46_s21, %s43_s22 }
   0xd   : > { %p48_p5 = scmp.eq.s32.totalorder %s47_s23, 0 }
   0xf   : > { %s2414_s25 = scalar_select %p48_p5, %s2320_s13, %s50_s24  }
  0x10   : > { %176 = sbr.rel (!%p59_p3) target bundleno = 55 (0x37), region = 24  ;;  %s178_s26 = sand.u32 (%p59_p3), 1, %s2320_s13  }
  0x11   : > { %s1766_s27 = sshll.u32 (%p59_p3), %s2332_s16, 2  ;;  %s1765_s28 = sshll.u32 (%p59_p3), %s178_s26, 9 }
  0x12   : > { %s1767_s29 = sshll.u32 (%p59_p3), %s2336_s17, 9  ;;  %s2428_s8 = scalar_lea.vmem (%p59_p3), [#allocation3], %s1765_s28 }
  0x13   : > { %s186_s30 = sadd.s32 (%p59_p3), %s1767_s29, %s1766_s27 }
  0x14   : > { %s1768_s4 = sshll.u32 (%p59_p3), %s186_s30, 2 }
  0x15   : > { %s2423_s7 = scalar_lea.vmem %s2761_s0, %s1768_s4 }
  0x16   : > { %v201_v0 = vld [vmem:[%s2423_s7] sm:$0xff]  ;;  %v203_v1 = vld [vmem:[%s2423_s7 + $0x8] sm:$0xff] }
  0x17   : > { %v205_v2 = vld [vmem:[%s2423_s7 + $0x40] sm:$0xff]  ;;  %202 = vst [vmem:[%s2428_s8] sm:$0xff] %v201_v0  ;;  %204 = vst [vmem:[%s2428_s8 + $0x8] sm:$0xff] %v203_v1  ;;  %v207_v3 = vld [vmem:[%s2423_s7 + $0x48] sm:$0xff] }
  0x18   : > { %206 = vst [vmem:[%s2428_s8 + $0x10] sm:$0xff] %v205_v2  ;;  %v209_v4 = vld [vmem:[%s2423_s7 + $0x80] sm:$0xff]  ;;  %v211_v5 = vld [vmem:[%s2423_s7 + $0x88] sm:$0xff]  ;;  %208 = vst [vmem:[%s2428_s8 + $0x18] sm:$0xff] %v207_v3 }
  0x19   : > { %210 = vst [vmem:[%s2428_s8 + $0x20] sm:$0xff] %v209_v4  ;;  %212 = vst [vmem:[%s2428_s8 + $0x28] sm:$0xff] %v211_v5  ;;  %v213_v6 = vld [vmem:[%s2423_s7 + $0xc0] sm:$0xff]  ;;  %v215_v7 = vld [vmem:[%s2423_s7 + $0xc8] sm:$0xff] }
  0x1a   : > { %v217_v8 = vld [vmem:[%s2423_s7 + $0x100] sm:$0xff]  ;;  %214 = vst [vmem:[%s2428_s8 + $0x30] sm:$0xff] %v213_v6  ;;  %216 = vst [vmem:[%s2428_s8 + $0x38] sm:$0xff] %v215_v7  ;;  %v219_v9 = vld [vmem:[%s2423_s7 + $0x108] sm:$0xff] }
  0x1b   : > { %218 = vst [vmem:[%s2428_s8 + $0x40] sm:$0xff] %v217_v8  ;;  %v221_v10 = vld [vmem:[%s2423_s7 + $0x140] sm:$0xff]  ;;  %v223_v11 = vld [vmem:[%s2423_s7 + $0x148] sm:$0xff]  ;;  %220 = vst [vmem:[%s2428_s8 + $0x48] sm:$0xff] %v219_v9 }
  0x1c   : > { %222 = vst [vmem:[%s2428_s8 + $0x50] sm:$0xff] %v221_v10  ;;  %224 = vst [vmem:[%s2428_s8 + $0x58] sm:$0xff] %v223_v11  ;;  %v225_v12 = vld [vmem:[%s2423_s7 + $0x180] sm:$0xff]  ;;  %v227_v13 = vld [vmem:[%s2423_s7 + $0x188] sm:$0xff] }
  0x1d   : > { %v229_v14 = vld [vmem:[%s2423_s7 + $0x1c0] sm:$0xff]  ;;  %226 = vst [vmem:[%s2428_s8 + $0x60] sm:$0xff] %v225_v12  ;;  %228 = vst [vmem:[%s2428_s8 + $0x68] sm:$0xff] %v227_v13  ;;  %v231_v15 = vld [vmem:[%s2423_s7 + $0x1c8] sm:$0xff] }
  0x1e   : > { %230 = vst [vmem:[%s2428_s8 + $0x70] sm:$0xff] %v229_v14  ;;  %v233_v16 = vld [vmem:[%s2423_s7 + $0x200] sm:$0xff]  ;;  %v235_v17 = vld [vmem:[%s2423_s7 + $0x208] sm:$0xff]  ;;  %232 = vst [vmem:[%s2428_s8 + $0x78] sm:$0xff] %v231_v15 }
  0x1f   : > { %234 = vst [vmem:[%s2428_s8 + $0x80] sm:$0xff] %v233_v16  ;;  %236 = vst [vmem:[%s2428_s8 + $0x88] sm:$0xff] %v235_v17  ;;  %v237_v18 = vld [vmem:[%s2423_s7 + $0x240] sm:$0xff]  ;;  %v239_v19 = vld [vmem:[%s2423_s7 + $0x248] sm:$0xff] }
  0x20   : > { %v241_v20 = vld [vmem:[%s2423_s7 + $0x280] sm:$0xff]  ;;  %238 = vst [vmem:[%s2428_s8 + $0x90] sm:$0xff] %v237_v18  ;;  %240 = vst [vmem:[%s2428_s8 + $0x98] sm:$0xff] %v239_v19  ;;  %v243_v21 = vld [vmem:[%s2423_s7 + $0x288] sm:$0xff] }
  0x21   : > { %242 = vst [vmem:[%s2428_s8 + $0xa0] sm:$0xff] %v241_v20  ;;  %v245_v22 = vld [vmem:[%s2423_s7 + $0x2c0] sm:$0xff]  ;;  %v247_v23 = vld [vmem:[%s2423_s7 + $0x2c8] sm:$0xff]  ;;  %244 = vst [vmem:[%s2428_s8 + $0xa8] sm:$0xff] %v243_v21 }
  0x22   : > { %246 = vst [vmem:[%s2428_s8 + $0xb0] sm:$0xff] %v245_v22  ;;  %248 = vst [vmem:[%s2428_s8 + $0xb8] sm:$0xff] %v247_v23  ;;  %v249_v24 = vld [vmem:[%s2423_s7 + $0x300] sm:$0xff]  ;;  %v251_v25 = vld [vmem:[%s2423_s7 + $0x308] sm:$0xff] }
  0x23   : > { %v253_v26 = vld [vmem:[%s2423_s7 + $0x340] sm:$0xff]  ;;  %250 = vst [vmem:[%s2428_s8 + $0xc0] sm:$0xff] %v249_v24  ;;  %252 = vst [vmem:[%s2428_s8 + $0xc8] sm:$0xff] %v251_v25  ;;  %v255_v27 = vld [vmem:[%s2423_s7 + $0x348] sm:$0xff] }
  0x24   : > { %254 = vst [vmem:[%s2428_s8 + $0xd0] sm:$0xff] %v253_v26  ;;  %v257_v28 = vld [vmem:[%s2423_s7 + $0x380] sm:$0xff]  ;;  %v259_v29 = vld [vmem:[%s2423_s7 + $0x388] sm:$0xff]  ;;  %256 = vst [vmem:[%s2428_s8 + $0xd8] sm:$0xff] %v255_v27 }
  0x25   : > { %258 = vst [vmem:[%s2428_s8 + $0xe0] sm:$0xff] %v257_v28  ;;  %260 = vst [vmem:[%s2428_s8 + $0xe8] sm:$0xff] %v259_v29  ;;  %v261_v30 = vld [vmem:[%s2423_s7 + $0x3c0] sm:$0xff]  ;;  %v263_v31 = vld [vmem:[%s2423_s7 + $0x3c8] sm:$0xff] }
  0x26   : > { %v265_v32 = vld [vmem:[%s2423_s7 + $0x400] sm:$0xff]  ;;  %262 = vst [vmem:[%s2428_s8 + $0xf0] sm:$0xff] %v261_v30  ;;  %264 = vst [vmem:[%s2428_s8 + $0xf8] sm:$0xff] %v263_v31  ;;  %v267_v33 = vld [vmem:[%s2423_s7 + $0x408] sm:$0xff] }
  0x27   : > { %266 = vst [vmem:[%s2428_s8 + $0x100] sm:$0xff] %v265_v32  ;;  %v269_v34 = vld [vmem:[%s2423_s7 + $0x440] sm:$0xff]  ;;  %v271_v35 = vld [vmem:[%s2423_s7 + $0x448] sm:$0xff]  ;;  %268 = vst [vmem:[%s2428_s8 + $0x108] sm:$0xff] %v267_v33 }
  0x28   : > { %270 = vst [vmem:[%s2428_s8 + $0x110] sm:$0xff] %v269_v34  ;;  %272 = vst [vmem:[%s2428_s8 + $0x118] sm:$0xff] %v271_v35  ;;  %v273_v36 = vld [vmem:[%s2423_s7 + $0x480] sm:$0xff]  ;;  %v275_v37 = vld [vmem:[%s2423_s7 + $0x488] sm:$0xff] }
  0x29   : > { %v277_v38 = vld [vmem:[%s2423_s7 + $0x4c0] sm:$0xff]  ;;  %274 = vst [vmem:[%s2428_s8 + $0x120] sm:$0xff] %v273_v36  ;;  %276 = vst [vmem:[%s2428_s8 + $0x128] sm:$0xff] %v275_v37  ;;  %v279_v39 = vld [vmem:[%s2423_s7 + $0x4c8] sm:$0xff] }
  0x2a   : > { %278 = vst [vmem:[%s2428_s8 + $0x130] sm:$0xff] %v277_v38  ;;  %v281_v40 = vld [vmem:[%s2423_s7 + $0x500] sm:$0xff]  ;;  %v283_v41 = vld [vmem:[%s2423_s7 + $0x508] sm:$0xff]  ;;  %280 = vst [vmem:[%s2428_s8 + $0x138] sm:$0xff] %v279_v39 }
  0x2b   : > { %282 = vst [vmem:[%s2428_s8 + $0x140] sm:$0xff] %v281_v40  ;;  %284 = vst [vmem:[%s2428_s8 + $0x148] sm:$0xff] %v283_v41  ;;  %v285_v42 = vld [vmem:[%s2423_s7 + $0x540] sm:$0xff]  ;;  %v287_v43 = vld [vmem:[%s2423_s7 + $0x548] sm:$0xff] }
  0x2c   : > { %v289_v44 = vld [vmem:[%s2423_s7 + $0x580] sm:$0xff]  ;;  %286 = vst [vmem:[%s2428_s8 + $0x150] sm:$0xff] %v285_v42  ;;  %288 = vst [vmem:[%s2428_s8 + $0x158] sm:$0xff] %v287_v43  ;;  %v291_v45 = vld [vmem:[%s2423_s7 + $0x588] sm:$0xff] }
  0x2d   : > { %290 = vst [vmem:[%s2428_s8 + $0x160] sm:$0xff] %v289_v44  ;;  %v293_v46 = vld [vmem:[%s2423_s7 + $0x5c0] sm:$0xff]  ;;  %v295_v47 = vld [vmem:[%s2423_s7 + $0x5c8] sm:$0xff]  ;;  %292 = vst [vmem:[%s2428_s8 + $0x168] sm:$0xff] %v291_v45 }
  0x2e   : > { %294 = vst [vmem:[%s2428_s8 + $0x170] sm:$0xff] %v293_v46  ;;  %296 = vst [vmem:[%s2428_s8 + $0x178] sm:$0xff] %v295_v47  ;;  %v297_v48 = vld [vmem:[%s2423_s7 + $0x600] sm:$0xff]  ;;  %v299_v49 = vld [vmem:[%s2423_s7 + $0x608] sm:$0xff] }
  0x2f   : > { %v301_v50 = vld [vmem:[%s2423_s7 + $0x640] sm:$0xff]  ;;  %298 = vst [vmem:[%s2428_s8 + $0x180] sm:$0xff] %v297_v48  ;;  %300 = vst [vmem:[%s2428_s8 + $0x188] sm:$0xff] %v299_v49  ;;  %v303_v51 = vld [vmem:[%s2423_s7 + $0x648] sm:$0xff] }
  0x30   : > { %302 = vst [vmem:[%s2428_s8 + $0x190] sm:$0xff] %v301_v50  ;;  %v305_v52 = vld [vmem:[%s2423_s7 + $0x680] sm:$0xff]  ;;  %v307_v53 = vld [vmem:[%s2423_s7 + $0x688] sm:$0xff]  ;;  %304 = vst [vmem:[%s2428_s8 + $0x198] sm:$0xff] %v303_v51 }
  0x31   : > { %306 = vst [vmem:[%s2428_s8 + $0x1a0] sm:$0xff] %v305_v52  ;;  %308 = vst [vmem:[%s2428_s8 + $0x1a8] sm:$0xff] %v307_v53  ;;  %v309_v54 = vld [vmem:[%s2423_s7 + $0x6c0] sm:$0xff]  ;;  %v311_v55 = vld [vmem:[%s2423_s7 + $0x6c8] sm:$0xff] }
  0x32   : > { %v313_v56 = vld [vmem:[%s2423_s7 + $0x700] sm:$0xff]  ;;  %310 = vst [vmem:[%s2428_s8 + $0x1b0] sm:$0xff] %v309_v54  ;;  %312 = vst [vmem:[%s2428_s8 + $0x1b8] sm:$0xff] %v311_v55  ;;  %v315_v57 = vld [vmem:[%s2423_s7 + $0x708] sm:$0xff] }
  0x33   : > { %314 = vst [vmem:[%s2428_s8 + $0x1c0] sm:$0xff] %v313_v56  ;;  %v317_v58 = vld [vmem:[%s2423_s7 + $0x740] sm:$0xff]  ;;  %v319_v59 = vld [vmem:[%s2423_s7 + $0x748] sm:$0xff]  ;;  %316 = vst [vmem:[%s2428_s8 + $0x1c8] sm:$0xff] %v315_v57 }
  0x34   : > { %318 = vst [vmem:[%s2428_s8 + $0x1d0] sm:$0xff] %v317_v58  ;;  %320 = vst [vmem:[%s2428_s8 + $0x1d8] sm:$0xff] %v319_v59  ;;  %v321_v60 = vld [vmem:[%s2423_s7 + $0x780] sm:$0xff]  ;;  %v323_v61 = vld [vmem:[%s2423_s7 + $0x788] sm:$0xff] }
  0x35   : > { %v325_v62 = vld [vmem:[%s2423_s7 + $0x7c0] sm:$0xff]  ;;  %322 = vst [vmem:[%s2428_s8 + $0x1e0] sm:$0xff] %v321_v60  ;;  %324 = vst [vmem:[%s2428_s8 + $0x1e8] sm:$0xff] %v323_v61  ;;  %v327_v63 = vld [vmem:[%s2423_s7 + $0x7c8] sm:$0xff] }
  0x36   : > { %326 = vst [vmem:[%s2428_s8 + $0x1f0] sm:$0xff] %v325_v62  ;;  %328 = vst [vmem:[%s2428_s8 + $0x1f8] sm:$0xff] %v327_v63 }
  0x37 PF: > { %p1769_p7 = scmp.ge.s32.totalorder %s2340_s18, 1  ;;  %p345_p8 = scmp.lt.s32.totalorder %s2340_s18, 9 }
  0x39   : > { %p346_p9 = pnand %p1769_p7, %p345_p8 }
  0x3a   : > { %s352_s9 = sand.u32 (!%p346_p9), 1, %s2316_s12   ;;  %s1771_s10 = sshll.u32 (!%p346_p9), %s2324_s14, 6 }
  0x3b   : > { %349 = sbr.rel (%p346_p9) target bundleno = 469 (0x1d5), region = 51  ;;  %s1770_s11 = sshll.u32 (!%p346_p9), %s352_s9, 9 }
  0x3c   : > { %p396_p10 = scmp.lt.s32.totalorder (!%p346_p9), %s1771_s10, 255  ;;  %p408_p11 = scmp.lt.s32.totalorder (!%p346_p9), %s2328_s15, 1 }
  0x3d   : > { %s2571_s30 = scalar_lea.vmem (!%p346_p9), [#allocation3], %s1770_s11  ;;  %p1775_p12 = scmp.ne.s32.totalorder (!%p346_p9), %s2324_s14, 0 }
  0x40   : > { %s2778_s10 = smov (!%p396_p10, %s1771_s10), 255  ;;  %s2780_s15 = smov (!%p408_p11, %s2328_s15), 1 }
  0x41   : > { %s1772_s21 = sshll.u32 %s2778_s10, 2  ;;  %s1876_s26 = sshll.u32 %s2780_s15, 8 }
  0x42   : > { %s2564_s24 = scalar_lea.vmem %s2762_s1, %s1772_s21  ;;  %s2569_s29 = scalar_lea.vmem %s2764_s3, %s1876_s26 }
  0x43   : > { %424 = sbr.rel (%p1775_p12) target bundleno = 89 (0x59), region = 59 }
  0x48   : > { %v2342_v0 = vmov 0.0  }
  0x49   : > { %425 = vst [vmem:[#allocation2 + $0xb0] sm:$0xff] %v2342_v0  ;;  %426 = vst [vmem:[#allocation2] sm:$0xff] %v2342_v0 }
  0x4a   : > { %427 = vst [vmem:[#allocation2 + $0xd8] sm:$0xff] %v2342_v0  ;;  %428 = vst [vmem:[#allocation2 + $0x18] sm:$0xff] %v2342_v0 }
  0x4b   : > { %429 = vst [vmem:[#allocation2 + $0x50] sm:$0xff] %v2342_v0  ;;  %430 = vst [vmem:[#allocation2 + $0x68] sm:$0xff] %v2342_v0 }
  0x4c   : > { %431 = vst [vmem:[#allocation2 + $0x30] sm:$0xff] %v2342_v0  ;;  %432 = vst [vmem:[#allocation2 + $0x48] sm:$0xff] %v2342_v0 }
  0x4d   : > { %433 = vst [vmem:[#allocation2 + $0x80] sm:$0xff] %v2342_v0  ;;  %434 = vst [vmem:[#allocation2 + $0x88] sm:$0xff] %v2342_v0 }
  0x4e   : > { %435 = vst [vmem:[#allocation2 + $0xe8] sm:$0xff] %v2342_v0  ;;  %436 = vst [vmem:[#allocation2 + $0xb8] sm:$0xff] %v2342_v0 }
  0x4f   : > { %437 = vst [vmem:[#allocation2 + $0x60] sm:$0xff] %v2342_v0  ;;  %438 = vst [vmem:[#allocation2 + $0xf0] sm:$0xff] %v2342_v0 }
  0x50   : > { %439 = vst [vmem:[#allocation2 + $0x8] sm:$0xff] %v2342_v0  ;;  %440 = vst [vmem:[#allocation2 + $0x78] sm:$0xff] %v2342_v0 }
  0x51   : > { %441 = vst [vmem:[#allocation2 + $0x38] sm:$0xff] %v2342_v0  ;;  %442 = vst [vmem:[#allocation2 + $0x58] sm:$0xff] %v2342_v0 }
  0x52   : > { %443 = vst [vmem:[#allocation2 + $0x40] sm:$0xff] %v2342_v0  ;;  %444 = vst [vmem:[#allocation2 + $0xc8] sm:$0xff] %v2342_v0 }
  0x53   : > { %445 = vst [vmem:[#allocation2 + $0xe0] sm:$0xff] %v2342_v0  ;;  %446 = vst [vmem:[#allocation2 + $0x90] sm:$0xff] %v2342_v0 }
  0x54   : > { %447 = vst [vmem:[#allocation2 + $0x70] sm:$0xff] %v2342_v0  ;;  %448 = vst [vmem:[#allocation2 + $0xc0] sm:$0xff] %v2342_v0 }
  0x55   : > { %449 = vst [vmem:[#allocation2 + $0xa8] sm:$0xff] %v2342_v0  ;;  %450 = vst [vmem:[#allocation2 + $0xd0] sm:$0xff] %v2342_v0 }
  0x56   : > { %451 = vst [vmem:[#allocation2 + $0x10] sm:$0xff] %v2342_v0  ;;  %452 = vst [vmem:[#allocation2 + $0x28] sm:$0xff] %v2342_v0 }
  0x57   : > { %453 = vst [vmem:[#allocation2 + $0xa0] sm:$0xff] %v2342_v0  ;;  %454 = vst [vmem:[#allocation2 + $0xf8] sm:$0xff] %v2342_v0 }
  0x58   : > { %455 = vst [vmem:[#allocation2 + $0x20] sm:$0xff] %v2342_v0  ;;  %456 = vst [vmem:[#allocation2 + $0x98] sm:$0xff] %v2342_v0 }
  0x59 PF: > { %v2158_v1 = vld [vmem:[%s2564_s24 + $0x78] sm:$0xff]   ;;  %v2162_v5 = vld [vmem:[%s2564_s24 + $0x70] sm:$0xff]   ;;  %v2166_v9 = vld [vmem:[%s2564_s24 + $0x68] sm:$0xff]   ;;  %p1872_p13 = scmp.ne.s32.totalorder %s2324_s14, 3 }
  0x5a   : > { %v2159_v2 = vld [vmem:[%s2564_s24 + $0xf8] sm:$0xff]   ;;  %1877 = vmatprep.subr.bf16.mxu0 %v2158_v1  ;;  %v2163_v6 = vld [vmem:[%s2564_s24 + $0xf0] sm:$0xff]   ;;  %v2167_v10 = vld [vmem:[%s2564_s24 + $0xe8] sm:$0xff]  }
  0x5b   : > { %v2160_v3 = vld [vmem:[%s2564_s24 + $0x38] sm:$0xff]   ;;  %1989 = vmatprep.subr.bf16.mxu1 %v2159_v2  ;;  %v2164_v7 = vld [vmem:[%s2564_s24 + $0x30] sm:$0xff]   ;;  %v2168_v11 = vld [vmem:[%s2564_s24 + $0x28] sm:$0xff]  }
  0x5c   : > { %v2161_v4 = vld [vmem:[%s2564_s24 + $0xb8] sm:$0xff]   ;;  %1878 = vmatpush3.bf16.msra.mxu0 %v2160_v3  ;;  %v2165_v8 = vld [vmem:[%s2564_s24 + $0xb0] sm:$0xff]   ;;  %v2169_v12 = vld [vmem:[%s2564_s24 + $0xa8] sm:$0xff]  }
  0x5d   : > { %1990 = vmatpush3.bf16.msra.mxu1 %v2161_v4  ;;  %1879 = vmatprep.subr.bf16.mxu0 %v2162_v5  ;;  %v2170_v13 = vld [vmem:[%s2564_s24 + $0x60] sm:$0xff]   ;;  %v2174_v17 = vld [vmem:[%s2564_s24 + $0x58] sm:$0xff]   ;;  %v2178_v21 = vld [vmem:[%s2564_s24 + $0x50] sm:$0xff]  }
  0x5e   : > { %1991 = vmatprep.subr.bf16.mxu1 %v2163_v6  ;;  %v2171_v14 = vld [vmem:[%s2564_s24 + $0xe0] sm:$0xff]   ;;  %v2175_v18 = vld [vmem:[%s2564_s24 + $0xd8] sm:$0xff]   ;;  %v2179_v22 = vld [vmem:[%s2564_s24 + $0xd0] sm:$0xff]  }
  0x5f   : > { %v2172_v15 = vld [vmem:[%s2564_s24 + $0x20] sm:$0xff]   ;;  %v2176_v19 = vld [vmem:[%s2564_s24 + $0x18] sm:$0xff]   ;;  %v2180_v23 = vld [vmem:[%s2564_s24 + $0x10] sm:$0xff]  }
  0x60   : > { %1880 = vmatpush3.bf16.msra.mxu0 %v2164_v7  ;;  %v2173_v16 = vld [vmem:[%s2564_s24 + $0xa0] sm:$0xff]   ;;  %v2177_v20 = vld [vmem:[%s2564_s24 + $0x98] sm:$0xff]   ;;  %v2181_v24 = vld [vmem:[%s2564_s24 + $0x90] sm:$0xff]  }
  0x61   : > { %1992 = vmatpush3.bf16.msra.mxu1 %v2165_v8  ;;  %1881 = vmatprep.subr.bf16.mxu0 %v2166_v9  ;;  %v2182_v25 = vld [vmem:[%s2564_s24 + $0x48] sm:$0xff]   ;;  %v2186_v29 = vld [vmem:[%s2564_s24 + $0x40] sm:$0xff]  }
  0x62   : > { %1993 = vmatprep.subr.bf16.mxu1 %v2167_v10  ;;  %v2183_v26 = vld [vmem:[%s2564_s24 + $0xc8] sm:$0xff]   ;;  %v2187_v30 = vld [vmem:[%s2564_s24 + $0xc0] sm:$0xff]  }
  0x63   : > { %v2184_v27 = vld [vmem:[%s2564_s24 + $0x8] sm:$0xff]   ;;  %v2188_v31 = vld [vmem:[%s2564_s24] sm:$0xff]  }
  0x64   : > { %1882 = vmatpush3.bf16.msra.mxu0 %v2168_v11  ;;  %v2185_v28 = vld [vmem:[%s2564_s24 + $0x88] sm:$0xff]   ;;  %v2189_v32 = vld [vmem:[%s2564_s24 + $0x80] sm:$0xff]  }
  0x65   : > { %1994 = vmatpush3.bf16.msra.mxu1 %v2169_v12  ;;  %1883 = vmatprep.subr.bf16.mxu0 %v2170_v13  ;;  %v2190_v33 = vld [vmem:[%s2571_s30] ss:$16 sps:$4 sm:$0xff]   ;;  %v2192_v34 = vld [vmem:[%s2571_s30 + $0x4] ss:$16 sps:$4 sm:$0xff]   ;;  %v2193_v35 = vld [vmem:[%s2571_s30 + $0x8] ss:$16 sps:$4 sm:$0xff]  }
  0x66   : > { %1995 = vmatprep.subr.bf16.mxu1 %v2171_v14  ;;  %v2195_v36 = vld [vmem:[%s2571_s30 + $0xc] ss:$16 sps:$4 sm:$0xff]   ;;  %1161 = vmatprep.mubr.bf16.mxu0 %v2192_v34  ;;  %v2196_v37 = vld [vmem:[%s2571_s30 + $0x24] ss:$16 sps:$4 sm:$0xff]   ;;  %v2200_v39 = vld [vmem:[%s2571_s30 + $0x20] ss:$16 sps:$4 sm:$0xff]  }
  0x67   : > { %1322 = vmatprep.mubr.bf16.mxu1 %v2195_v36  ;;  %v2198_v38 = vld [vmem:[%s2571_s30 + $0x2c] ss:$16 sps:$4 sm:$0xff]   ;;  %v2201_v40 = vld [vmem:[%s2571_s30 + $0x28] ss:$16 sps:$4 sm:$0xff]   ;;  %v2202_v41 = vld [vmem:[%s2571_s30 + $0x44] ss:$16 sps:$4 sm:$0xff]  }
  0x68   : > { %1884 = vmatpush3.bf16.msra.mxu0 %v2172_v15  ;;  %v2204_v42 = vld [vmem:[%s2571_s30 + $0x4c] ss:$16 sps:$4 sm:$0xff]   ;;  %v2206_v43 = vld [vmem:[%s2571_s30 + $0x40] ss:$16 sps:$4 sm:$0xff]   ;;  %v2207_v44 = vld [vmem:[%s2571_s30 + $0x48] ss:$16 sps:$4 sm:$0xff]  }
  0x69   : > { %1996 = vmatpush3.bf16.msra.mxu1 %v2173_v16  ;;  %1885 = vmatprep.subr.bf16.mxu0 %v2174_v17  ;;  %v2208_v45 = vld [vmem:[%s2571_s30 + $0x64] ss:$16 sps:$4 sm:$0xff]   ;;  %v2210_v46 = vld [vmem:[%s2571_s30 + $0x6c] ss:$16 sps:$4 sm:$0xff]   ;;  %v2212_v47 = vld [vmem:[%s2571_s30 + $0x60] ss:$16 sps:$4 sm:$0xff]  }
  0x6a   : > { %1997 = vmatprep.subr.bf16.mxu1 %v2175_v18  ;;  %v2213_v48 = vld [vmem:[%s2571_s30 + $0x68] ss:$16 sps:$4 sm:$0xff]   ;;  %v2214_v49 = vld [vmem:[%s2571_s30 + $0x84] ss:$16 sps:$4 sm:$0xff]   ;;  %v2216_v50 = vld [vmem:[%s2571_s30 + $0x8c] ss:$16 sps:$4 sm:$0xff]  }
  0x6b   : > { %v2218_v51 = vld [vmem:[%s2571_s30 + $0x80] ss:$16 sps:$4 sm:$0xff]   ;;  %v2219_v52 = vld [vmem:[%s2571_s30 + $0x88] ss:$16 sps:$4 sm:$0xff]   ;;  %v2220_v53 = vld [vmem:[%s2571_s30 + $0xa4] ss:$16 sps:$4 sm:$0xff]  }
  0x6c   : > { %1886 = vmatpush3.bf16.msra.mxu0 %v2176_v19  ;;  %v2222_v54 = vld [vmem:[%s2571_s30 + $0xac] ss:$16 sps:$4 sm:$0xff]   ;;  %v2224_v55 = vld [vmem:[%s2571_s30 + $0xa0] ss:$16 sps:$4 sm:$0xff]   ;;  %v2225_v56 = vld [vmem:[%s2571_s30 + $0xa8] ss:$16 sps:$4 sm:$0xff]  }
  0x6d   : > { %1998 = vmatpush3.bf16.msra.mxu1 %v2177_v20  ;;  %1887 = vmatprep.subr.bf16.mxu0 %v2178_v21  ;;  %v2226_v57 = vld [vmem:[%s2571_s30 + $0xc4] ss:$16 sps:$4 sm:$0xff]   ;;  %v2228_v58 = vld [vmem:[%s2571_s30 + $0xcc] ss:$16 sps:$4 sm:$0xff]   ;;  %v2230_v59 = vld [vmem:[%s2571_s30 + $0xc0] ss:$16 sps:$4 sm:$0xff]  }
  0x6e   : > { %1999 = vmatprep.subr.bf16.mxu1 %v2179_v22  ;;  %v2231_v60 = vld [vmem:[%s2571_s30 + $0xc8] ss:$16 sps:$4 sm:$0xff]   ;;  %v2232_v61 = vld [vmem:[%s2571_s30 + $0xe4] ss:$16 sps:$4 sm:$0xff]   ;;  %v2234_v62 = vld [vmem:[%s2571_s30 + $0xec] ss:$16 sps:$4 sm:$0xff]  }
  0x6f   : > { %v2236_v63 = vld [vmem:[%s2571_s30 + $0xe0] ss:$16 sps:$4 sm:$0xff]   ;;  %v2237_v0 = vld [vmem:[%s2571_s30 + $0xe8] ss:$16 sps:$4 sm:$0xff]   ;;  %v2238_v1 = vld [vmem:[%s2571_s30 + $0x104] ss:$16 sps:$4 sm:$0xff]  }
  0x70   : > { %1888 = vmatpush3.bf16.msra.mxu0 %v2180_v23  ;;  %v2240_v2 = vld [vmem:[%s2571_s30 + $0x10c] ss:$16 sps:$4 sm:$0xff]   ;;  %v2242_v3 = vld [vmem:[%s2571_s30 + $0x100] ss:$16 sps:$4 sm:$0xff]   ;;  %v2243_v4 = vld [vmem:[%s2571_s30 + $0x108] ss:$16 sps:$4 sm:$0xff]  }
  0x71   : > { %2000 = vmatpush3.bf16.msra.mxu1 %v2181_v24  ;;  %1889 = vmatprep.subr.bf16.mxu0 %v2182_v25  ;;  %v2244_v5 = vld [vmem:[%s2571_s30 + $0x124] ss:$16 sps:$4 sm:$0xff]   ;;  %v2246_v6 = vld [vmem:[%s2571_s30 + $0x12c] ss:$16 sps:$4 sm:$0xff]   ;;  %v2248_v7 = vld [vmem:[%s2571_s30 + $0x120] ss:$16 sps:$4 sm:$0xff]  }
  0x72   : > { %2001 = vmatprep.subr.bf16.mxu1 %v2183_v26  ;;  %v2249_v8 = vld [vmem:[%s2571_s30 + $0x128] ss:$16 sps:$4 sm:$0xff]   ;;  %v2250_v9 = vld [vmem:[%s2571_s30 + $0x144] ss:$16 sps:$4 sm:$0xff]   ;;  %v2252_v10 = vld [vmem:[%s2571_s30 + $0x14c] ss:$16 sps:$4 sm:$0xff]  }
  0x73   : > { %v2254_v11 = vld [vmem:[%s2571_s30 + $0x140] ss:$16 sps:$4 sm:$0xff]   ;;  %v2255_v12 = vld [vmem:[%s2571_s30 + $0x148] ss:$16 sps:$4 sm:$0xff]   ;;  %v2256_v13 = vld [vmem:[%s2571_s30 + $0x164] ss:$16 sps:$4 sm:$0xff]  }
  0x74   : > { %1890 = vmatpush3.bf16.msra.mxu0 %v2184_v27  ;;  %v2258_v14 = vld [vmem:[%s2571_s30 + $0x16c] ss:$16 sps:$4 sm:$0xff]   ;;  %v2260_v15 = vld [vmem:[%s2571_s30 + $0x160] ss:$16 sps:$4 sm:$0xff]   ;;  %v2261_v16 = vld [vmem:[%s2571_s30 + $0x168] ss:$16 sps:$4 sm:$0xff]  }
  0x75   : > { %2002 = vmatpush3.bf16.msra.mxu1 %v2185_v28  ;;  %1891 = vmatprep.subr.bf16.mxu0 %v2186_v29  ;;  %v2262_v17 = vld [vmem:[%s2571_s30 + $0x184] ss:$16 sps:$4 sm:$0xff]   ;;  %v2264_v18 = vld [vmem:[%s2571_s30 + $0x18c] ss:$16 sps:$4 sm:$0xff]   ;;  %v2266_v19 = vld [vmem:[%s2571_s30 + $0x180] ss:$16 sps:$4 sm:$0xff]  }
  0x76   : > { %2003 = vmatprep.subr.bf16.mxu1 %v2187_v30  ;;  %v2267_v20 = vld [vmem:[%s2571_s30 + $0x188] ss:$16 sps:$4 sm:$0xff]   ;;  %v2268_v21 = vld [vmem:[%s2571_s30 + $0x1a4] ss:$16 sps:$4 sm:$0xff]   ;;  %v2270_v22 = vld [vmem:[%s2571_s30 + $0x1ac] ss:$16 sps:$4 sm:$0xff]  }
  0x77   : > { %v2272_v23 = vld [vmem:[%s2571_s30 + $0x1a0] ss:$16 sps:$4 sm:$0xff]   ;;  %v2273_v24 = vld [vmem:[%s2571_s30 + $0x1a8] ss:$16 sps:$4 sm:$0xff]   ;;  %v2274_v25 = vld [vmem:[%s2571_s30 + $0x1c4] ss:$16 sps:$4 sm:$0xff]  }
  0x78   : > { %1892 = vmatpush3.bf16.msra.mxu0 %v2188_v31  ;;  %v2276_v26 = vld [vmem:[%s2571_s30 + $0x1cc] ss:$16 sps:$4 sm:$0xff]   ;;  %v2278_v27 = vld [vmem:[%s2571_s30 + $0x1c0] ss:$16 sps:$4 sm:$0xff]   ;;  %v2279_v28 = vld [vmem:[%s2571_s30 + $0x1c8] ss:$16 sps:$4 sm:$0xff]  }
  0x79   : > { %2004 = vmatpush3.bf16.msra.mxu1 %v2189_v32  ;;  %v2280_v29 = vld [vmem:[%s2571_s30 + $0x1e4] ss:$16 sps:$4 sm:$0xff]   ;;  %v2282_v30 = vld [vmem:[%s2571_s30 + $0x1ec] ss:$16 sps:$4 sm:$0xff]   ;;  %v2284_v31 = vld [vmem:[%s2571_s30 + $0x1e0] ss:$16 sps:$4 sm:$0xff]  }
  0x7a   : > { %v2285_v32 = vld [vmem:[%s2571_s30 + $0x1e8] ss:$16 sps:$4 sm:$0xff]  }
  0x7b   : > { %1162 = vmatmul.mubr.bf16.vlgmr.msra.gmra.mxu0 %v2190_v33 }
  0x7c   : > { %1323 = vmatmul.mubr.bf16.vlgmr.msra.gmra.mxu1 %v2193_v35  ;;  %1169 = vmatprep.mubr.bf16.mxu0 %v2196_v37 }
  0x7d   : > { %1330 = vmatprep.mubr.bf16.mxu1 %v2198_v38 }
  0x83   : > { %1170 = vmatmul.mubr.bf16.gmra.mxu0 %v2200_v39 }
  0x84   : > { %1331 = vmatmul.mubr.bf16.gmra.mxu1 %v2201_v40  ;;  %1177 = vmatprep.mubr.bf16.mxu0 %v2202_v41  ;;  %v457_v40 = vld [vmem:[#allocation2 + $0xb0] sm:$0xff] }
  0x85   : > { %1338 = vmatprep.mubr.bf16.mxu1 %v2204_v42 }
  0x8b   : > { %1178 = vmatmul.mubr.bf16.gmra.mxu0 %v2206_v43 }
  0x8c   : > { %1339 = vmatmul.mubr.bf16.gmra.mxu1 %v2207_v44  ;;  %1185 = vmatprep.mubr.bf16.mxu0 %v2208_v45 }
  0x8d   : > { %1346 = vmatprep.mubr.bf16.mxu1 %v2210_v46 }
  0x93   : > { %1186 = vmatmul.mubr.bf16.gmra.mxu0 %v2212_v47 }
  0x94   : > { %1347 = vmatmul.mubr.bf16.gmra.mxu1 %v2213_v48  ;;  %1193 = vmatprep.mubr.bf16.mxu0 %v2214_v49  ;;  %v458_v49 = vld [vmem:[#allocation2] sm:$0xff] }
  0x95   : > { %1354 = vmatprep.mubr.bf16.mxu1 %v2216_v50 }
  0x9b   : > { %1194 = vmatmul.mubr.bf16.gmra.mxu0 %v2218_v51 }
  0x9c   : > { %1355 = vmatmul.mubr.bf16.gmra.mxu1 %v2219_v52  ;;  %1201 = vmatprep.mubr.bf16.mxu0 %v2220_v53 }
  0x9d   : > { %1362 = vmatprep.mubr.bf16.mxu1 %v2222_v54 }
  0xa3   : > { %1202 = vmatmul.mubr.bf16.gmra.mxu0 %v2224_v55 }
  0xa4   : > { %1363 = vmatmul.mubr.bf16.gmra.mxu1 %v2225_v56  ;;  %1209 = vmatprep.mubr.bf16.mxu0 %v2226_v57 }
  0xa5   : > { %1370 = vmatprep.mubr.bf16.mxu1 %v2228_v58  ;;  %v459_v58 = vld [vmem:[#allocation2 + $0xd8] sm:$0xff] }
  0xab   : > { %1210 = vmatmul.mubr.bf16.gmra.mxu0 %v2230_v59 }
  0xac   : > { %1371 = vmatmul.mubr.bf16.gmra.mxu1 %v2231_v60  ;;  %1217 = vmatprep.mubr.bf16.mxu0 %v2232_v61 }
  0xad   : > { %1378 = vmatprep.mubr.bf16.mxu1 %v2234_v62 }
  0xb3   : > { %1218 = vmatmul.mubr.bf16.gmra.mxu0 %v2236_v63 }
  0xb4   : > { %1379 = vmatmul.mubr.bf16.gmra.mxu1 %v2237_v0  ;;  %1225 = vmatprep.mubr.bf16.mxu0 %v2238_v1 }
  0xb5   : > { %1386 = vmatprep.mubr.bf16.mxu1 %v2240_v2 }
  0xbb   : > { %1226 = vmatmul.mubr.bf16.gmra.mxu0 %v2242_v3  ;;  %v460_v3 = vld [vmem:[#allocation2 + $0x18] sm:$0xff] }
  0xbc   : > { %1387 = vmatmul.mubr.bf16.gmra.mxu1 %v2243_v4  ;;  %1233 = vmatprep.mubr.bf16.mxu0 %v2244_v5 }
  0xbd   : > { %1394 = vmatprep.mubr.bf16.mxu1 %v2246_v6 }
  0xc3   : > { %1234 = vmatmul.mubr.bf16.gmra.mxu0 %v2248_v7 }
  0xc4   : > { %1395 = vmatmul.mubr.bf16.gmra.mxu1 %v2249_v8  ;;  %1241 = vmatprep.mubr.bf16.mxu0 %v2250_v9 }
  0xc5   : > { %1402 = vmatprep.mubr.bf16.mxu1 %v2252_v10 }
  0xcb   : > { %1242 = vmatmul.mubr.bf16.gmra.mxu0 %v2254_v11 }
  0xcc   : > { %1403 = vmatmul.mubr.bf16.gmra.mxu1 %v2255_v12  ;;  %1249 = vmatprep.mubr.bf16.mxu0 %v2256_v13  ;;  %v461_v12 = vld [vmem:[#allocation2 + $0x50] sm:$0xff] }
  0xcd   : > { %1410 = vmatprep.mubr.bf16.mxu1 %v2258_v14 }
  0xd3   : > { %1250 = vmatmul.mubr.bf16.gmra.mxu0 %v2260_v15 }
  0xd4   : > { %1411 = vmatmul.mubr.bf16.gmra.mxu1 %v2261_v16  ;;  %1257 = vmatprep.mubr.bf16.mxu0 %v2262_v17 }
  0xd5   : > { %1418 = vmatprep.mubr.bf16.mxu1 %v2264_v18 }
  0xdb   : > { %1258 = vmatmul.mubr.bf16.gmra.mxu0 %v2266_v19 }
  0xdc   : > { %1419 = vmatmul.mubr.bf16.gmra.mxu1 %v2267_v20  ;;  %1265 = vmatprep.mubr.bf16.mxu0 %v2268_v21  ;;  %v462_v21 = vld [vmem:[#allocation2 + $0x68] sm:$0xff] }
  0xdd   : > { %1426 = vmatprep.mubr.bf16.mxu1 %v2270_v22 }
  0xe3   : > { %1266 = vmatmul.mubr.bf16.gmra.mxu0 %v2272_v23 }
  0xe4   : > { %1427 = vmatmul.mubr.bf16.gmra.mxu1 %v2273_v24  ;;  %1273 = vmatprep.mubr.bf16.mxu0 %v2274_v25 }
  0xe5   : > { %1434 = vmatprep.mubr.bf16.mxu1 %v2276_v26 }
  0xeb   : > { %1274 = vmatmul.mubr.bf16.gmra.mxu0 %v2278_v27 }
  0xec   : > { %1435 = vmatmul.mubr.bf16.gmra.mxu1 %v2279_v28  ;;  %1281 = vmatprep.mubr.bf16.mxu0 %v2280_v29 }
  0xed   : > { %1442 = vmatprep.mubr.bf16.mxu1 %v2282_v30  ;;  %v463_v30 = vld [vmem:[#allocation2 + $0x30] sm:$0xff] }
  0xf3   : > { %1282 = vmatmul.mubr.bf16.gmra.mxu0 %v2284_v31 }
  0xf4   : > { %1443 = vmatmul.mubr.bf16.gmra.mxu1 %v2285_v32 }
 0x13b   : > { %v1893_v33 = vpop.f32.mrf.mxu0 }
 0x13c   : > { %v2005_v34 = vpop.f32.mrf.mxu1 }
 0x13d   : > { %v1894_v35 = vpop.f32.mrf.mxu0 }
 0x13e   : > { %v1895_v36 = vadd.f32 %v1894_v35, %v1893_v33  ;;  %v2006_v37 = vpop.f32.mrf.mxu1 }
 0x13f   : > { %v2007_v38 = vadd.f32 %v2006_v37, %v2005_v34  ;;  %v1896_v39 = vpop.f32.mrf.mxu0 }
 0x140   : > { %v2008_v41 = vpop.f32.mrf.mxu1 }
 0x141   : > { %v1325_v42 = vadd.f32 %v2007_v38, %v1895_v36  ;;  %v1897_v43 = vpop.f32.mrf.mxu0 }
 0x142   : > { %v1898_v44 = vadd.f32 %v1897_v43, %v1896_v39  ;;  %v2009_v45 = vpop.f32.mrf.mxu1  ;;  %v464_v39 = vld [vmem:[#allocation2 + $0x48] sm:$0xff] }
 0x143   : > { %v1451_v46 = vadd.f32 %v1325_v42, %v457_v40  ;;  %v2010_v47 = vadd.f32 %v2009_v45, %v2008_v41  ;;  %v1899_v48 = vpop.f32.mrf.mxu0 }
 0x144   : > { %v2011_v50 = vpop.f32.mrf.mxu1 }
 0x145   : > { %1483 = vst [vmem:[#allocation2 + $0xb0] sm:$0xff] %v1451_v46  ;;  %v1328_v51 = vadd.f32 %v2010_v47, %v1898_v44  ;;  %v1900_v52 = vpop.f32.mrf.mxu0 }
 0x146   : > { %v1901_v53 = vadd.f32 %v1900_v52, %v1899_v48  ;;  %v2012_v54 = vpop.f32.mrf.mxu1  ;;  %v465_v48 = vld [vmem:[#allocation2 + $0x80] sm:$0xff] }
 0x147   : > { %v1452_v55 = vadd.f32 %v1328_v51, %v458_v49  ;;  %v2013_v56 = vadd.f32 %v2012_v54, %v2011_v50  ;;  %v1902_v57 = vpop.f32.mrf.mxu0 }
 0x148   : > { %v2014_v59 = vpop.f32.mrf.mxu1 }
 0x149   : > { %1484 = vst [vmem:[#allocation2] sm:$0xff] %v1452_v55  ;;  %v1333_v60 = vadd.f32 %v2013_v56, %v1901_v53  ;;  %v1903_v61 = vpop.f32.mrf.mxu0 }
 0x14a   : > { %v1904_v62 = vadd.f32 %v1903_v61, %v1902_v57  ;;  %v2015_v63 = vpop.f32.mrf.mxu1  ;;  %v466_v57 = vld [vmem:[#allocation2 + $0x88] sm:$0xff] }
 0x14b   : > { %v1453_v0 = vadd.f32 %v1333_v60, %v459_v58  ;;  %v2016_v1 = vadd.f32 %v2015_v63, %v2014_v59  ;;  %v1905_v2 = vpop.f32.mrf.mxu0 }
 0x14c   : > { %v2017_v4 = vpop.f32.mrf.mxu1 }
 0x14d   : > { %1485 = vst [vmem:[#allocation2 + $0xd8] sm:$0xff] %v1453_v0  ;;  %v1336_v5 = vadd.f32 %v2016_v1, %v1904_v62  ;;  %v1906_v6 = vpop.f32.mrf.mxu0 }
 0x14e   : > { %v1907_v7 = vadd.f32 %v1906_v6, %v1905_v2  ;;  %v2018_v8 = vpop.f32.mrf.mxu1  ;;  %v467_v2 = vld [vmem:[#allocation2 + $0xe8] sm:$0xff] }
 0x14f   : > { %v1454_v9 = vadd.f32 %v1336_v5, %v460_v3  ;;  %v2019_v10 = vadd.f32 %v2018_v8, %v2017_v4  ;;  %v1908_v11 = vpop.f32.mrf.mxu0 }
 0x150   : > { %v2020_v13 = vpop.f32.mrf.mxu1 }
 0x151   : > { %1486 = vst [vmem:[#allocation2 + $0x18] sm:$0xff] %v1454_v9  ;;  %v1341_v14 = vadd.f32 %v2019_v10, %v1907_v7  ;;  %v1909_v15 = vpop.f32.mrf.mxu0 }
 0x152   : > { %v1910_v16 = vadd.f32 %v1909_v15, %v1908_v11  ;;  %v2021_v17 = vpop.f32.mrf.mxu1  ;;  %v468_v11 = vld [vmem:[#allocation2 + $0xb8] sm:$0xff] }
 0x153   : > { %v1455_v18 = vadd.f32 %v1341_v14, %v461_v12  ;;  %v2022_v19 = vadd.f32 %v2021_v17, %v2020_v13  ;;  %v1911_v20 = vpop.f32.mrf.mxu0 }
 0x154   : > { %v2023_v22 = vpop.f32.mrf.mxu1 }
 0x155   : > { %1487 = vst [vmem:[#allocation2 + $0x50] sm:$0xff] %v1455_v18  ;;  %v1344_v23 = vadd.f32 %v2022_v19, %v1910_v16  ;;  %v1912_v24 = vpop.f32.mrf.mxu0 }
 0x156   : > { %v1913_v25 = vadd.f32 %v1912_v24, %v1911_v20  ;;  %v2024_v26 = vpop.f32.mrf.mxu1  ;;  %v469_v20 = vld [vmem:[#allocation2 + $0x60] sm:$0xff] }
 0x157   : > { %v1456_v27 = vadd.f32 %v1344_v23, %v462_v21  ;;  %v2025_v28 = vadd.f32 %v2024_v26, %v2023_v22  ;;  %v1914_v29 = vpop.f32.mrf.mxu0 }
 0x158   : > { %v2026_v31 = vpop.f32.mrf.mxu1 }
 0x159   : > { %1488 = vst [vmem:[#allocation2 + $0x68] sm:$0xff] %v1456_v27  ;;  %v1349_v32 = vadd.f32 %v2025_v28, %v1913_v25  ;;  %v1915_v33 = vpop.f32.mrf.mxu0 }
 0x15a   : > { %v1916_v34 = vadd.f32 %v1915_v33, %v1914_v29  ;;  %v2027_v35 = vpop.f32.mrf.mxu1  ;;  %v470_v29 = vld [vmem:[#allocation2 + $0xf0] sm:$0xff] }
 0x15b   : > { %v1457_v36 = vadd.f32 %v1349_v32, %v463_v30  ;;  %v2028_v37 = vadd.f32 %v2027_v35, %v2026_v31  ;;  %v1917_v38 = vpop.f32.mrf.mxu0 }
 0x15c   : > { %v2029_v40 = vpop.f32.mrf.mxu1 }
 0x15d   : > { %1489 = vst [vmem:[#allocation2 + $0x30] sm:$0xff] %v1457_v36  ;;  %v1352_v41 = vadd.f32 %v2028_v37, %v1916_v34  ;;  %v1918_v42 = vpop.f32.mrf.mxu0 }
 0x15e   : > { %v1919_v43 = vadd.f32 %v1918_v42, %v1917_v38  ;;  %v2030_v44 = vpop.f32.mrf.mxu1  ;;  %v471_v38 = vld [vmem:[#allocation2 + $0x8] sm:$0xff] }
 0x15f   : > { %v1458_v45 = vadd.f32 %v1352_v41, %v464_v39  ;;  %v2031_v46 = vadd.f32 %v2030_v44, %v2029_v40  ;;  %v1920_v47 = vpop.f32.mrf.mxu0 }
 0x160   : > { %v2032_v49 = vpop.f32.mrf.mxu1 }
 0x161   : > { %1490 = vst [vmem:[#allocation2 + $0x48] sm:$0xff] %v1458_v45  ;;  %v1357_v50 = vadd.f32 %v2031_v46, %v1919_v43  ;;  %v1921_v51 = vpop.f32.mrf.mxu0 }
 0x162   : > { %v1922_v52 = vadd.f32 %v1921_v51, %v1920_v47  ;;  %v2033_v53 = vpop.f32.mrf.mxu1  ;;  %v472_v47 = vld [vmem:[#allocation2 + $0x78] sm:$0xff] }
 0x163   : > { %v1459_v54 = vadd.f32 %v1357_v50, %v465_v48  ;;  %v2034_v55 = vadd.f32 %v2033_v53, %v2032_v49  ;;  %v1923_v56 = vpop.f32.mrf.mxu0 }
 0x164   : > { %v2035_v58 = vpop.f32.mrf.mxu1 }
 0x165   : > { %1491 = vst [vmem:[#allocation2 + $0x80] sm:$0xff] %v1459_v54  ;;  %v1360_v59 = vadd.f32 %v2034_v55, %v1922_v52  ;;  %v1924_v60 = vpop.f32.mrf.mxu0 }
 0x166   : > { %v1925_v61 = vadd.f32 %v1924_v60, %v1923_v56  ;;  %v2036_v62 = vpop.f32.mrf.mxu1  ;;  %v473_v56 = vld [vmem:[#allocation2 + $0x38] sm:$0xff] }
 0x167   : > { %v1460_v63 = vadd.f32 %v1360_v59, %v466_v57  ;;  %v2037_v0 = vadd.f32 %v2036_v62, %v2035_v58  ;;  %v1926_v1 = vpop.f32.mrf.mxu0 }
 0x168   : > { %v2038_v3 = vpop.f32.mrf.mxu1 }
 0x169   : > { %1492 = vst [vmem:[#allocation2 + $0x88] sm:$0xff] %v1460_v63  ;;  %v1365_v4 = vadd.f32 %v2037_v0, %v1925_v61  ;;  %v1927_v5 = vpop.f32.mrf.mxu0 }
 0x16a   : > { %v1928_v6 = vadd.f32 %v1927_v5, %v1926_v1  ;;  %v2039_v7 = vpop.f32.mrf.mxu1  ;;  %v474_v1 = vld [vmem:[#allocation2 + $0x58] sm:$0xff] }
 0x16b   : > { %v1461_v8 = vadd.f32 %v1365_v4, %v467_v2  ;;  %v2040_v9 = vadd.f32 %v2039_v7, %v2038_v3  ;;  %v1929_v10 = vpop.f32.mrf.mxu0 }
 0x16c   : > { %v2041_v12 = vpop.f32.mrf.mxu1 }
 0x16d   : > { %1493 = vst [vmem:[#allocation2 + $0xe8] sm:$0xff] %v1461_v8  ;;  %v1368_v13 = vadd.f32 %v2040_v9, %v1928_v6  ;;  %v1930_v14 = vpop.f32.mrf.mxu0 }
 0x16e   : > { %v1931_v15 = vadd.f32 %v1930_v14, %v1929_v10  ;;  %v2042_v16 = vpop.f32.mrf.mxu1  ;;  %v475_v10 = vld [vmem:[#allocation2 + $0x40] sm:$0xff] }
 0x16f   : > { %v1462_v17 = vadd.f32 %v1368_v13, %v468_v11  ;;  %v2043_v18 = vadd.f32 %v2042_v16, %v2041_v12  ;;  %v1932_v19 = vpop.f32.mrf.mxu0 }
 0x170   : > { %v2044_v21 = vpop.f32.mrf.mxu1 }
 0x171   : > { %1494 = vst [vmem:[#allocation2 + $0xb8] sm:$0xff] %v1462_v17  ;;  %v1373_v22 = vadd.f32 %v2043_v18, %v1931_v15  ;;  %v1933_v23 = vpop.f32.mrf.mxu0 }
 0x172   : > { %v1934_v24 = vadd.f32 %v1933_v23, %v1932_v19  ;;  %v2045_v25 = vpop.f32.mrf.mxu1  ;;  %v476_v19 = vld [vmem:[#allocation2 + $0xc8] sm:$0xff] }
 0x173   : > { %v1463_v26 = vadd.f32 %v1373_v22, %v469_v20  ;;  %v2046_v27 = vadd.f32 %v2045_v25, %v2044_v21  ;;  %v1935_v28 = vpop.f32.mrf.mxu0 }
 0x174   : > { %v2047_v30 = vpop.f32.mrf.mxu1 }
 0x175   : > { %1495 = vst [vmem:[#allocation2 + $0x60] sm:$0xff] %v1463_v26  ;;  %v1376_v31 = vadd.f32 %v2046_v27, %v1934_v24  ;;  %v1936_v32 = vpop.f32.mrf.mxu0 }
 0x176   : > { %v1937_v33 = vadd.f32 %v1936_v32, %v1935_v28  ;;  %v2048_v34 = vpop.f32.mrf.mxu1  ;;  %v477_v28 = vld [vmem:[#allocation2 + $0xe0] sm:$0xff] }
 0x177   : > { %v1464_v35 = vadd.f32 %v1376_v31, %v470_v29  ;;  %v2049_v36 = vadd.f32 %v2048_v34, %v2047_v30  ;;  %v1938_v37 = vpop.f32.mrf.mxu0 }
 0x178   : > { %v2050_v39 = vpop.f32.mrf.mxu1 }
 0x179   : > { %1496 = vst [vmem:[#allocation2 + $0xf0] sm:$0xff] %v1464_v35  ;;  %v1381_v40 = vadd.f32 %v2049_v36, %v1937_v33  ;;  %v1939_v41 = vpop.f32.mrf.mxu0 }
 0x17a   : > { %v1940_v42 = vadd.f32 %v1939_v41, %v1938_v37  ;;  %v2051_v43 = vpop.f32.mrf.mxu1  ;;  %v478_v37 = vld [vmem:[#allocation2 + $0x90] sm:$0xff] }
 0x17b   : > { %v1465_v44 = vadd.f32 %v1381_v40, %v471_v38  ;;  %v2052_v45 = vadd.f32 %v2051_v43, %v2050_v39  ;;  %v1941_v46 = vpop.f32.mrf.mxu0 }
 0x17c   : > { %v2053_v48 = vpop.f32.mrf.mxu1 }
 0x17d   : > { %1497 = vst [vmem:[#allocation2 + $0x8] sm:$0xff] %v1465_v44  ;;  %v1384_v49 = vadd.f32 %v2052_v45, %v1940_v42  ;;  %v1942_v50 = vpop.f32.mrf.mxu0 }
 0x17e   : > { %v1943_v51 = vadd.f32 %v1942_v50, %v1941_v46  ;;  %v2054_v52 = vpop.f32.mrf.mxu1  ;;  %v479_v46 = vld [vmem:[#allocation2 + $0x70] sm:$0xff] }
 0x17f   : > { %v1466_v53 = vadd.f32 %v1384_v49, %v472_v47  ;;  %v2055_v54 = vadd.f32 %v2054_v52, %v2053_v48  ;;  %v1944_v55 = vpop.f32.mrf.mxu0 }
 0x180   : > { %v2056_v57 = vpop.f32.mrf.mxu1 }
 0x181   : > { %1498 = vst [vmem:[#allocation2 + $0x78] sm:$0xff] %v1466_v53  ;;  %v1389_v58 = vadd.f32 %v2055_v54, %v1943_v51  ;;  %v1945_v59 = vpop.f32.mrf.mxu0 }
 0x182   : > { %v1946_v60 = vadd.f32 %v1945_v59, %v1944_v55  ;;  %v2057_v61 = vpop.f32.mrf.mxu1  ;;  %v480_v55 = vld [vmem:[#allocation2 + $0xc0] sm:$0xff] }
 0x183   : > { %v1467_v62 = vadd.f32 %v1389_v58, %v473_v56  ;;  %v2058_v63 = vadd.f32 %v2057_v61, %v2056_v57  ;;  %v1947_v0 = vpop.f32.mrf.mxu0 }
 0x184   : > { %v2059_v2 = vpop.f32.mrf.mxu1 }
 0x185   : > { %1499 = vst [vmem:[#allocation2 + $0x38] sm:$0xff] %v1467_v62  ;;  %v1392_v3 = vadd.f32 %v2058_v63, %v1946_v60  ;;  %v1948_v4 = vpop.f32.mrf.mxu0 }
 0x186   : > { %v1949_v5 = vadd.f32 %v1948_v4, %v1947_v0  ;;  %v2060_v6 = vpop.f32.mrf.mxu1  ;;  %v481_v0 = vld [vmem:[#allocation2 + $0xa8] sm:$0xff] }
 0x187   : > { %v1468_v7 = vadd.f32 %v1392_v3, %v474_v1  ;;  %v2061_v8 = vadd.f32 %v2060_v6, %v2059_v2  ;;  %v1950_v9 = vpop.f32.mrf.mxu0 }
 0x188   : > { %v2062_v11 = vpop.f32.mrf.mxu1 }
 0x189   : > { %1500 = vst [vmem:[#allocation2 + $0x58] sm:$0xff] %v1468_v7  ;;  %v1397_v12 = vadd.f32 %v2061_v8, %v1949_v5  ;;  %v1951_v13 = vpop.f32.mrf.mxu0 }
 0x18a   : > { %v1952_v14 = vadd.f32 %v1951_v13, %v1950_v9  ;;  %v2063_v15 = vpop.f32.mrf.mxu1  ;;  %v482_v9 = vld [vmem:[#allocation2 + $0xd0] sm:$0xff] }
 0x18b   : > { %v1469_v16 = vadd.f32 %v1397_v12, %v475_v10  ;;  %v2064_v17 = vadd.f32 %v2063_v15, %v2062_v11  ;;  %v1953_v18 = vpop.f32.mrf.mxu0 }
 0x18c   : > { %v2065_v20 = vpop.f32.mrf.mxu1 }
 0x18d   : > { %1501 = vst [vmem:[#allocation2 + $0x40] sm:$0xff] %v1469_v16  ;;  %v1400_v21 = vadd.f32 %v2064_v17, %v1952_v14  ;;  %v1954_v22 = vpop.f32.mrf.mxu0 }
 0x18e   : > { %v1955_v23 = vadd.f32 %v1954_v22, %v1953_v18  ;;  %v2066_v24 = vpop.f32.mrf.mxu1  ;;  %v483_v18 = vld [vmem:[#allocation2 + $0x10] sm:$0xff] }
 0x18f   : > { %v1470_v25 = vadd.f32 %v1400_v21, %v476_v19  ;;  %v2067_v26 = vadd.f32 %v2066_v24, %v2065_v20  ;;  %v1956_v27 = vpop.f32.mrf.mxu0 }
 0x190   : > { %v2068_v29 = vpop.f32.mrf.mxu1 }
 0x191   : > { %1502 = vst [vmem:[#allocation2 + $0xc8] sm:$0xff] %v1470_v25  ;;  %v1405_v30 = vadd.f32 %v2067_v26, %v1955_v23  ;;  %v1957_v31 = vpop.f32.mrf.mxu0 }
 0x192   : > { %v1958_v32 = vadd.f32 %v1957_v31, %v1956_v27  ;;  %v2069_v33 = vpop.f32.mrf.mxu1  ;;  %v484_v27 = vld [vmem:[#allocation2 + $0x28] sm:$0xff] }
 0x193   : > { %v1471_v34 = vadd.f32 %v1405_v30, %v477_v28  ;;  %v2070_v35 = vadd.f32 %v2069_v33, %v2068_v29  ;;  %v1959_v36 = vpop.f32.mrf.mxu0 }
 0x194   : > { %v2071_v38 = vpop.f32.mrf.mxu1 }
 0x195   : > { %1503 = vst [vmem:[#allocation2 + $0xe0] sm:$0xff] %v1471_v34  ;;  %v1408_v39 = vadd.f32 %v2070_v35, %v1958_v32  ;;  %v1960_v40 = vpop.f32.mrf.mxu0 }
 0x196   : > { %v1961_v41 = vadd.f32 %v1960_v40, %v1959_v36  ;;  %v2072_v42 = vpop.f32.mrf.mxu1  ;;  %v485_v36 = vld [vmem:[#allocation2 + $0xa0] sm:$0xff] }
 0x197   : > { %v1472_v43 = vadd.f32 %v1408_v39, %v478_v37  ;;  %v2073_v44 = vadd.f32 %v2072_v42, %v2071_v38  ;;  %v1962_v45 = vpop.f32.mrf.mxu0 }
 0x198   : > { %v2074_v47 = vpop.f32.mrf.mxu1 }
 0x199   : > { %1504 = vst [vmem:[#allocation2 + $0x90] sm:$0xff] %v1472_v43  ;;  %v1413_v48 = vadd.f32 %v2073_v44, %v1961_v41  ;;  %v1963_v49 = vpop.f32.mrf.mxu0 }
 0x19a   : > { %v1964_v50 = vadd.f32 %v1963_v49, %v1962_v45  ;;  %v2075_v51 = vpop.f32.mrf.mxu1  ;;  %v486_v45 = vld [vmem:[#allocation2 + $0xf8] sm:$0xff] }
 0x19b   : > { %v1473_v52 = vadd.f32 %v1413_v48, %v479_v46  ;;  %v2076_v53 = vadd.f32 %v2075_v51, %v2074_v47  ;;  %v1965_v54 = vpop.f32.mrf.mxu0 }
 0x19c   : > { %v2077_v56 = vpop.f32.mrf.mxu1 }
 0x19d   : > { %1505 = vst [vmem:[#allocation2 + $0x70] sm:$0xff] %v1473_v52  ;;  %v1416_v57 = vadd.f32 %v2076_v53, %v1964_v50  ;;  %v1966_v58 = vpop.f32.mrf.mxu0 }
 0x19e   : > { %v1967_v59 = vadd.f32 %v1966_v58, %v1965_v54  ;;  %v2078_v60 = vpop.f32.mrf.mxu1  ;;  %v487_v54 = vld [vmem:[#allocation2 + $0x20] sm:$0xff] }
 0x19f   : > { %v1474_v61 = vadd.f32 %v1416_v57, %v480_v55  ;;  %v2079_v62 = vadd.f32 %v2078_v60, %v2077_v56  ;;  %v1968_v63 = vpop.f32.mrf.mxu0 }
 0x1a0   : > { %v2080_v1 = vpop.f32.mrf.mxu1 }
 0x1a1   : > { %1506 = vst [vmem:[#allocation2 + $0xc0] sm:$0xff] %v1474_v61  ;;  %v1421_v2 = vadd.f32 %v2079_v62, %v1967_v59  ;;  %v1969_v3 = vpop.f32.mrf.mxu0  ;;  %v488_v62 = vld [vmem:[#allocation2 + $0x98] sm:$0xff] }
 0x1a2   : > { %v1970_v4 = vadd.f32 %v1969_v3, %v1968_v63  ;;  %v2081_v5 = vpop.f32.mrf.mxu1 }
 0x1a3   : > { %v1475_v6 = vadd.f32 %v1421_v2, %v481_v0  ;;  %v2082_v7 = vadd.f32 %v2081_v5, %v2080_v1  ;;  %v1971_v8 = vpop.f32.mrf.mxu0 }
 0x1a4   : > { %v2083_v10 = vpop.f32.mrf.mxu1 }
 0x1a5   : > { %1507 = vst [vmem:[#allocation2 + $0xa8] sm:$0xff] %v1475_v6  ;;  %v1424_v11 = vadd.f32 %v2082_v7, %v1970_v4  ;;  %v1972_v12 = vpop.f32.mrf.mxu0 }
 0x1a6   : > { %v1973_v13 = vadd.f32 %v1972_v12, %v1971_v8  ;;  %v2084_v14 = vpop.f32.mrf.mxu1 }
 0x1a7   : > { %v1476_v15 = vadd.f32 %v1424_v11, %v482_v9  ;;  %v2085_v16 = vadd.f32 %v2084_v14, %v2083_v10  ;;  %v1974_v17 = vpop.f32.mrf.mxu0 }
 0x1a8   : > { %v2086_v19 = vpop.f32.mrf.mxu1 }
 0x1a9   : > { %1508 = vst [vmem:[#allocation2 + $0xd0] sm:$0xff] %v1476_v15  ;;  %v1429_v20 = vadd.f32 %v2085_v16, %v1973_v13  ;;  %v1975_v21 = vpop.f32.mrf.mxu0 }
 0x1aa   : > { %v1976_v22 = vadd.f32 %v1975_v21, %v1974_v17  ;;  %v2087_v23 = vpop.f32.mrf.mxu1 }
 0x1ab   : > { %v1477_v24 = vadd.f32 %v1429_v20, %v483_v18  ;;  %v2088_v25 = vadd.f32 %v2087_v23, %v2086_v19  ;;  %v1977_v26 = vpop.f32.mrf.mxu0 }
 0x1ac   : > { %v2089_v28 = vpop.f32.mrf.mxu1 }
 0x1ad   : > { %1509 = vst [vmem:[#allocation2 + $0x10] sm:$0xff] %v1477_v24  ;;  %v1432_v29 = vadd.f32 %v2088_v25, %v1976_v22  ;;  %v1978_v30 = vpop.f32.mrf.mxu0 }
 0x1ae   : > { %v1979_v31 = vadd.f32 %v1978_v30, %v1977_v26  ;;  %v2090_v32 = vpop.f32.mrf.mxu1 }
 0x1af   : > { %v1478_v33 = vadd.f32 %v1432_v29, %v484_v27  ;;  %v2091_v34 = vadd.f32 %v2090_v32, %v2089_v28  ;;  %v1980_v35 = vpop.f32.mrf.mxu0 }
 0x1b0   : > { %v2092_v37 = vpop.f32.mrf.mxu1 }
 0x1b1   : > { %1510 = vst [vmem:[#allocation2 + $0x28] sm:$0xff] %v1478_v33  ;;  %v1437_v38 = vadd.f32 %v2091_v34, %v1979_v31  ;;  %v1981_v39 = vpop.f32.mrf.mxu0 }
 0x1b2   : > { %v1982_v40 = vadd.f32 %v1981_v39, %v1980_v35  ;;  %v2093_v41 = vpop.f32.mrf.mxu1 }
 0x1b3   : > { %v1479_v42 = vadd.f32 %v1437_v38, %v485_v36  ;;  %v2094_v43 = vadd.f32 %v2093_v41, %v2092_v37  ;;  %v1983_v44 = vpop.f32.mrf.mxu0 }
 0x1b4   : > { %v2095_v46 = vpop.f32.mrf.mxu1 }
 0x1b5   : > { %1511 = vst [vmem:[#allocation2 + $0xa0] sm:$0xff] %v1479_v42  ;;  %v1440_v47 = vadd.f32 %v2094_v43, %v1982_v40  ;;  %v1984_v48 = vpop.f32.mrf.mxu0 }
 0x1b6   : > { %v1985_v49 = vadd.f32 %v1984_v48, %v1983_v44  ;;  %v2096_v50 = vpop.f32.mrf.mxu1 }
 0x1b7   : > { %v1480_v51 = vadd.f32 %v1440_v47, %v486_v45  ;;  %v2097_v52 = vadd.f32 %v2096_v50, %v2095_v46  ;;  %v1986_v53 = vpop.f32.mrf.mxu0 }
 0x1b8   : > { %v2098_v55 = vpop.f32.mrf.mxu1 }
 0x1b9   : > { %1512 = vst [vmem:[#allocation2 + $0xf8] sm:$0xff] %v1480_v51  ;;  %v1445_v56 = vadd.f32 %v2097_v52, %v1985_v49  ;;  %v1987_v57 = vpop.f32.mrf.mxu0 }
 0x1ba   : > { %v1988_v58 = vadd.f32 %v1987_v57, %v1986_v53  ;;  %v2099_v59 = vpop.f32.mrf.mxu1 }
 0x1bb   : > { %v1481_v60 = vadd.f32 %v1445_v56, %v487_v54  ;;  %v2100_v61 = vadd.f32 %v2099_v59, %v2098_v55 }
 0x1bd   : > { %1513 = vst [vmem:[#allocation2 + $0x20] sm:$0xff] %v1481_v60  ;;  %v1448_v63 = vadd.f32 %v2100_v61, %v1988_v58  ;;  %1518 = sbr.rel (%p1872_p13) target bundleno = 469 (0x1d5), region = 63 }
 0x1bf   : > { %v1482_v0 = vadd.f32 %v1448_v63, %v488_v62 }
 0x1c1   : > { %1514 = vst [vmem:[#allocation2 + $0x98] sm:$0xff] %v1482_v0 }
 0x1c2   : > { %v1519_v1 = vld [vmem:[#allocation2 + $0xb0] sm:$0xff]  ;;  %v2674_v2 = vld [vmem:[%s2763_s2] ss:$0 sm:$0xff]  ;;  %v1521_v6 = vld [vmem:[#allocation2 + $0xd8] sm:$0xff] }
 0x1c3   : > { %v1520_v3 = vld [vmem:[#allocation2] sm:$0xff]  ;;  %v1558_v4 = vadd.f32 %v2674_v2, %v1519_v1  ;;  %v1522_v7 = vld [vmem:[#allocation2 + $0x18] sm:$0xff]  ;;  %v1523_v8 = vld [vmem:[#allocation2 + $0x50] sm:$0xff]  ;;  %v1560_v9 = vadd.f32 %v2674_v2, %v1521_v6 }
 0x1c4   : > { %v1559_v5 = vadd.f32 %v2674_v2, %v1520_v3  ;;  %v1561_v10 = vadd.f32 %v2674_v2, %v1522_v7  ;;  %v1562_v11 = vadd.f32 %v2674_v2, %v1523_v8  ;;  %v1524_v12 = vld [vmem:[#allocation2 + $0x68] sm:$0xff]  ;;  %v1525_v13 = vld [vmem:[#allocation2 + $0x30] sm:$0xff]  ;;  %v1527_v18 = vld [vmem:[#allocation2 + $0x80] sm:$0xff] }
 0x1c5   : > { %v1526_v14 = vld [vmem:[#allocation2 + $0x48] sm:$0xff]  ;;  %1590 = vst [vmem:[%s2569_s29] sm:$0xff] %v1558_v4  ;;  %v1563_v15 = vadd.f32 %v2674_v2, %v1524_v12  ;;  %v1564_v16 = vadd.f32 %v2674_v2, %v1525_v13  ;;  %1592 = vst [vmem:[%s2569_s29 + $0x10] sm:$0xff] %v1560_v9  ;;  %v1566_v21 = vadd.f32 %v2674_v2, %v1527_v18  ;;  %v1530_v24 = vld [vmem:[#allocation2 + $0xb8] sm:$0xff] }
 0x1c6   : > { %1591 = vst [vmem:[%s2569_s29 + $0x8] sm:$0xff] %v1559_v5  ;;  %v1565_v17 = vadd.f32 %v2674_v2, %v1526_v14  ;;  %v1528_v19 = vld [vmem:[#allocation2 + $0x88] sm:$0xff]  ;;  %1593 = vst [vmem:[%s2569_s29 + $0x18] sm:$0xff] %v1561_v10  ;;  %v1531_v25 = vld [vmem:[#allocation2 + $0x60] sm:$0xff]  ;;  %v1569_v27 = vadd.f32 %v2674_v2, %v1530_v24 }
 0x1c7   : > { %v1529_v20 = vld [vmem:[#allocation2 + $0xe8] sm:$0xff]  ;;  %1594 = vst [vmem:[%s2569_s29 + $0x20] sm:$0xff] %v1562_v11  ;;  %v1567_v22 = vadd.f32 %v2674_v2, %v1528_v19  ;;  %v1532_v26 = vld [vmem:[#allocation2 + $0xf0] sm:$0xff]  ;;  %1595 = vst [vmem:[%s2569_s29 + $0x28] sm:$0xff] %v1563_v15  ;;  %v1570_v28 = vadd.f32 %v2674_v2, %v1531_v25 }
 0x1c8   : > { %v1568_v23 = vadd.f32 %v2674_v2, %v1529_v20  ;;  %1596 = vst [vmem:[%s2569_s29 + $0x30] sm:$0xff] %v1564_v16  ;;  %1597 = vst [vmem:[%s2569_s29 + $0x38] sm:$0xff] %v1565_v17  ;;  %v1571_v29 = vadd.f32 %v2674_v2, %v1532_v26  ;;  %v1533_v30 = vld [vmem:[#allocation2 + $0x8] sm:$0xff]  ;;  %v1534_v31 = vld [vmem:[#allocation2 + $0x78] sm:$0xff] }
 0x1c9   : > { %v1535_v32 = vld [vmem:[#allocation2 + $0x38] sm:$0xff]  ;;  %1598 = vst [vmem:[%s2569_s29 + $0x40] sm:$0xff] %v1566_v21  ;;  %1599 = vst [vmem:[%s2569_s29 + $0x48] sm:$0xff] %v1567_v22  ;;  %v1572_v33 = vadd.f32 %v2674_v2, %v1533_v30  ;;  %v1573_v34 = vadd.f32 %v2674_v2, %v1534_v31  ;;  %v1537_v37 = vld [vmem:[#allocation2 + $0x40] sm:$0xff] }
 0x1ca   : > { %1600 = vst [vmem:[%s2569_s29 + $0x50] sm:$0xff] %v1568_v23  ;;  %v1574_v35 = vadd.f32 %v2674_v2, %v1535_v32  ;;  %v1536_v36 = vld [vmem:[#allocation2 + $0x58] sm:$0xff]  ;;  %v1538_v38 = vld [vmem:[#allocation2 + $0xc8] sm:$0xff]  ;;  %1601 = vst [vmem:[%s2569_s29 + $0x58] sm:$0xff] %v1569_v27  ;;  %v1576_v40 = vadd.f32 %v2674_v2, %v1537_v37 }
 0x1cb   : > { %1602 = vst [vmem:[%s2569_s29 + $0x60] sm:$0xff] %v1570_v28  ;;  %1603 = vst [vmem:[%s2569_s29 + $0x68] sm:$0xff] %v1571_v29  ;;  %v1575_v39 = vadd.f32 %v2674_v2, %v1536_v36  ;;  %v1577_v41 = vadd.f32 %v2674_v2, %v1538_v38  ;;  %v1539_v42 = vld [vmem:[#allocation2 + $0xe0] sm:$0xff]  ;;  %v1540_v43 = vld [vmem:[#allocation2 + $0x90] sm:$0xff] }
 0x1cc   : > { %v1541_v44 = vld [vmem:[#allocation2 + $0x70] sm:$0xff]  ;;  %1604 = vst [vmem:[%s2569_s29 + $0x70] sm:$0xff] %v1572_v33  ;;  %1605 = vst [vmem:[%s2569_s29 + $0x78] sm:$0xff] %v1573_v34  ;;  %v1578_v45 = vadd.f32 %v2674_v2, %v1539_v42  ;;  %v1579_v46 = vadd.f32 %v2674_v2, %v1540_v43  ;;  %v1542_v48 = vld [vmem:[#allocation2 + $0xc0] sm:$0xff] }
 0x1cd   : > { %1606 = vst [vmem:[%s2569_s29 + $0x80] sm:$0xff] %v1574_v35  ;;  %v1580_v47 = vadd.f32 %v2674_v2, %v1541_v44  ;;  %v1543_v49 = vld [vmem:[#allocation2 + $0xa8] sm:$0xff]  ;;  %v1544_v50 = vld [vmem:[#allocation2 + $0xd0] sm:$0xff]  ;;  %1607 = vst [vmem:[%s2569_s29 + $0x88] sm:$0xff] %v1575_v39  ;;  %v1581_v51 = vadd.f32 %v2674_v2, %v1542_v48 }
 0x1ce   : > { %1608 = vst [vmem:[%s2569_s29 + $0x90] sm:$0xff] %v1576_v40  ;;  %1609 = vst [vmem:[%s2569_s29 + $0x98] sm:$0xff] %v1577_v41  ;;  %v1582_v52 = vadd.f32 %v2674_v2, %v1543_v49  ;;  %v1583_v53 = vadd.f32 %v2674_v2, %v1544_v50  ;;  %v1545_v54 = vld [vmem:[#allocation2 + $0x10] sm:$0xff]  ;;  %v1546_v55 = vld [vmem:[#allocation2 + $0x28] sm:$0xff] }
 0x1cf   : > { %v1547_v56 = vld [vmem:[#allocation2 + $0xa0] sm:$0xff]  ;;  %1610 = vst [vmem:[%s2569_s29 + $0xa0] sm:$0xff] %v1578_v45  ;;  %1611 = vst [vmem:[%s2569_s29 + $0xa8] sm:$0xff] %v1579_v46  ;;  %v1584_v57 = vadd.f32 %v2674_v2, %v1545_v54  ;;  %v1585_v58 = vadd.f32 %v2674_v2, %v1546_v55  ;;  %v1548_v60 = vld [vmem:[#allocation2 + $0xf8] sm:$0xff] }
 0x1d0   : > { %1612 = vst [vmem:[%s2569_s29 + $0xb0] sm:$0xff] %v1580_v47  ;;  %v1586_v59 = vadd.f32 %v2674_v2, %v1547_v56  ;;  %v1549_v61 = vld [vmem:[#allocation2 + $0x20] sm:$0xff]  ;;  %v1550_v62 = vld [vmem:[#allocation2 + $0x98] sm:$0xff]  ;;  %1613 = vst [vmem:[%s2569_s29 + $0xb8] sm:$0xff] %v1581_v51  ;;  %v1587_v63 = vadd.f32 %v2674_v2, %v1548_v60 }
 0x1d1   : > { %1614 = vst [vmem:[%s2569_s29 + $0xc0] sm:$0xff] %v1582_v52  ;;  %1615 = vst [vmem:[%s2569_s29 + $0xc8] sm:$0xff] %v1583_v53  ;;  %v1588_v0 = vadd.f32 %v2674_v2, %v1549_v61  ;;  %v1589_v1 = vadd.f32 %v2674_v2, %v1550_v62 }
 0x1d2   : > { %1616 = vst [vmem:[%s2569_s29 + $0xd0] sm:$0xff] %v1584_v57  ;;  %1617 = vst [vmem:[%s2569_s29 + $0xd8] sm:$0xff] %v1585_v58 }
 0x1d3   : > { %1618 = vst [vmem:[%s2569_s29 + $0xe0] sm:$0xff] %v1586_v59  ;;  %1619 = vst [vmem:[%s2569_s29 + $0xe8] sm:$0xff] %v1587_v63 }
 0x1d4   : > { %1620 = vst [vmem:[%s2569_s29 + $0xf0] sm:$0xff] %v1588_v0  ;;  %1621 = vst [vmem:[%s2569_s29 + $0xf8] sm:$0xff] %v1589_v1 }
 0x1d5 PF: > { %s13_s18 = sadd.s32 1, %s2340_s18   ;;  %s2765_s12 = smov %s2320_s13 }
 0x1d6   : > { %p10_p0 = scmp.ge.s32.totalorder %s13_s18, 10   ;;  %s2766_s13 = smov %s2414_s25 }
 0x1d7   : > { %s2767_s14 = smov %s2332_s16  ;;  %s2768_s15 = smov %s2336_s17 }
 0x1d8   : > { %s2769_s16 = smov %s2772_s19  ;;  %s2770_s17 = smov %s2776_s20 }
 0x1d9   :  { %12 = sbr.rel (!%p10_p0) target bundleno = 4 (0x4), region = 104 }

</bundles_post_ra>
